<compile_context>
chip_gen: v5e
topology: v5e:2x2
jax: 0.10.0
libtpu: 0.0.40
codegen_flags: <defaults>
</compile_context>

<pallas_src>
import functools

import jax
import jax.numpy as jnp
from jax.experimental import pallas as pl
from jax.experimental.pallas import tpu as pltpu


# ----------------------------------------------------------------------------
# Fused Pallas kernel: encoder stack -> decoder stack -> Linear, one launch.
# ----------------------------------------------------------------------------
def _rnn_layer(x_list, w_ih, w_hh, b, h0):
    """One tanh-RNN layer, fully unrolled over time.

    x_list: list of T (B, In) f32 arrays.
    Returns (list of T (B, H) outputs, final hidden (B, H)).
    """
    # Hoisted input projections: independent of h, off the sequential path.
    xp = [jnp.dot(x, w_ih, preferred_element_type=jnp.float32) + b for x in x_list]
    h = h0
    ys = []
    for t in range(len(x_list)):
        h = jnp.tanh(xp[t] + jnp.dot(h, w_hh, preferred_element_type=jnp.float32))
        ys.append(h)
    return ys, h


def _seq2seq_kernel(num_layers, t_enc, t_dec, *refs):
    it = iter(refs)
    enc_x_ref = next(it)          # (B, T_enc, In0)
    dec_x_ref = next(it)          # (B, T_dec, In0)
    h0_ref = next(it)             # (L, B, H)
    enc_layers = [(next(it), next(it), next(it)) for _ in range(num_layers)]
    dec_layers = [(next(it), next(it), next(it)) for _ in range(num_layers)]
    fc_w_ref = next(it)           # (H, C)
    fc_b_ref = next(it)           # (1, C)
    out_ref = next(it)            # (B, T_dec, C)

    # ---- encoder: only the per-layer final hidden states are needed ----
    xv = enc_x_ref[...].astype(jnp.float32)
    x_list = [xv[:, t, :] for t in range(t_enc)]
    h_finals = []
    for l, (wih_ref, whh_ref, b_ref) in enumerate(enc_layers):
        x_list, h_last = _rnn_layer(
            x_list, wih_ref[...], whh_ref[...], b_ref[...],
            h0_ref[l].astype(jnp.float32))
        h_finals.append(h_last)

    # ---- decoder: seeded with the encoder's final hidden states ----
    xv = dec_x_ref[...].astype(jnp.float32)
    x_list = [xv[:, t, :] for t in range(t_dec)]
    for l, (wih_ref, whh_ref, b_ref) in enumerate(dec_layers):
        x_list, _ = _rnn_layer(
            x_list, wih_ref[...], whh_ref[...], b_ref[...], h_finals[l])

    # ---- fused final Linear: write logits directly (static time indices) ----
    fc_w = fc_w_ref[...]
    fc_b = fc_b_ref[...]
    for t in range(t_dec):
        logit_t = jnp.dot(x_list[t], fc_w, preferred_element_type=jnp.float32) + fc_b
        out_ref[:, t, :] = logit_t.astype(out_ref.dtype)


# ----------------------------------------------------------------------------
# Wrapper: one pallas_call for the whole forward pass (post-embedding).
# ----------------------------------------------------------------------------
def seq2seq_forward(params, enc_input, enc_hidden, dec_input):
    # Embedding lookups (gather = glue, plain JAX)
    enc_emb = jnp.take(params["embed1"], enc_input, axis=0)   # (B, T_enc, n_class)
    dec_emb = jnp.take(params["embed2"], dec_input, axis=0)   # (B, T_dec, n_class)

    B, t_enc, _ = enc_emb.shape
    t_dec = dec_emb.shape[1]
    num_layers = len(params["encoder"])
    H = params["encoder"][0][1].shape[0]
    C = params["fc_w"].shape[1]

    flat_inputs = [enc_emb, dec_emb, enc_hidden]
    for w_ih, w_hh, b in params["encoder"]:
        flat_inputs += [w_ih, w_hh, b]
    for w_ih, w_hh, b in params["decoder"]:
        flat_inputs += [w_ih, w_hh, b]
    flat_inputs += [params["fc_w"], params["fc_b"]]

    # Advisory cost estimate for the XLA scheduler.
    def _stack_flops(layers, t):
        f = 0
        for w_ih, w_hh, _ in layers:
            f += 2 * t * B * w_ih.shape[0] * w_ih.shape[1]   # x @ W_ih
            f += 2 * t * B * w_hh.shape[0] * w_hh.shape[1]   # h @ W_hh
        return f

    flops = (_stack_flops(params["encoder"], t_enc)
             + _stack_flops(params["decoder"], t_dec)
             + 2 * t_dec * B * H * C)
    transcendentals = num_layers * (t_enc + t_dec) * B * H      # tanh
    bytes_accessed = (sum(int(x.size) * x.dtype.itemsize for x in flat_inputs)
                      + B * t_dec * C * 4)

    kernel = functools.partial(_seq2seq_kernel, num_layers, t_enc, t_dec)
    logits = pl.pallas_call(
        kernel,
        out_shape=jax.ShapeDtypeStruct((B, t_dec, C), jnp.float32),
        # Whole arrays VMEM-resident (everything here totals < 1 MiB).
        in_specs=[pl.BlockSpec(memory_space=pltpu.MemorySpace.VMEM)
                  for _ in flat_inputs],
        out_specs=pl.BlockSpec(memory_space=pltpu.MemorySpace.VMEM),
        cost_estimate=pl.CostEstimate(
            flops=flops,
            transcendentals=transcendentals,
            bytes_accessed=bytes_accessed),
    )(*flat_inputs)
    return logits


# ----------------------------------------------------------------------------
# Parameter construction (deterministic, PyTorch-style uniform init)
# ----------------------------------------------------------------------------
def make_params(key, ivocab_size, n_class, n_hidden, num_layers):
    keys = iter(jax.random.split(key, 64))
    u = lambda k, shape, bound: jax.random.uniform(
        k, shape, jnp.float32, minval=-bound, maxval=bound)

    params = {
        "embed1": jax.random.normal(next(keys), (ivocab_size, n_class), jnp.float32),
        "embed2": jax.random.normal(next(keys), (ivocab_size, n_class), jnp.float32),
    }
    bound = 1.0 / float(jnp.sqrt(n_hidden))

    def rnn_stack():
        layers = []
        for l in range(num_layers):
            in_dim = n_class if l == 0 else n_hidden
            w_ih = u(next(keys), (in_dim, n_hidden), bound)     # stored (in, out)
            w_hh = u(next(keys), (n_hidden, n_hidden), bound)
            b_ih = u(next(keys), (1, n_hidden), bound)
            b_hh = u(next(keys), (1, n_hidden), bound)
            layers.append((w_ih, w_hh, b_ih + b_hh))
        return layers

    params["encoder"] = rnn_stack()
    params["decoder"] = rnn_stack()
    params["fc_w"] = u(next(keys), (n_hidden, n_class), bound)  # stored (in, out)
    params["fc_b"] = u(next(keys), (1, n_class), bound)
    return params


# ----------------------------------------------------------------------------
# Pure-JAX reference (silent numerical verification)
# ----------------------------------------------------------------------------
def _ref_forward(params, enc_input, enc_hidden, dec_input):
    hi = jax.lax.Precision.HIGHEST

    def rnn_stack(x, layers, h0):
        h_lasts = []
        for l, (w_ih, w_hh, b) in enumerate(layers):
            T = x.shape[1]
            h = h0[l]
            ys = []
            for t in range(T):
                h = jnp.tanh(jnp.dot(x[:, t], w_ih, precision=hi)
                             + jnp.dot(h, w_hh, precision=hi) + b)
                ys.append(h)
            x = jnp.stack(ys, axis=1)
            h_lasts.append(h)
        return x, jnp.stack(h_lasts, axis=0)

    enc_emb = jnp.take(params["embed1"], enc_input, axis=0)
    dec_emb = jnp.take(params["embed2"], dec_input, axis=0)
    _, h_t = rnn_stack(enc_emb, params["encoder"], enc_hidden)
    out, _ = rnn_stack(dec_emb, params["decoder"], h_t)
    return jnp.dot(out, params["fc_w"], precision=hi) + params["fc_b"]


# ----------------------------------------------------------------------------
if __name__ == "__main__":
    # Small, forward-consistent shapes (n_hidden matches the PyTorch spec).
    B = 2            # batch
    T_ENC = 8        # encoder sequence length
    T_DEC = 8        # decoder sequence length
    IVOCAB = 20      # len(ivocab)
    N_CLASS = 16     # n_class (= len(ovocab))
    N_HIDDEN = 128   # n_hidden (lane-dense)
    NUM_LAYERS = 3

    key = jax.random.PRNGKey(0)
    k_param, k_enc, k_dec, k_h0 = jax.random.split(key, 4)

    params = make_params(k_param, IVOCAB, N_CLASS, N_HIDDEN, NUM_LAYERS)

    enc_input = jax.random.randint(k_enc, (B, T_ENC), 0, IVOCAB, dtype=jnp.int32)
    dec_input = jax.random.randint(k_dec, (B, T_DEC), 0, IVOCAB, dtype=jnp.int32)
    enc_hidden = jax.random.normal(k_h0, (NUM_LAYERS, B, N_HIDDEN), jnp.float32)

    out = jax.jit(seq2seq_forward)(params, enc_input, enc_hidden, dec_input)
    out = jax.block_until_ready(out)

    ref = _ref_forward(params, enc_input, enc_hidden, dec_input)
    assert out.shape == (B, T_DEC, N_CLASS), out.shape
    assert jnp.allclose(out, ref, atol=2e-3, rtol=2e-3), (
        "mismatch vs reference: max abs err = "
        + str(float(jnp.max(jnp.abs(out - ref)))))

    print("KERNEL_OK")
</pallas_src>

<mosaic_0001>
module attributes {stable_mosaic.version = 11 : i64} {
  func.func @_seq2seq_kernel(%arg0: memref<2x8x16xf32, #tpu.memory_space<vmem>>, %arg1: memref<2x8x16xf32, #tpu.memory_space<vmem>>, %arg2: memref<3x2x128xf32, #tpu.memory_space<vmem>>, %arg3: memref<16x128xf32, #tpu.memory_space<vmem>>, %arg4: memref<128x128xf32, #tpu.memory_space<vmem>>, %arg5: memref<1x128xf32, #tpu.memory_space<vmem>>, %arg6: memref<128x128xf32, #tpu.memory_space<vmem>>, %arg7: memref<128x128xf32, #tpu.memory_space<vmem>>, %arg8: memref<1x128xf32, #tpu.memory_space<vmem>>, %arg9: memref<128x128xf32, #tpu.memory_space<vmem>>, %arg10: memref<128x128xf32, #tpu.memory_space<vmem>>, %arg11: memref<1x128xf32, #tpu.memory_space<vmem>>, %arg12: memref<16x128xf32, #tpu.memory_space<vmem>>, %arg13: memref<128x128xf32, #tpu.memory_space<vmem>>, %arg14: memref<1x128xf32, #tpu.memory_space<vmem>>, %arg15: memref<128x128xf32, #tpu.memory_space<vmem>>, %arg16: memref<128x128xf32, #tpu.memory_space<vmem>>, %arg17: memref<1x128xf32, #tpu.memory_space<vmem>>, %arg18: memref<128x128xf32, #tpu.memory_space<vmem>>, %arg19: memref<128x128xf32, #tpu.memory_space<vmem>>, %arg20: memref<1x128xf32, #tpu.memory_space<vmem>>, %arg21: memref<128x16xf32, #tpu.memory_space<vmem>>, %arg22: memref<1x16xf32, #tpu.memory_space<vmem>>, %arg23: memref<2x8x16xf32, #tpu.memory_space<vmem>>) attributes {dimension_semantics = [], scalar_prefetch = 0 : i64, scratch_operands = 0 : i64, tpu.core_type = #tpu.core_type<tc>} {
    %c0 = arith.constant 0 : index
    %c0_0 = arith.constant 0 : index
    %c0_1 = arith.constant 0 : index
    %0 = vector.load %arg0[%c0, %c0_0, %c0_1] : memref<2x8x16xf32, #tpu.memory_space<vmem>>, vector<2x8x16xf32>
    %1 = vector.extract_strided_slice %0 {offsets = [0, 0, 0], sizes = [2, 1, 16], strides = [1, 1, 1]} : vector<2x8x16xf32> to vector<2x1x16xf32>
    %2 = vector.shape_cast %1 : vector<2x1x16xf32> to vector<2x16xf32>
    %3 = vector.extract_strided_slice %0 {offsets = [0, 1, 0], sizes = [2, 1, 16], strides = [1, 1, 1]} : vector<2x8x16xf32> to vector<2x1x16xf32>
    %4 = vector.shape_cast %3 : vector<2x1x16xf32> to vector<2x16xf32>
    %5 = vector.extract_strided_slice %0 {offsets = [0, 2, 0], sizes = [2, 1, 16], strides = [1, 1, 1]} : vector<2x8x16xf32> to vector<2x1x16xf32>
    %6 = vector.shape_cast %5 : vector<2x1x16xf32> to vector<2x16xf32>
    %7 = vector.extract_strided_slice %0 {offsets = [0, 3, 0], sizes = [2, 1, 16], strides = [1, 1, 1]} : vector<2x8x16xf32> to vector<2x1x16xf32>
    %8 = vector.shape_cast %7 : vector<2x1x16xf32> to vector<2x16xf32>
    %9 = vector.extract_strided_slice %0 {offsets = [0, 4, 0], sizes = [2, 1, 16], strides = [1, 1, 1]} : vector<2x8x16xf32> to vector<2x1x16xf32>
    %10 = vector.shape_cast %9 : vector<2x1x16xf32> to vector<2x16xf32>
    %11 = vector.extract_strided_slice %0 {offsets = [0, 5, 0], sizes = [2, 1, 16], strides = [1, 1, 1]} : vector<2x8x16xf32> to vector<2x1x16xf32>
    %12 = vector.shape_cast %11 : vector<2x1x16xf32> to vector<2x16xf32>
    %13 = vector.extract_strided_slice %0 {offsets = [0, 6, 0], sizes = [2, 1, 16], strides = [1, 1, 1]} : vector<2x8x16xf32> to vector<2x1x16xf32>
    %14 = vector.shape_cast %13 : vector<2x1x16xf32> to vector<2x16xf32>
    %15 = vector.extract_strided_slice %0 {offsets = [0, 7, 0], sizes = [2, 1, 16], strides = [1, 1, 1]} : vector<2x8x16xf32> to vector<2x1x16xf32>
    %16 = vector.shape_cast %15 : vector<2x1x16xf32> to vector<2x16xf32>
    %c0_2 = arith.constant 0 : index
    %c0_3 = arith.constant 0 : index
    %17 = vector.load %arg3[%c0_2, %c0_3] : memref<16x128xf32, #tpu.memory_space<vmem>>, vector<16x128xf32>
    %c0_4 = arith.constant 0 : index
    %c0_5 = arith.constant 0 : index
    %18 = vector.load %arg4[%c0_4, %c0_5] : memref<128x128xf32, #tpu.memory_space<vmem>>, vector<128x128xf32>
    %c0_6 = arith.constant 0 : index
    %c0_7 = arith.constant 0 : index
    %19 = vector.load %arg5[%c0_6, %c0_7] : memref<1x128xf32, #tpu.memory_space<vmem>>, vector<1x128xf32>
    %c0_8 = arith.constant 0 : index
    %c0_9 = arith.constant 0 : index
    %c0_10 = arith.constant 0 : index
    %20 = vector.load %arg2[%c0_8, %c0_9, %c0_10] : memref<3x2x128xf32, #tpu.memory_space<vmem>>, vector<1x2x128xf32>
    %21 = vector.shape_cast %20 : vector<1x2x128xf32> to vector<2x128xf32>
    %cst = arith.constant dense<0.000000e+00> : vector<2x128xf32>
    %22 = tpu.matmul %2, %17, %cst {dimension_numbers = #tpu.dot_dimension_numbers<[1], [0], [0], [1], [0, 0, 1, 1], [], []>} : vector<2x16xf32>, vector<16x128xf32>, vector<2x128xf32> -> vector<2x128xf32>
    %23 = vector.broadcast %19 : vector<1x128xf32> to vector<2x128xf32>
    %24 = arith.addf %22, %23 : vector<2x128xf32>
    %cst_11 = arith.constant dense<0.000000e+00> : vector<2x128xf32>
    %25 = tpu.matmul %4, %17, %cst_11 {dimension_numbers = #tpu.dot_dimension_numbers<[1], [0], [0], [1], [0, 0, 1, 1], [], []>} : vector<2x16xf32>, vector<16x128xf32>, vector<2x128xf32> -> vector<2x128xf32>
    %26 = vector.broadcast %19 : vector<1x128xf32> to vector<2x128xf32>
    %27 = arith.addf %25, %26 : vector<2x128xf32>
    %cst_12 = arith.constant dense<0.000000e+00> : vector<2x128xf32>
    %28 = tpu.matmul %6, %17, %cst_12 {dimension_numbers = #tpu.dot_dimension_numbers<[1], [0], [0], [1], [0, 0, 1, 1], [], []>} : vector<2x16xf32>, vector<16x128xf32>, vector<2x128xf32> -> vector<2x128xf32>
    %29 = vector.broadcast %19 : vector<1x128xf32> to vector<2x128xf32>
    %30 = arith.addf %28, %29 : vector<2x128xf32>
    %cst_13 = arith.constant dense<0.000000e+00> : vector<2x128xf32>
    %31 = tpu.matmul %8, %17, %cst_13 {dimension_numbers = #tpu.dot_dimension_numbers<[1], [0], [0], [1], [0, 0, 1, 1], [], []>} : vector<2x16xf32>, vector<16x128xf32>, vector<2x128xf32> -> vector<2x128xf32>
    %32 = vector.broadcast %19 : vector<1x128xf32> to vector<2x128xf32>
    %33 = arith.addf %31, %32 : vector<2x128xf32>
    %cst_14 = arith.constant dense<0.000000e+00> : vector<2x128xf32>
    %34 = tpu.matmul %10, %17, %cst_14 {dimension_numbers = #tpu.dot_dimension_numbers<[1], [0], [0], [1], [0, 0, 1, 1], [], []>} : vector<2x16xf32>, vector<16x128xf32>, vector<2x128xf32> -> vector<2x128xf32>
    %35 = vector.broadcast %19 : vector<1x128xf32> to vector<2x128xf32>
    %36 = arith.addf %34, %35 : vector<2x128xf32>
    %cst_15 = arith.constant dense<0.000000e+00> : vector<2x128xf32>
    %37 = tpu.matmul %12, %17, %cst_15 {dimension_numbers = #tpu.dot_dimension_numbers<[1], [0], [0], [1], [0, 0, 1, 1], [], []>} : vector<2x16xf32>, vector<16x128xf32>, vector<2x128xf32> -> vector<2x128xf32>
    %38 = vector.broadcast %19 : vector<1x128xf32> to vector<2x128xf32>
    %39 = arith.addf %37, %38 : vector<2x128xf32>
    %cst_16 = arith.constant dense<0.000000e+00> : vector<2x128xf32>
    %40 = tpu.matmul %14, %17, %cst_16 {dimension_numbers = #tpu.dot_dimension_numbers<[1], [0], [0], [1], [0, 0, 1, 1], [], []>} : vector<2x16xf32>, vector<16x128xf32>, vector<2x128xf32> -> vector<2x128xf32>
    %41 = vector.broadcast %19 : vector<1x128xf32> to vector<2x128xf32>
    %42 = arith.addf %40, %41 : vector<2x128xf32>
    %cst_17 = arith.constant dense<0.000000e+00> : vector<2x128xf32>
    %43 = tpu.matmul %16, %17, %cst_17 {dimension_numbers = #tpu.dot_dimension_numbers<[1], [0], [0], [1], [0, 0, 1, 1], [], []>} : vector<2x16xf32>, vector<16x128xf32>, vector<2x128xf32> -> vector<2x128xf32>
    %44 = vector.broadcast %19 : vector<1x128xf32> to vector<2x128xf32>
    %45 = arith.addf %43, %44 : vector<2x128xf32>
    %cst_18 = arith.constant dense<0.000000e+00> : vector<2x128xf32>
    %46 = tpu.matmul %21, %18, %cst_18 {dimension_numbers = #tpu.dot_dimension_numbers<[1], [0], [0], [1], [0, 0, 1, 1], [], []>} : vector<2x128xf32>, vector<128x128xf32>, vector<2x128xf32> -> vector<2x128xf32>
    %47 = arith.addf %24, %46 : vector<2x128xf32>
    %48 = math.tanh %47 : vector<2x128xf32>
    %cst_19 = arith.constant dense<0.000000e+00> : vector<2x128xf32>
    %49 = tpu.matmul %48, %18, %cst_19 {dimension_numbers = #tpu.dot_dimension_numbers<[1], [0], [0], [1], [0, 0, 1, 1], [], []>} : vector<2x128xf32>, vector<128x128xf32>, vector<2x128xf32> -> vector<2x128xf32>
    %50 = arith.addf %27, %49 : vector<2x128xf32>
    %51 = math.tanh %50 : vector<2x128xf32>
    %cst_20 = arith.constant dense<0.000000e+00> : vector<2x128xf32>
    %52 = tpu.matmul %51, %18, %cst_20 {dimension_numbers = #tpu.dot_dimension_numbers<[1], [0], [0], [1], [0, 0, 1, 1], [], []>} : vector<2x128xf32>, vector<128x128xf32>, vector<2x128xf32> -> vector<2x128xf32>
    %53 = arith.addf %30, %52 : vector<2x128xf32>
    %54 = math.tanh %53 : vector<2x128xf32>
    %cst_21 = arith.constant dense<0.000000e+00> : vector<2x128xf32>
    %55 = tpu.matmul %54, %18, %cst_21 {dimension_numbers = #tpu.dot_dimension_numbers<[1], [0], [0], [1], [0, 0, 1, 1], [], []>} : vector<2x128xf32>, vector<128x128xf32>, vector<2x128xf32> -> vector<2x128xf32>
    %56 = arith.addf %33, %55 : vector<2x128xf32>
    %57 = math.tanh %56 : vector<2x128xf32>
    %cst_22 = arith.constant dense<0.000000e+00> : vector<2x128xf32>
    %58 = tpu.matmul %57, %18, %cst_22 {dimension_numbers = #tpu.dot_dimension_numbers<[1], [0], [0], [1], [0, 0, 1, 1], [], []>} : vector<2x128xf32>, vector<128x128xf32>, vector<2x128xf32> -> vector<2x128xf32>
    %59 = arith.addf %36, %58 : vector<2x128xf32>
    %60 = math.tanh %59 : vector<2x128xf32>
    %cst_23 = arith.constant dense<0.000000e+00> : vector<2x128xf32>
    %61 = tpu.matmul %60, %18, %cst_23 {dimension_numbers = #tpu.dot_dimension_numbers<[1], [0], [0], [1], [0, 0, 1, 1], [], []>} : vector<2x128xf32>, vector<128x128xf32>, vector<2x128xf32> -> vector<2x128xf32>
    %62 = arith.addf %39, %61 : vector<2x128xf32>
    %63 = math.tanh %62 : vector<2x128xf32>
    %cst_24 = arith.constant dense<0.000000e+00> : vector<2x128xf32>
    %64 = tpu.matmul %63, %18, %cst_24 {dimension_numbers = #tpu.dot_dimension_numbers<[1], [0], [0], [1], [0, 0, 1, 1], [], []>} : vector<2x128xf32>, vector<128x128xf32>, vector<2x128xf32> -> vector<2x128xf32>
    %65 = arith.addf %42, %64 : vector<2x128xf32>
    %66 = math.tanh %65 : vector<2x128xf32>
    %cst_25 = arith.constant dense<0.000000e+00> : vector<2x128xf32>
    %67 = tpu.matmul %66, %18, %cst_25 {dimension_numbers = #tpu.dot_dimension_numbers<[1], [0], [0], [1], [0, 0, 1, 1], [], []>} : vector<2x128xf32>, vector<128x128xf32>, vector<2x128xf32> -> vector<2x128xf32>
    %68 = arith.addf %45, %67 : vector<2x128xf32>
    %69 = math.tanh %68 : vector<2x128xf32>
    %c0_26 = arith.constant 0 : index
    %c0_27 = arith.constant 0 : index
    %70 = vector.load %arg6[%c0_26, %c0_27] : memref<128x128xf32, #tpu.memory_space<vmem>>, vector<128x128xf32>
    %c0_28 = arith.constant 0 : index
    %c0_29 = arith.constant 0 : index
    %71 = vector.load %arg7[%c0_28, %c0_29] : memref<128x128xf32, #tpu.memory_space<vmem>>, vector<128x128xf32>
    %c0_30 = arith.constant 0 : index
    %c0_31 = arith.constant 0 : index
    %72 = vector.load %arg8[%c0_30, %c0_31] : memref<1x128xf32, #tpu.memory_space<vmem>>, vector<1x128xf32>
    %c1 = arith.constant 1 : index
    %c0_32 = arith.constant 0 : index
    %c0_33 = arith.constant 0 : index
    %73 = vector.load %arg2[%c1, %c0_32, %c0_33] : memref<3x2x128xf32, #tpu.memory_space<vmem>>, vector<1x2x128xf32>
    %74 = vector.shape_cast %73 : vector<1x2x128xf32> to vector<2x128xf32>
    %cst_34 = arith.constant dense<0.000000e+00> : vector<2x128xf32>
    %75 = tpu.matmul %48, %70, %cst_34 {dimension_numbers = #tpu.dot_dimension_numbers<[1], [0], [0], [1], [0, 0, 1, 1], [], []>} : vector<2x128xf32>, vector<128x128xf32>, vector<2x128xf32> -> vector<2x128xf32>
    %76 = vector.broadcast %72 : vector<1x128xf32> to vector<2x128xf32>
    %77 = arith.addf %75, %76 : vector<2x128xf32>
    %cst_35 = arith.constant dense<0.000000e+00> : vector<2x128xf32>
    %78 = tpu.matmul %51, %70, %cst_35 {dimension_numbers = #tpu.dot_dimension_numbers<[1], [0], [0], [1], [0, 0, 1, 1], [], []>} : vector<2x128xf32>, vector<128x128xf32>, vector<2x128xf32> -> vector<2x128xf32>
    %79 = vector.broadcast %72 : vector<1x128xf32> to vector<2x128xf32>
    %80 = arith.addf %78, %79 : vector<2x128xf32>
    %cst_36 = arith.constant dense<0.000000e+00> : vector<2x128xf32>
    %81 = tpu.matmul %54, %70, %cst_36 {dimension_numbers = #tpu.dot_dimension_numbers<[1], [0], [0], [1], [0, 0, 1, 1], [], []>} : vector<2x128xf32>, vector<128x128xf32>, vector<2x128xf32> -> vector<2x128xf32>
    %82 = vector.broadcast %72 : vector<1x128xf32> to vector<2x128xf32>
    %83 = arith.addf %81, %82 : vector<2x128xf32>
    %cst_37 = arith.constant dense<0.000000e+00> : vector<2x128xf32>
    %84 = tpu.matmul %57, %70, %cst_37 {dimension_numbers = #tpu.dot_dimension_numbers<[1], [0], [0], [1], [0, 0, 1, 1], [], []>} : vector<2x128xf32>, vector<128x128xf32>, vector<2x128xf32> -> vector<2x128xf32>
    %85 = vector.broadcast %72 : vector<1x128xf32> to vector<2x128xf32>
    %86 = arith.addf %84, %85 : vector<2x128xf32>
    %cst_38 = arith.constant dense<0.000000e+00> : vector<2x128xf32>
    %87 = tpu.matmul %60, %70, %cst_38 {dimension_numbers = #tpu.dot_dimension_numbers<[1], [0], [0], [1], [0, 0, 1, 1], [], []>} : vector<2x128xf32>, vector<128x128xf32>, vector<2x128xf32> -> vector<2x128xf32>
    %88 = vector.broadcast %72 : vector<1x128xf32> to vector<2x128xf32>
    %89 = arith.addf %87, %88 : vector<2x128xf32>
    %cst_39 = arith.constant dense<0.000000e+00> : vector<2x128xf32>
    %90 = tpu.matmul %63, %70, %cst_39 {dimension_numbers = #tpu.dot_dimension_numbers<[1], [0], [0], [1], [0, 0, 1, 1], [], []>} : vector<2x128xf32>, vector<128x128xf32>, vector<2x128xf32> -> vector<2x128xf32>
    %91 = vector.broadcast %72 : vector<1x128xf32> to vector<2x128xf32>
    %92 = arith.addf %90, %91 : vector<2x128xf32>
    %cst_40 = arith.constant dense<0.000000e+00> : vector<2x128xf32>
    %93 = tpu.matmul %66, %70, %cst_40 {dimension_numbers = #tpu.dot_dimension_numbers<[1], [0], [0], [1], [0, 0, 1, 1], [], []>} : vector<2x128xf32>, vector<128x128xf32>, vector<2x128xf32> -> vector<2x128xf32>
    %94 = vector.broadcast %72 : vector<1x128xf32> to vector<2x128xf32>
    %95 = arith.addf %93, %94 : vector<2x128xf32>
    %cst_41 = arith.constant dense<0.000000e+00> : vector<2x128xf32>
    %96 = tpu.matmul %69, %70, %cst_41 {dimension_numbers = #tpu.dot_dimension_numbers<[1], [0], [0], [1], [0, 0, 1, 1], [], []>} : vector<2x128xf32>, vector<128x128xf32>, vector<2x128xf32> -> vector<2x128xf32>
    %97 = vector.broadcast %72 : vector<1x128xf32> to vector<2x128xf32>
    %98 = arith.addf %96, %97 : vector<2x128xf32>
    %cst_42 = arith.constant dense<0.000000e+00> : vector<2x128xf32>
    %99 = tpu.matmul %74, %71, %cst_42 {dimension_numbers = #tpu.dot_dimension_numbers<[1], [0], [0], [1], [0, 0, 1, 1], [], []>} : vector<2x128xf32>, vector<128x128xf32>, vector<2x128xf32> -> vector<2x128xf32>
    %100 = arith.addf %77, %99 : vector<2x128xf32>
    %101 = math.tanh %100 : vector<2x128xf32>
    %cst_43 = arith.constant dense<0.000000e+00> : vector<2x128xf32>
    %102 = tpu.matmul %101, %71, %cst_43 {dimension_numbers = #tpu.dot_dimension_numbers<[1], [0], [0], [1], [0, 0, 1, 1], [], []>} : vector<2x128xf32>, vector<128x128xf32>, vector<2x128xf32> -> vector<2x128xf32>
    %103 = arith.addf %80, %102 : vector<2x128xf32>
    %104 = math.tanh %103 : vector<2x128xf32>
    %cst_44 = arith.constant dense<0.000000e+00> : vector<2x128xf32>
    %105 = tpu.matmul %104, %71, %cst_44 {dimension_numbers = #tpu.dot_dimension_numbers<[1], [0], [0], [1], [0, 0, 1, 1], [], []>} : vector<2x128xf32>, vector<128x128xf32>, vector<2x128xf32> -> vector<2x128xf32>
    %106 = arith.addf %83, %105 : vector<2x128xf32>
    %107 = math.tanh %106 : vector<2x128xf32>
    %cst_45 = arith.constant dense<0.000000e+00> : vector<2x128xf32>
    %108 = tpu.matmul %107, %71, %cst_45 {dimension_numbers = #tpu.dot_dimension_numbers<[1], [0], [0], [1], [0, 0, 1, 1], [], []>} : vector<2x128xf32>, vector<128x128xf32>, vector<2x128xf32> -> vector<2x128xf32>
    %109 = arith.addf %86, %108 : vector<2x128xf32>
    %110 = math.tanh %109 : vector<2x128xf32>
    %cst_46 = arith.constant dense<0.000000e+00> : vector<2x128xf32>
    %111 = tpu.matmul %110, %71, %cst_46 {dimension_numbers = #tpu.dot_dimension_numbers<[1], [0], [0], [1], [0, 0, 1, 1], [], []>} : vector<2x128xf32>, vector<128x128xf32>, vector<2x128xf32> -> vector<2x128xf32>
    %112 = arith.addf %89, %111 : vector<2x128xf32>
    %113 = math.tanh %112 : vector<2x128xf32>
    %cst_47 = arith.constant dense<0.000000e+00> : vector<2x128xf32>
    %114 = tpu.matmul %113, %71, %cst_47 {dimension_numbers = #tpu.dot_dimension_numbers<[1], [0], [0], [1], [0, 0, 1, 1], [], []>} : vector<2x128xf32>, vector<128x128xf32>, vector<2x128xf32> -> vector<2x128xf32>
    %115 = arith.addf %92, %114 : vector<2x128xf32>
    %116 = math.tanh %115 : vector<2x128xf32>
    %cst_48 = arith.constant dense<0.000000e+00> : vector<2x128xf32>
    %117 = tpu.matmul %116, %71, %cst_48 {dimension_numbers = #tpu.dot_dimension_numbers<[1], [0], [0], [1], [0, 0, 1, 1], [], []>} : vector<2x128xf32>, vector<128x128xf32>, vector<2x128xf32> -> vector<2x128xf32>
    %118 = arith.addf %95, %117 : vector<2x128xf32>
    %119 = math.tanh %118 : vector<2x128xf32>
    %cst_49 = arith.constant dense<0.000000e+00> : vector<2x128xf32>
    %120 = tpu.matmul %119, %71, %cst_49 {dimension_numbers = #tpu.dot_dimension_numbers<[1], [0], [0], [1], [0, 0, 1, 1], [], []>} : vector<2x128xf32>, vector<128x128xf32>, vector<2x128xf32> -> vector<2x128xf32>
    %121 = arith.addf %98, %120 : vector<2x128xf32>
    %122 = math.tanh %121 : vector<2x128xf32>
    %c0_50 = arith.constant 0 : index
    %c0_51 = arith.constant 0 : index
    %123 = vector.load %arg9[%c0_50, %c0_51] : memref<128x128xf32, #tpu.memory_space<vmem>>, vector<128x128xf32>
    %c0_52 = arith.constant 0 : index
    %c0_53 = arith.constant 0 : index
    %124 = vector.load %arg10[%c0_52, %c0_53] : memref<128x128xf32, #tpu.memory_space<vmem>>, vector<128x128xf32>
    %c0_54 = arith.constant 0 : index
    %c0_55 = arith.constant 0 : index
    %125 = vector.load %arg11[%c0_54, %c0_55] : memref<1x128xf32, #tpu.memory_space<vmem>>, vector<1x128xf32>
    %c2 = arith.constant 2 : index
    %c0_56 = arith.constant 0 : index
    %c0_57 = arith.constant 0 : index
    %126 = vector.load %arg2[%c2, %c0_56, %c0_57] : memref<3x2x128xf32, #tpu.memory_space<vmem>>, vector<1x2x128xf32>
    %127 = vector.shape_cast %126 : vector<1x2x128xf32> to vector<2x128xf32>
    %cst_58 = arith.constant dense<0.000000e+00> : vector<2x128xf32>
    %128 = tpu.matmul %101, %123, %cst_58 {dimension_numbers = #tpu.dot_dimension_numbers<[1], [0], [0], [1], [0, 0, 1, 1], [], []>} : vector<2x128xf32>, vector<128x128xf32>, vector<2x128xf32> -> vector<2x128xf32>
    %129 = vector.broadcast %125 : vector<1x128xf32> to vector<2x128xf32>
    %130 = arith.addf %128, %129 : vector<2x128xf32>
    %cst_59 = arith.constant dense<0.000000e+00> : vector<2x128xf32>
    %131 = tpu.matmul %104, %123, %cst_59 {dimension_numbers = #tpu.dot_dimension_numbers<[1], [0], [0], [1], [0, 0, 1, 1], [], []>} : vector<2x128xf32>, vector<128x128xf32>, vector<2x128xf32> -> vector<2x128xf32>
    %132 = vector.broadcast %125 : vector<1x128xf32> to vector<2x128xf32>
    %133 = arith.addf %131, %132 : vector<2x128xf32>
    %cst_60 = arith.constant dense<0.000000e+00> : vector<2x128xf32>
    %134 = tpu.matmul %107, %123, %cst_60 {dimension_numbers = #tpu.dot_dimension_numbers<[1], [0], [0], [1], [0, 0, 1, 1], [], []>} : vector<2x128xf32>, vector<128x128xf32>, vector<2x128xf32> -> vector<2x128xf32>
    %135 = vector.broadcast %125 : vector<1x128xf32> to vector<2x128xf32>
    %136 = arith.addf %134, %135 : vector<2x128xf32>
    %cst_61 = arith.constant dense<0.000000e+00> : vector<2x128xf32>
    %137 = tpu.matmul %110, %123, %cst_61 {dimension_numbers = #tpu.dot_dimension_numbers<[1], [0], [0], [1], [0, 0, 1, 1], [], []>} : vector<2x128xf32>, vector<128x128xf32>, vector<2x128xf32> -> vector<2x128xf32>
    %138 = vector.broadcast %125 : vector<1x128xf32> to vector<2x128xf32>
    %139 = arith.addf %137, %138 : vector<2x128xf32>
    %cst_62 = arith.constant dense<0.000000e+00> : vector<2x128xf32>
    %140 = tpu.matmul %113, %123, %cst_62 {dimension_numbers = #tpu.dot_dimension_numbers<[1], [0], [0], [1], [0, 0, 1, 1], [], []>} : vector<2x128xf32>, vector<128x128xf32>, vector<2x128xf32> -> vector<2x128xf32>
    %141 = vector.broadcast %125 : vector<1x128xf32> to vector<2x128xf32>
    %142 = arith.addf %140, %141 : vector<2x128xf32>
    %cst_63 = arith.constant dense<0.000000e+00> : vector<2x128xf32>
    %143 = tpu.matmul %116, %123, %cst_63 {dimension_numbers = #tpu.dot_dimension_numbers<[1], [0], [0], [1], [0, 0, 1, 1], [], []>} : vector<2x128xf32>, vector<128x128xf32>, vector<2x128xf32> -> vector<2x128xf32>
    %144 = vector.broadcast %125 : vector<1x128xf32> to vector<2x128xf32>
    %145 = arith.addf %143, %144 : vector<2x128xf32>
    %cst_64 = arith.constant dense<0.000000e+00> : vector<2x128xf32>
    %146 = tpu.matmul %119, %123, %cst_64 {dimension_numbers = #tpu.dot_dimension_numbers<[1], [0], [0], [1], [0, 0, 1, 1], [], []>} : vector<2x128xf32>, vector<128x128xf32>, vector<2x128xf32> -> vector<2x128xf32>
    %147 = vector.broadcast %125 : vector<1x128xf32> to vector<2x128xf32>
    %148 = arith.addf %146, %147 : vector<2x128xf32>
    %cst_65 = arith.constant dense<0.000000e+00> : vector<2x128xf32>
    %149 = tpu.matmul %122, %123, %cst_65 {dimension_numbers = #tpu.dot_dimension_numbers<[1], [0], [0], [1], [0, 0, 1, 1], [], []>} : vector<2x128xf32>, vector<128x128xf32>, vector<2x128xf32> -> vector<2x128xf32>
    %150 = vector.broadcast %125 : vector<1x128xf32> to vector<2x128xf32>
    %151 = arith.addf %149, %150 : vector<2x128xf32>
    %cst_66 = arith.constant dense<0.000000e+00> : vector<2x128xf32>
    %152 = tpu.matmul %127, %124, %cst_66 {dimension_numbers = #tpu.dot_dimension_numbers<[1], [0], [0], [1], [0, 0, 1, 1], [], []>} : vector<2x128xf32>, vector<128x128xf32>, vector<2x128xf32> -> vector<2x128xf32>
    %153 = arith.addf %130, %152 : vector<2x128xf32>
    %154 = math.tanh %153 : vector<2x128xf32>
    %cst_67 = arith.constant dense<0.000000e+00> : vector<2x128xf32>
    %155 = tpu.matmul %154, %124, %cst_67 {dimension_numbers = #tpu.dot_dimension_numbers<[1], [0], [0], [1], [0, 0, 1, 1], [], []>} : vector<2x128xf32>, vector<128x128xf32>, vector<2x128xf32> -> vector<2x128xf32>
    %156 = arith.addf %133, %155 : vector<2x128xf32>
    %157 = math.tanh %156 : vector<2x128xf32>
    %cst_68 = arith.constant dense<0.000000e+00> : vector<2x128xf32>
    %158 = tpu.matmul %157, %124, %cst_68 {dimension_numbers = #tpu.dot_dimension_numbers<[1], [0], [0], [1], [0, 0, 1, 1], [], []>} : vector<2x128xf32>, vector<128x128xf32>, vector<2x128xf32> -> vector<2x128xf32>
    %159 = arith.addf %136, %158 : vector<2x128xf32>
    %160 = math.tanh %159 : vector<2x128xf32>
    %cst_69 = arith.constant dense<0.000000e+00> : vector<2x128xf32>
    %161 = tpu.matmul %160, %124, %cst_69 {dimension_numbers = #tpu.dot_dimension_numbers<[1], [0], [0], [1], [0, 0, 1, 1], [], []>} : vector<2x128xf32>, vector<128x128xf32>, vector<2x128xf32> -> vector<2x128xf32>
    %162 = arith.addf %139, %161 : vector<2x128xf32>
    %163 = math.tanh %162 : vector<2x128xf32>
    %cst_70 = arith.constant dense<0.000000e+00> : vector<2x128xf32>
    %164 = tpu.matmul %163, %124, %cst_70 {dimension_numbers = #tpu.dot_dimension_numbers<[1], [0], [0], [1], [0, 0, 1, 1], [], []>} : vector<2x128xf32>, vector<128x128xf32>, vector<2x128xf32> -> vector<2x128xf32>
    %165 = arith.addf %142, %164 : vector<2x128xf32>
    %166 = math.tanh %165 : vector<2x128xf32>
    %cst_71 = arith.constant dense<0.000000e+00> : vector<2x128xf32>
    %167 = tpu.matmul %166, %124, %cst_71 {dimension_numbers = #tpu.dot_dimension_numbers<[1], [0], [0], [1], [0, 0, 1, 1], [], []>} : vector<2x128xf32>, vector<128x128xf32>, vector<2x128xf32> -> vector<2x128xf32>
    %168 = arith.addf %145, %167 : vector<2x128xf32>
    %169 = math.tanh %168 : vector<2x128xf32>
    %cst_72 = arith.constant dense<0.000000e+00> : vector<2x128xf32>
    %170 = tpu.matmul %169, %124, %cst_72 {dimension_numbers = #tpu.dot_dimension_numbers<[1], [0], [0], [1], [0, 0, 1, 1], [], []>} : vector<2x128xf32>, vector<128x128xf32>, vector<2x128xf32> -> vector<2x128xf32>
    %171 = arith.addf %148, %170 : vector<2x128xf32>
    %172 = math.tanh %171 : vector<2x128xf32>
    %cst_73 = arith.constant dense<0.000000e+00> : vector<2x128xf32>
    %173 = tpu.matmul %172, %124, %cst_73 {dimension_numbers = #tpu.dot_dimension_numbers<[1], [0], [0], [1], [0, 0, 1, 1], [], []>} : vector<2x128xf32>, vector<128x128xf32>, vector<2x128xf32> -> vector<2x128xf32>
    %174 = arith.addf %151, %173 : vector<2x128xf32>
    %175 = math.tanh %174 : vector<2x128xf32>
    %c0_74 = arith.constant 0 : index
    %c0_75 = arith.constant 0 : index
    %c0_76 = arith.constant 0 : index
    %176 = vector.load %arg1[%c0_74, %c0_75, %c0_76] : memref<2x8x16xf32, #tpu.memory_space<vmem>>, vector<2x8x16xf32>
    %177 = vector.extract_strided_slice %176 {offsets = [0, 0, 0], sizes = [2, 1, 16], strides = [1, 1, 1]} : vector<2x8x16xf32> to vector<2x1x16xf32>
    %178 = vector.shape_cast %177 : vector<2x1x16xf32> to vector<2x16xf32>
    %179 = vector.extract_strided_slice %176 {offsets = [0, 1, 0], sizes = [2, 1, 16], strides = [1, 1, 1]} : vector<2x8x16xf32> to vector<2x1x16xf32>
    %180 = vector.shape_cast %179 : vector<2x1x16xf32> to vector<2x16xf32>
    %181 = vector.extract_strided_slice %176 {offsets = [0, 2, 0], sizes = [2, 1, 16], strides = [1, 1, 1]} : vector<2x8x16xf32> to vector<2x1x16xf32>
    %182 = vector.shape_cast %181 : vector<2x1x16xf32> to vector<2x16xf32>
    %183 = vector.extract_strided_slice %176 {offsets = [0, 3, 0], sizes = [2, 1, 16], strides = [1, 1, 1]} : vector<2x8x16xf32> to vector<2x1x16xf32>
    %184 = vector.shape_cast %183 : vector<2x1x16xf32> to vector<2x16xf32>
    %185 = vector.extract_strided_slice %176 {offsets = [0, 4, 0], sizes = [2, 1, 16], strides = [1, 1, 1]} : vector<2x8x16xf32> to vector<2x1x16xf32>
    %186 = vector.shape_cast %185 : vector<2x1x16xf32> to vector<2x16xf32>
    %187 = vector.extract_strided_slice %176 {offsets = [0, 5, 0], sizes = [2, 1, 16], strides = [1, 1, 1]} : vector<2x8x16xf32> to vector<2x1x16xf32>
    %188 = vector.shape_cast %187 : vector<2x1x16xf32> to vector<2x16xf32>
    %189 = vector.extract_strided_slice %176 {offsets = [0, 6, 0], sizes = [2, 1, 16], strides = [1, 1, 1]} : vector<2x8x16xf32> to vector<2x1x16xf32>
    %190 = vector.shape_cast %189 : vector<2x1x16xf32> to vector<2x16xf32>
    %191 = vector.extract_strided_slice %176 {offsets = [0, 7, 0], sizes = [2, 1, 16], strides = [1, 1, 1]} : vector<2x8x16xf32> to vector<2x1x16xf32>
    %192 = vector.shape_cast %191 : vector<2x1x16xf32> to vector<2x16xf32>
    %c0_77 = arith.constant 0 : index
    %c0_78 = arith.constant 0 : index
    %193 = vector.load %arg12[%c0_77, %c0_78] : memref<16x128xf32, #tpu.memory_space<vmem>>, vector<16x128xf32>
    %c0_79 = arith.constant 0 : index
    %c0_80 = arith.constant 0 : index
    %194 = vector.load %arg13[%c0_79, %c0_80] : memref<128x128xf32, #tpu.memory_space<vmem>>, vector<128x128xf32>
    %c0_81 = arith.constant 0 : index
    %c0_82 = arith.constant 0 : index
    %195 = vector.load %arg14[%c0_81, %c0_82] : memref<1x128xf32, #tpu.memory_space<vmem>>, vector<1x128xf32>
    %cst_83 = arith.constant dense<0.000000e+00> : vector<2x128xf32>
    %196 = tpu.matmul %178, %193, %cst_83 {dimension_numbers = #tpu.dot_dimension_numbers<[1], [0], [0], [1], [0, 0, 1, 1], [], []>} : vector<2x16xf32>, vector<16x128xf32>, vector<2x128xf32> -> vector<2x128xf32>
    %197 = vector.broadcast %195 : vector<1x128xf32> to vector<2x128xf32>
    %198 = arith.addf %196, %197 : vector<2x128xf32>
    %cst_84 = arith.constant dense<0.000000e+00> : vector<2x128xf32>
    %199 = tpu.matmul %180, %193, %cst_84 {dimension_numbers = #tpu.dot_dimension_numbers<[1], [0], [0], [1], [0, 0, 1, 1], [], []>} : vector<2x16xf32>, vector<16x128xf32>, vector<2x128xf32> -> vector<2x128xf32>
    %200 = vector.broadcast %195 : vector<1x128xf32> to vector<2x128xf32>
    %201 = arith.addf %199, %200 : vector<2x128xf32>
    %cst_85 = arith.constant dense<0.000000e+00> : vector<2x128xf32>
    %202 = tpu.matmul %182, %193, %cst_85 {dimension_numbers = #tpu.dot_dimension_numbers<[1], [0], [0], [1], [0, 0, 1, 1], [], []>} : vector<2x16xf32>, vector<16x128xf32>, vector<2x128xf32> -> vector<2x128xf32>
    %203 = vector.broadcast %195 : vector<1x128xf32> to vector<2x128xf32>
    %204 = arith.addf %202, %203 : vector<2x128xf32>
    %cst_86 = arith.constant dense<0.000000e+00> : vector<2x128xf32>
    %205 = tpu.matmul %184, %193, %cst_86 {dimension_numbers = #tpu.dot_dimension_numbers<[1], [0], [0], [1], [0, 0, 1, 1], [], []>} : vector<2x16xf32>, vector<16x128xf32>, vector<2x128xf32> -> vector<2x128xf32>
    %206 = vector.broadcast %195 : vector<1x128xf32> to vector<2x128xf32>
    %207 = arith.addf %205, %206 : vector<2x128xf32>
    %cst_87 = arith.constant dense<0.000000e+00> : vector<2x128xf32>
    %208 = tpu.matmul %186, %193, %cst_87 {dimension_numbers = #tpu.dot_dimension_numbers<[1], [0], [0], [1], [0, 0, 1, 1], [], []>} : vector<2x16xf32>, vector<16x128xf32>, vector<2x128xf32> -> vector<2x128xf32>
    %209 = vector.broadcast %195 : vector<1x128xf32> to vector<2x128xf32>
    %210 = arith.addf %208, %209 : vector<2x128xf32>
    %cst_88 = arith.constant dense<0.000000e+00> : vector<2x128xf32>
    %211 = tpu.matmul %188, %193, %cst_88 {dimension_numbers = #tpu.dot_dimension_numbers<[1], [0], [0], [1], [0, 0, 1, 1], [], []>} : vector<2x16xf32>, vector<16x128xf32>, vector<2x128xf32> -> vector<2x128xf32>
    %212 = vector.broadcast %195 : vector<1x128xf32> to vector<2x128xf32>
    %213 = arith.addf %211, %212 : vector<2x128xf32>
    %cst_89 = arith.constant dense<0.000000e+00> : vector<2x128xf32>
    %214 = tpu.matmul %190, %193, %cst_89 {dimension_numbers = #tpu.dot_dimension_numbers<[1], [0], [0], [1], [0, 0, 1, 1], [], []>} : vector<2x16xf32>, vector<16x128xf32>, vector<2x128xf32> -> vector<2x128xf32>
    %215 = vector.broadcast %195 : vector<1x128xf32> to vector<2x128xf32>
    %216 = arith.addf %214, %215 : vector<2x128xf32>
    %cst_90 = arith.constant dense<0.000000e+00> : vector<2x128xf32>
    %217 = tpu.matmul %192, %193, %cst_90 {dimension_numbers = #tpu.dot_dimension_numbers<[1], [0], [0], [1], [0, 0, 1, 1], [], []>} : vector<2x16xf32>, vector<16x128xf32>, vector<2x128xf32> -> vector<2x128xf32>
    %218 = vector.broadcast %195 : vector<1x128xf32> to vector<2x128xf32>
    %219 = arith.addf %217, %218 : vector<2x128xf32>
    %cst_91 = arith.constant dense<0.000000e+00> : vector<2x128xf32>
    %220 = tpu.matmul %69, %194, %cst_91 {dimension_numbers = #tpu.dot_dimension_numbers<[1], [0], [0], [1], [0, 0, 1, 1], [], []>} : vector<2x128xf32>, vector<128x128xf32>, vector<2x128xf32> -> vector<2x128xf32>
    %221 = arith.addf %198, %220 : vector<2x128xf32>
    %222 = math.tanh %221 : vector<2x128xf32>
    %cst_92 = arith.constant dense<0.000000e+00> : vector<2x128xf32>
    %223 = tpu.matmul %222, %194, %cst_92 {dimension_numbers = #tpu.dot_dimension_numbers<[1], [0], [0], [1], [0, 0, 1, 1], [], []>} : vector<2x128xf32>, vector<128x128xf32>, vector<2x128xf32> -> vector<2x128xf32>
    %224 = arith.addf %201, %223 : vector<2x128xf32>
    %225 = math.tanh %224 : vector<2x128xf32>
    %cst_93 = arith.constant dense<0.000000e+00> : vector<2x128xf32>
    %226 = tpu.matmul %225, %194, %cst_93 {dimension_numbers = #tpu.dot_dimension_numbers<[1], [0], [0], [1], [0, 0, 1, 1], [], []>} : vector<2x128xf32>, vector<128x128xf32>, vector<2x128xf32> -> vector<2x128xf32>
    %227 = arith.addf %204, %226 : vector<2x128xf32>
    %228 = math.tanh %227 : vector<2x128xf32>
    %cst_94 = arith.constant dense<0.000000e+00> : vector<2x128xf32>
    %229 = tpu.matmul %228, %194, %cst_94 {dimension_numbers = #tpu.dot_dimension_numbers<[1], [0], [0], [1], [0, 0, 1, 1], [], []>} : vector<2x128xf32>, vector<128x128xf32>, vector<2x128xf32> -> vector<2x128xf32>
    %230 = arith.addf %207, %229 : vector<2x128xf32>
    %231 = math.tanh %230 : vector<2x128xf32>
    %cst_95 = arith.constant dense<0.000000e+00> : vector<2x128xf32>
    %232 = tpu.matmul %231, %194, %cst_95 {dimension_numbers = #tpu.dot_dimension_numbers<[1], [0], [0], [1], [0, 0, 1, 1], [], []>} : vector<2x128xf32>, vector<128x128xf32>, vector<2x128xf32> -> vector<2x128xf32>
    %233 = arith.addf %210, %232 : vector<2x128xf32>
    %234 = math.tanh %233 : vector<2x128xf32>
    %cst_96 = arith.constant dense<0.000000e+00> : vector<2x128xf32>
    %235 = tpu.matmul %234, %194, %cst_96 {dimension_numbers = #tpu.dot_dimension_numbers<[1], [0], [0], [1], [0, 0, 1, 1], [], []>} : vector<2x128xf32>, vector<128x128xf32>, vector<2x128xf32> -> vector<2x128xf32>
    %236 = arith.addf %213, %235 : vector<2x128xf32>
    %237 = math.tanh %236 : vector<2x128xf32>
    %cst_97 = arith.constant dense<0.000000e+00> : vector<2x128xf32>
    %238 = tpu.matmul %237, %194, %cst_97 {dimension_numbers = #tpu.dot_dimension_numbers<[1], [0], [0], [1], [0, 0, 1, 1], [], []>} : vector<2x128xf32>, vector<128x128xf32>, vector<2x128xf32> -> vector<2x128xf32>
    %239 = arith.addf %216, %238 : vector<2x128xf32>
    %240 = math.tanh %239 : vector<2x128xf32>
    %cst_98 = arith.constant dense<0.000000e+00> : vector<2x128xf32>
    %241 = tpu.matmul %240, %194, %cst_98 {dimension_numbers = #tpu.dot_dimension_numbers<[1], [0], [0], [1], [0, 0, 1, 1], [], []>} : vector<2x128xf32>, vector<128x128xf32>, vector<2x128xf32> -> vector<2x128xf32>
    %242 = arith.addf %219, %241 : vector<2x128xf32>
    %243 = math.tanh %242 : vector<2x128xf32>
    %c0_99 = arith.constant 0 : index
    %c0_100 = arith.constant 0 : index
    %244 = vector.load %arg15[%c0_99, %c0_100] : memref<128x128xf32, #tpu.memory_space<vmem>>, vector<128x128xf32>
    %c0_101 = arith.constant 0 : index
    %c0_102 = arith.constant 0 : index
    %245 = vector.load %arg16[%c0_101, %c0_102] : memref<128x128xf32, #tpu.memory_space<vmem>>, vector<128x128xf32>
    %c0_103 = arith.constant 0 : index
    %c0_104 = arith.constant 0 : index
    %246 = vector.load %arg17[%c0_103, %c0_104] : memref<1x128xf32, #tpu.memory_space<vmem>>, vector<1x128xf32>
    %cst_105 = arith.constant dense<0.000000e+00> : vector<2x128xf32>
    %247 = tpu.matmul %222, %244, %cst_105 {dimension_numbers = #tpu.dot_dimension_numbers<[1], [0], [0], [1], [0, 0, 1, 1], [], []>} : vector<2x128xf32>, vector<128x128xf32>, vector<2x128xf32> -> vector<2x128xf32>
    %248 = vector.broadcast %246 : vector<1x128xf32> to vector<2x128xf32>
    %249 = arith.addf %247, %248 : vector<2x128xf32>
    %cst_106 = arith.constant dense<0.000000e+00> : vector<2x128xf32>
    %250 = tpu.matmul %225, %244, %cst_106 {dimension_numbers = #tpu.dot_dimension_numbers<[1], [0], [0], [1], [0, 0, 1, 1], [], []>} : vector<2x128xf32>, vector<128x128xf32>, vector<2x128xf32> -> vector<2x128xf32>
    %251 = vector.broadcast %246 : vector<1x128xf32> to vector<2x128xf32>
    %252 = arith.addf %250, %251 : vector<2x128xf32>
    %cst_107 = arith.constant dense<0.000000e+00> : vector<2x128xf32>
    %253 = tpu.matmul %228, %244, %cst_107 {dimension_numbers = #tpu.dot_dimension_numbers<[1], [0], [0], [1], [0, 0, 1, 1], [], []>} : vector<2x128xf32>, vector<128x128xf32>, vector<2x128xf32> -> vector<2x128xf32>
    %254 = vector.broadcast %246 : vector<1x128xf32> to vector<2x128xf32>
    %255 = arith.addf %253, %254 : vector<2x128xf32>
    %cst_108 = arith.constant dense<0.000000e+00> : vector<2x128xf32>
    %256 = tpu.matmul %231, %244, %cst_108 {dimension_numbers = #tpu.dot_dimension_numbers<[1], [0], [0], [1], [0, 0, 1, 1], [], []>} : vector<2x128xf32>, vector<128x128xf32>, vector<2x128xf32> -> vector<2x128xf32>
    %257 = vector.broadcast %246 : vector<1x128xf32> to vector<2x128xf32>
    %258 = arith.addf %256, %257 : vector<2x128xf32>
    %cst_109 = arith.constant dense<0.000000e+00> : vector<2x128xf32>
    %259 = tpu.matmul %234, %244, %cst_109 {dimension_numbers = #tpu.dot_dimension_numbers<[1], [0], [0], [1], [0, 0, 1, 1], [], []>} : vector<2x128xf32>, vector<128x128xf32>, vector<2x128xf32> -> vector<2x128xf32>
    %260 = vector.broadcast %246 : vector<1x128xf32> to vector<2x128xf32>
    %261 = arith.addf %259, %260 : vector<2x128xf32>
    %cst_110 = arith.constant dense<0.000000e+00> : vector<2x128xf32>
    %262 = tpu.matmul %237, %244, %cst_110 {dimension_numbers = #tpu.dot_dimension_numbers<[1], [0], [0], [1], [0, 0, 1, 1], [], []>} : vector<2x128xf32>, vector<128x128xf32>, vector<2x128xf32> -> vector<2x128xf32>
    %263 = vector.broadcast %246 : vector<1x128xf32> to vector<2x128xf32>
    %264 = arith.addf %262, %263 : vector<2x128xf32>
    %cst_111 = arith.constant dense<0.000000e+00> : vector<2x128xf32>
    %265 = tpu.matmul %240, %244, %cst_111 {dimension_numbers = #tpu.dot_dimension_numbers<[1], [0], [0], [1], [0, 0, 1, 1], [], []>} : vector<2x128xf32>, vector<128x128xf32>, vector<2x128xf32> -> vector<2x128xf32>
    %266 = vector.broadcast %246 : vector<1x128xf32> to vector<2x128xf32>
    %267 = arith.addf %265, %266 : vector<2x128xf32>
    %cst_112 = arith.constant dense<0.000000e+00> : vector<2x128xf32>
    %268 = tpu.matmul %243, %244, %cst_112 {dimension_numbers = #tpu.dot_dimension_numbers<[1], [0], [0], [1], [0, 0, 1, 1], [], []>} : vector<2x128xf32>, vector<128x128xf32>, vector<2x128xf32> -> vector<2x128xf32>
    %269 = vector.broadcast %246 : vector<1x128xf32> to vector<2x128xf32>
    %270 = arith.addf %268, %269 : vector<2x128xf32>
    %cst_113 = arith.constant dense<0.000000e+00> : vector<2x128xf32>
    %271 = tpu.matmul %122, %245, %cst_113 {dimension_numbers = #tpu.dot_dimension_numbers<[1], [0], [0], [1], [0, 0, 1, 1], [], []>} : vector<2x128xf32>, vector<128x128xf32>, vector<2x128xf32> -> vector<2x128xf32>
    %272 = arith.addf %249, %271 : vector<2x128xf32>
    %273 = math.tanh %272 : vector<2x128xf32>
    %cst_114 = arith.constant dense<0.000000e+00> : vector<2x128xf32>
    %274 = tpu.matmul %273, %245, %cst_114 {dimension_numbers = #tpu.dot_dimension_numbers<[1], [0], [0], [1], [0, 0, 1, 1], [], []>} : vector<2x128xf32>, vector<128x128xf32>, vector<2x128xf32> -> vector<2x128xf32>
    %275 = arith.addf %252, %274 : vector<2x128xf32>
    %276 = math.tanh %275 : vector<2x128xf32>
    %cst_115 = arith.constant dense<0.000000e+00> : vector<2x128xf32>
    %277 = tpu.matmul %276, %245, %cst_115 {dimension_numbers = #tpu.dot_dimension_numbers<[1], [0], [0], [1], [0, 0, 1, 1], [], []>} : vector<2x128xf32>, vector<128x128xf32>, vector<2x128xf32> -> vector<2x128xf32>
    %278 = arith.addf %255, %277 : vector<2x128xf32>
    %279 = math.tanh %278 : vector<2x128xf32>
    %cst_116 = arith.constant dense<0.000000e+00> : vector<2x128xf32>
    %280 = tpu.matmul %279, %245, %cst_116 {dimension_numbers = #tpu.dot_dimension_numbers<[1], [0], [0], [1], [0, 0, 1, 1], [], []>} : vector<2x128xf32>, vector<128x128xf32>, vector<2x128xf32> -> vector<2x128xf32>
    %281 = arith.addf %258, %280 : vector<2x128xf32>
    %282 = math.tanh %281 : vector<2x128xf32>
    %cst_117 = arith.constant dense<0.000000e+00> : vector<2x128xf32>
    %283 = tpu.matmul %282, %245, %cst_117 {dimension_numbers = #tpu.dot_dimension_numbers<[1], [0], [0], [1], [0, 0, 1, 1], [], []>} : vector<2x128xf32>, vector<128x128xf32>, vector<2x128xf32> -> vector<2x128xf32>
    %284 = arith.addf %261, %283 : vector<2x128xf32>
    %285 = math.tanh %284 : vector<2x128xf32>
    %cst_118 = arith.constant dense<0.000000e+00> : vector<2x128xf32>
    %286 = tpu.matmul %285, %245, %cst_118 {dimension_numbers = #tpu.dot_dimension_numbers<[1], [0], [0], [1], [0, 0, 1, 1], [], []>} : vector<2x128xf32>, vector<128x128xf32>, vector<2x128xf32> -> vector<2x128xf32>
    %287 = arith.addf %264, %286 : vector<2x128xf32>
    %288 = math.tanh %287 : vector<2x128xf32>
    %cst_119 = arith.constant dense<0.000000e+00> : vector<2x128xf32>
    %289 = tpu.matmul %288, %245, %cst_119 {dimension_numbers = #tpu.dot_dimension_numbers<[1], [0], [0], [1], [0, 0, 1, 1], [], []>} : vector<2x128xf32>, vector<128x128xf32>, vector<2x128xf32> -> vector<2x128xf32>
    %290 = arith.addf %267, %289 : vector<2x128xf32>
    %291 = math.tanh %290 : vector<2x128xf32>
    %cst_120 = arith.constant dense<0.000000e+00> : vector<2x128xf32>
    %292 = tpu.matmul %291, %245, %cst_120 {dimension_numbers = #tpu.dot_dimension_numbers<[1], [0], [0], [1], [0, 0, 1, 1], [], []>} : vector<2x128xf32>, vector<128x128xf32>, vector<2x128xf32> -> vector<2x128xf32>
    %293 = arith.addf %270, %292 : vector<2x128xf32>
    %294 = math.tanh %293 : vector<2x128xf32>
    %c0_121 = arith.constant 0 : index
    %c0_122 = arith.constant 0 : index
    %295 = vector.load %arg18[%c0_121, %c0_122] : memref<128x128xf32, #tpu.memory_space<vmem>>, vector<128x128xf32>
    %c0_123 = arith.constant 0 : index
    %c0_124 = arith.constant 0 : index
    %296 = vector.load %arg19[%c0_123, %c0_124] : memref<128x128xf32, #tpu.memory_space<vmem>>, vector<128x128xf32>
    %c0_125 = arith.constant 0 : index
    %c0_126 = arith.constant 0 : index
    %297 = vector.load %arg20[%c0_125, %c0_126] : memref<1x128xf32, #tpu.memory_space<vmem>>, vector<1x128xf32>
    %cst_127 = arith.constant dense<0.000000e+00> : vector<2x128xf32>
    %298 = tpu.matmul %273, %295, %cst_127 {dimension_numbers = #tpu.dot_dimension_numbers<[1], [0], [0], [1], [0, 0, 1, 1], [], []>} : vector<2x128xf32>, vector<128x128xf32>, vector<2x128xf32> -> vector<2x128xf32>
    %299 = vector.broadcast %297 : vector<1x128xf32> to vector<2x128xf32>
    %300 = arith.addf %298, %299 : vector<2x128xf32>
    %cst_128 = arith.constant dense<0.000000e+00> : vector<2x128xf32>
    %301 = tpu.matmul %276, %295, %cst_128 {dimension_numbers = #tpu.dot_dimension_numbers<[1], [0], [0], [1], [0, 0, 1, 1], [], []>} : vector<2x128xf32>, vector<128x128xf32>, vector<2x128xf32> -> vector<2x128xf32>
    %302 = vector.broadcast %297 : vector<1x128xf32> to vector<2x128xf32>
    %303 = arith.addf %301, %302 : vector<2x128xf32>
    %cst_129 = arith.constant dense<0.000000e+00> : vector<2x128xf32>
    %304 = tpu.matmul %279, %295, %cst_129 {dimension_numbers = #tpu.dot_dimension_numbers<[1], [0], [0], [1], [0, 0, 1, 1], [], []>} : vector<2x128xf32>, vector<128x128xf32>, vector<2x128xf32> -> vector<2x128xf32>
    %305 = vector.broadcast %297 : vector<1x128xf32> to vector<2x128xf32>
    %306 = arith.addf %304, %305 : vector<2x128xf32>
    %cst_130 = arith.constant dense<0.000000e+00> : vector<2x128xf32>
    %307 = tpu.matmul %282, %295, %cst_130 {dimension_numbers = #tpu.dot_dimension_numbers<[1], [0], [0], [1], [0, 0, 1, 1], [], []>} : vector<2x128xf32>, vector<128x128xf32>, vector<2x128xf32> -> vector<2x128xf32>
    %308 = vector.broadcast %297 : vector<1x128xf32> to vector<2x128xf32>
    %309 = arith.addf %307, %308 : vector<2x128xf32>
    %cst_131 = arith.constant dense<0.000000e+00> : vector<2x128xf32>
    %310 = tpu.matmul %285, %295, %cst_131 {dimension_numbers = #tpu.dot_dimension_numbers<[1], [0], [0], [1], [0, 0, 1, 1], [], []>} : vector<2x128xf32>, vector<128x128xf32>, vector<2x128xf32> -> vector<2x128xf32>
    %311 = vector.broadcast %297 : vector<1x128xf32> to vector<2x128xf32>
    %312 = arith.addf %310, %311 : vector<2x128xf32>
    %cst_132 = arith.constant dense<0.000000e+00> : vector<2x128xf32>
    %313 = tpu.matmul %288, %295, %cst_132 {dimension_numbers = #tpu.dot_dimension_numbers<[1], [0], [0], [1], [0, 0, 1, 1], [], []>} : vector<2x128xf32>, vector<128x128xf32>, vector<2x128xf32> -> vector<2x128xf32>
    %314 = vector.broadcast %297 : vector<1x128xf32> to vector<2x128xf32>
    %315 = arith.addf %313, %314 : vector<2x128xf32>
    %cst_133 = arith.constant dense<0.000000e+00> : vector<2x128xf32>
    %316 = tpu.matmul %291, %295, %cst_133 {dimension_numbers = #tpu.dot_dimension_numbers<[1], [0], [0], [1], [0, 0, 1, 1], [], []>} : vector<2x128xf32>, vector<128x128xf32>, vector<2x128xf32> -> vector<2x128xf32>
    %317 = vector.broadcast %297 : vector<1x128xf32> to vector<2x128xf32>
    %318 = arith.addf %316, %317 : vector<2x128xf32>
    %cst_134 = arith.constant dense<0.000000e+00> : vector<2x128xf32>
    %319 = tpu.matmul %294, %295, %cst_134 {dimension_numbers = #tpu.dot_dimension_numbers<[1], [0], [0], [1], [0, 0, 1, 1], [], []>} : vector<2x128xf32>, vector<128x128xf32>, vector<2x128xf32> -> vector<2x128xf32>
    %320 = vector.broadcast %297 : vector<1x128xf32> to vector<2x128xf32>
    %321 = arith.addf %319, %320 : vector<2x128xf32>
    %cst_135 = arith.constant dense<0.000000e+00> : vector<2x128xf32>
    %322 = tpu.matmul %175, %296, %cst_135 {dimension_numbers = #tpu.dot_dimension_numbers<[1], [0], [0], [1], [0, 0, 1, 1], [], []>} : vector<2x128xf32>, vector<128x128xf32>, vector<2x128xf32> -> vector<2x128xf32>
    %323 = arith.addf %300, %322 : vector<2x128xf32>
    %324 = math.tanh %323 : vector<2x128xf32>
    %cst_136 = arith.constant dense<0.000000e+00> : vector<2x128xf32>
    %325 = tpu.matmul %324, %296, %cst_136 {dimension_numbers = #tpu.dot_dimension_numbers<[1], [0], [0], [1], [0, 0, 1, 1], [], []>} : vector<2x128xf32>, vector<128x128xf32>, vector<2x128xf32> -> vector<2x128xf32>
    %326 = arith.addf %303, %325 : vector<2x128xf32>
    %327 = math.tanh %326 : vector<2x128xf32>
    %cst_137 = arith.constant dense<0.000000e+00> : vector<2x128xf32>
    %328 = tpu.matmul %327, %296, %cst_137 {dimension_numbers = #tpu.dot_dimension_numbers<[1], [0], [0], [1], [0, 0, 1, 1], [], []>} : vector<2x128xf32>, vector<128x128xf32>, vector<2x128xf32> -> vector<2x128xf32>
    %329 = arith.addf %306, %328 : vector<2x128xf32>
    %330 = math.tanh %329 : vector<2x128xf32>
    %cst_138 = arith.constant dense<0.000000e+00> : vector<2x128xf32>
    %331 = tpu.matmul %330, %296, %cst_138 {dimension_numbers = #tpu.dot_dimension_numbers<[1], [0], [0], [1], [0, 0, 1, 1], [], []>} : vector<2x128xf32>, vector<128x128xf32>, vector<2x128xf32> -> vector<2x128xf32>
    %332 = arith.addf %309, %331 : vector<2x128xf32>
    %333 = math.tanh %332 : vector<2x128xf32>
    %cst_139 = arith.constant dense<0.000000e+00> : vector<2x128xf32>
    %334 = tpu.matmul %333, %296, %cst_139 {dimension_numbers = #tpu.dot_dimension_numbers<[1], [0], [0], [1], [0, 0, 1, 1], [], []>} : vector<2x128xf32>, vector<128x128xf32>, vector<2x128xf32> -> vector<2x128xf32>
    %335 = arith.addf %312, %334 : vector<2x128xf32>
    %336 = math.tanh %335 : vector<2x128xf32>
    %cst_140 = arith.constant dense<0.000000e+00> : vector<2x128xf32>
    %337 = tpu.matmul %336, %296, %cst_140 {dimension_numbers = #tpu.dot_dimension_numbers<[1], [0], [0], [1], [0, 0, 1, 1], [], []>} : vector<2x128xf32>, vector<128x128xf32>, vector<2x128xf32> -> vector<2x128xf32>
    %338 = arith.addf %315, %337 : vector<2x128xf32>
    %339 = math.tanh %338 : vector<2x128xf32>
    %cst_141 = arith.constant dense<0.000000e+00> : vector<2x128xf32>
    %340 = tpu.matmul %339, %296, %cst_141 {dimension_numbers = #tpu.dot_dimension_numbers<[1], [0], [0], [1], [0, 0, 1, 1], [], []>} : vector<2x128xf32>, vector<128x128xf32>, vector<2x128xf32> -> vector<2x128xf32>
    %341 = arith.addf %318, %340 : vector<2x128xf32>
    %342 = math.tanh %341 : vector<2x128xf32>
    %cst_142 = arith.constant dense<0.000000e+00> : vector<2x128xf32>
    %343 = tpu.matmul %342, %296, %cst_142 {dimension_numbers = #tpu.dot_dimension_numbers<[1], [0], [0], [1], [0, 0, 1, 1], [], []>} : vector<2x128xf32>, vector<128x128xf32>, vector<2x128xf32> -> vector<2x128xf32>
    %344 = arith.addf %321, %343 : vector<2x128xf32>
    %345 = math.tanh %344 : vector<2x128xf32>
    %c0_143 = arith.constant 0 : index
    %c0_144 = arith.constant 0 : index
    %346 = vector.load %arg21[%c0_143, %c0_144] : memref<128x16xf32, #tpu.memory_space<vmem>>, vector<128x16xf32>
    %c0_145 = arith.constant 0 : index
    %c0_146 = arith.constant 0 : index
    %347 = vector.load %arg22[%c0_145, %c0_146] : memref<1x16xf32, #tpu.memory_space<vmem>>, vector<1x16xf32>
    %cst_147 = arith.constant dense<0.000000e+00> : vector<2x16xf32>
    %348 = tpu.matmul %324, %346, %cst_147 {dimension_numbers = #tpu.dot_dimension_numbers<[1], [0], [0], [1], [0, 0, 1, 1], [], []>} : vector<2x128xf32>, vector<128x16xf32>, vector<2x16xf32> -> vector<2x16xf32>
    %349 = vector.broadcast %347 : vector<1x16xf32> to vector<2x16xf32>
    %350 = arith.addf %348, %349 : vector<2x16xf32>
    %c0_148 = arith.constant 0 : index
    %c0_149 = arith.constant 0 : index
    %c0_150 = arith.constant 0 : index
    %351 = vector.load %arg23[%c0_148, %c0_149, %c0_150] : memref<2x8x16xf32, #tpu.memory_space<vmem>>, vector<2x1x16xf32>
    %352 = vector.shape_cast %351 : vector<2x1x16xf32> to vector<2x16xf32>
    %353 = vector.shape_cast %350 : vector<2x16xf32> to vector<2x1x16xf32>
    tpu.vector_store %arg23[%c0_148, %c0_149, %c0_150], %353 {strides = array<i32>} : memref<2x8x16xf32, #tpu.memory_space<vmem>>, vector<2x1x16xf32>,
    %cst_151 = arith.constant dense<0.000000e+00> : vector<2x16xf32>
    %354 = tpu.matmul %327, %346, %cst_151 {dimension_numbers = #tpu.dot_dimension_numbers<[1], [0], [0], [1], [0, 0, 1, 1], [], []>} : vector<2x128xf32>, vector<128x16xf32>, vector<2x16xf32> -> vector<2x16xf32>
    %355 = vector.broadcast %347 : vector<1x16xf32> to vector<2x16xf32>
    %356 = arith.addf %354, %355 : vector<2x16xf32>
    %c0_152 = arith.constant 0 : index
    %c1_153 = arith.constant 1 : index
    %c0_154 = arith.constant 0 : index
    %357 = vector.load %arg23[%c0_152, %c1_153, %c0_154] : memref<2x8x16xf32, #tpu.memory_space<vmem>>, vector<2x1x16xf32>
    %358 = vector.shape_cast %357 : vector<2x1x16xf32> to vector<2x16xf32>
    %359 = vector.shape_cast %356 : vector<2x16xf32> to vector<2x1x16xf32>
    tpu.vector_store %arg23[%c0_152, %c1_153, %c0_154], %359 {strides = array<i32>} : memref<2x8x16xf32, #tpu.memory_space<vmem>>, vector<2x1x16xf32>,
    %cst_155 = arith.constant dense<0.000000e+00> : vector<2x16xf32>
    %360 = tpu.matmul %330, %346, %cst_155 {dimension_numbers = #tpu.dot_dimension_numbers<[1], [0], [0], [1], [0, 0, 1, 1], [], []>} : vector<2x128xf32>, vector<128x16xf32>, vector<2x16xf32> -> vector<2x16xf32>
    %361 = vector.broadcast %347 : vector<1x16xf32> to vector<2x16xf32>
    %362 = arith.addf %360, %361 : vector<2x16xf32>
    %c0_156 = arith.constant 0 : index
    %c2_157 = arith.constant 2 : index
    %c0_158 = arith.constant 0 : index
    %363 = vector.load %arg23[%c0_156, %c2_157, %c0_158] : memref<2x8x16xf32, #tpu.memory_space<vmem>>, vector<2x1x16xf32>
    %364 = vector.shape_cast %363 : vector<2x1x16xf32> to vector<2x16xf32>
    %365 = vector.shape_cast %362 : vector<2x16xf32> to vector<2x1x16xf32>
    tpu.vector_store %arg23[%c0_156, %c2_157, %c0_158], %365 {strides = array<i32>} : memref<2x8x16xf32, #tpu.memory_space<vmem>>, vector<2x1x16xf32>,
    %cst_159 = arith.constant dense<0.000000e+00> : vector<2x16xf32>
    %366 = tpu.matmul %333, %346, %cst_159 {dimension_numbers = #tpu.dot_dimension_numbers<[1], [0], [0], [1], [0, 0, 1, 1], [], []>} : vector<2x128xf32>, vector<128x16xf32>, vector<2x16xf32> -> vector<2x16xf32>
    %367 = vector.broadcast %347 : vector<1x16xf32> to vector<2x16xf32>
    %368 = arith.addf %366, %367 : vector<2x16xf32>
    %c0_160 = arith.constant 0 : index
    %c3 = arith.constant 3 : index
    %c0_161 = arith.constant 0 : index
    %369 = vector.load %arg23[%c0_160, %c3, %c0_161] : memref<2x8x16xf32, #tpu.memory_space<vmem>>, vector<2x1x16xf32>
    %370 = vector.shape_cast %369 : vector<2x1x16xf32> to vector<2x16xf32>
    %371 = vector.shape_cast %368 : vector<2x16xf32> to vector<2x1x16xf32>
    tpu.vector_store %arg23[%c0_160, %c3, %c0_161], %371 {strides = array<i32>} : memref<2x8x16xf32, #tpu.memory_space<vmem>>, vector<2x1x16xf32>,
    %cst_162 = arith.constant dense<0.000000e+00> : vector<2x16xf32>
    %372 = tpu.matmul %336, %346, %cst_162 {dimension_numbers = #tpu.dot_dimension_numbers<[1], [0], [0], [1], [0, 0, 1, 1], [], []>} : vector<2x128xf32>, vector<128x16xf32>, vector<2x16xf32> -> vector<2x16xf32>
    %373 = vector.broadcast %347 : vector<1x16xf32> to vector<2x16xf32>
    %374 = arith.addf %372, %373 : vector<2x16xf32>
    %c0_163 = arith.constant 0 : index
    %c4 = arith.constant 4 : index
    %c0_164 = arith.constant 0 : index
    %375 = vector.load %arg23[%c0_163, %c4, %c0_164] : memref<2x8x16xf32, #tpu.memory_space<vmem>>, vector<2x1x16xf32>
    %376 = vector.shape_cast %375 : vector<2x1x16xf32> to vector<2x16xf32>
    %377 = vector.shape_cast %374 : vector<2x16xf32> to vector<2x1x16xf32>
    tpu.vector_store %arg23[%c0_163, %c4, %c0_164], %377 {strides = array<i32>} : memref<2x8x16xf32, #tpu.memory_space<vmem>>, vector<2x1x16xf32>,
    %cst_165 = arith.constant dense<0.000000e+00> : vector<2x16xf32>
    %378 = tpu.matmul %339, %346, %cst_165 {dimension_numbers = #tpu.dot_dimension_numbers<[1], [0], [0], [1], [0, 0, 1, 1], [], []>} : vector<2x128xf32>, vector<128x16xf32>, vector<2x16xf32> -> vector<2x16xf32>
    %379 = vector.broadcast %347 : vector<1x16xf32> to vector<2x16xf32>
    %380 = arith.addf %378, %379 : vector<2x16xf32>
    %c0_166 = arith.constant 0 : index
    %c5 = arith.constant 5 : index
    %c0_167 = arith.constant 0 : index
    %381 = vector.load %arg23[%c0_166, %c5, %c0_167] : memref<2x8x16xf32, #tpu.memory_space<vmem>>, vector<2x1x16xf32>
    %382 = vector.shape_cast %381 : vector<2x1x16xf32> to vector<2x16xf32>
    %383 = vector.shape_cast %380 : vector<2x16xf32> to vector<2x1x16xf32>
    tpu.vector_store %arg23[%c0_166, %c5, %c0_167], %383 {strides = array<i32>} : memref<2x8x16xf32, #tpu.memory_space<vmem>>, vector<2x1x16xf32>,
    %cst_168 = arith.constant dense<0.000000e+00> : vector<2x16xf32>
    %384 = tpu.matmul %342, %346, %cst_168 {dimension_numbers = #tpu.dot_dimension_numbers<[1], [0], [0], [1], [0, 0, 1, 1], [], []>} : vector<2x128xf32>, vector<128x16xf32>, vector<2x16xf32> -> vector<2x16xf32>
    %385 = vector.broadcast %347 : vector<1x16xf32> to vector<2x16xf32>
    %386 = arith.addf %384, %385 : vector<2x16xf32>
    %c0_169 = arith.constant 0 : index
    %c6 = arith.constant 6 : index
    %c0_170 = arith.constant 0 : index
    %387 = vector.load %arg23[%c0_169, %c6, %c0_170] : memref<2x8x16xf32, #tpu.memory_space<vmem>>, vector<2x1x16xf32>
    %388 = vector.shape_cast %387 : vector<2x1x16xf32> to vector<2x16xf32>
    %389 = vector.shape_cast %386 : vector<2x16xf32> to vector<2x1x16xf32>
    tpu.vector_store %arg23[%c0_169, %c6, %c0_170], %389 {strides = array<i32>} : memref<2x8x16xf32, #tpu.memory_space<vmem>>, vector<2x1x16xf32>,
    %cst_171 = arith.constant dense<0.000000e+00> : vector<2x16xf32>
    %390 = tpu.matmul %345, %346, %cst_171 {dimension_numbers = #tpu.dot_dimension_numbers<[1], [0], [0], [1], [0, 0, 1, 1], [], []>} : vector<2x128xf32>, vector<128x16xf32>, vector<2x16xf32> -> vector<2x16xf32>
    %391 = vector.broadcast %347 : vector<1x16xf32> to vector<2x16xf32>
    %392 = arith.addf %390, %391 : vector<2x16xf32>
    %c0_172 = arith.constant 0 : index
    %c7 = arith.constant 7 : index
    %c0_173 = arith.constant 0 : index
    %393 = vector.load %arg23[%c0_172, %c7, %c0_173] : memref<2x8x16xf32, #tpu.memory_space<vmem>>, vector<2x1x16xf32>
    %394 = vector.shape_cast %393 : vector<2x1x16xf32> to vector<2x16xf32>
    %395 = vector.shape_cast %392 : vector<2x16xf32> to vector<2x1x16xf32>
    tpu.vector_store %arg23[%c0_172, %c7, %c0_173], %395 {strides = array<i32>} : memref<2x8x16xf32, #tpu.memory_space<vmem>>, vector<2x1x16xf32>,
    return
  }
}

</mosaic_0001>

<bundles_post_ra>
// kernel: seq2seq_forward.1
= control target key start
LH: loop header
LB: loop body
LE: loop exit
PB: predicated region body
PF: predicated region fallthrough
CT: control target
= control target key end

     0   :  { %s5581_s0 = inlined_call_operand.vmem [shape: f32[2,8,16], index: 0, kind: input, shape index: {}]   ;;  %s5582_s1 = inlined_call_operand.vmem [shape: f32[2,8,16], index: 1, kind: input, shape index: {}]   ;;  %s5583_s2 = inlined_call_operand.vmem [shape: f32[3,2,128], index: 2, kind: input, shape index: {}]   ;;  %s5584_s3 = inlined_call_operand.vmem [shape: f32[16,128], index: 3, kind: input, shape index: {}]   ;;  %s5585_s4 = inlined_call_operand.vmem [shape: f32[128,128], index: 4, kind: input, shape index: {}]   ;;  %s5586_s5 = inlined_call_operand.vmem [shape: f32[1,128], index: 5, kind: input, shape index: {}]   ;;  %s5587_s6 = inlined_call_operand.vmem [shape: f32[128,128], index: 6, kind: input, shape index: {}]   ;;  %s5588_s7 = inlined_call_operand.vmem [shape: f32[128,128], index: 7, kind: input, shape index: {}]   ;;  %s5589_s8 = inlined_call_operand.vmem [shape: f32[1,128], index: 8, kind: input, shape index: {}]   ;;  %s5590_s9 = inlined_call_operand.vmem [shape: f32[128,128], index: 9, kind: input, shape index: {}]   ;;  %s5591_s10 = inlined_call_operand.hbm [shape: f32[128,128], index: 10, kind: input, shape index: {}]   ;;  %s5592_s11 = inlined_call_operand.vmem [shape: f32[1,128], index: 11, kind: input, shape index: {}]   ;;  %s5593_s12 = inlined_call_operand.vmem [shape: f32[16,128], index: 12, kind: input, shape index: {}]   ;;  %s5594_s13 = inlined_call_operand.hbm [shape: f32[128,128], index: 13, kind: input, shape index: {}]   ;;  %s5595_s14 = inlined_call_operand.vmem [shape: f32[1,128], index: 14, kind: input, shape index: {}]   ;;  %s5596_s15 = inlined_call_operand.hbm [shape: f32[128,128], index: 15, kind: input, shape index: {}]   ;;  %s5597_s16 = inlined_call_operand.hbm [shape: f32[128,128], index: 16, kind: input, shape index: {}]   ;;  %s5598_s17 = inlined_call_operand.vmem [shape: f32[1,128], index: 17, kind: input, shape index: {}]   ;;  %s5599_s18 = inlined_call_operand.hbm [shape: f32[128,128], index: 18, kind: input, shape index: {}]   ;;  %s5600_s19 = inlined_call_operand.hbm [shape: f32[128,128], index: 19, kind: input, shape index: {}]   ;;  %s5601_s20 = inlined_call_operand.vmem [shape: f32[1,128], index: 20, kind: input, shape index: {}]   ;;  %s5602_s21 = inlined_call_operand.vmem [shape: f32[128,16], index: 21, kind: input, shape index: {}]   ;;  %s5603_s22 = inlined_call_operand.vmem [shape: f32[1,16], index: 22, kind: input, shape index: {}]   ;;  %s5604_s23 = inlined_call_operand.hbm [shape: f32[2,8,16], index: 23, kind: output, shape index: {}]  }
   0x1   :  { %5612 = sst [smem:[#allocation19_spill]] %s5581_s0 }
   0x2   :  { %5613 = sst [smem:[#allocation20_spill]] %s5582_s1 }
   0x3   :  { %5614 = sst [smem:[#allocation21_spill]] %s5583_s2 }
   0x4   :  { %5615 = sst [smem:[#allocation22_spill]] %s5584_s3 }
   0x5   :  { %5616 = sst [smem:[#allocation23_spill]] %s5585_s4 }
   0x6   :  { %5617 = sst [smem:[#allocation24_spill]] %s5586_s5 }
   0x7   :  { %5618 = sst [smem:[#allocation25_spill]] %s5587_s6 }
   0x8   :  { %5619 = sst [smem:[#allocation26_spill]] %s5588_s7 }
   0x9   :  { %28 = vsyncpa [#allocation3], 0 }
   0xa   :  { %29 = vsyncpa [#allocation6], 0 }
   0xb   :  { %30 = vsyncpa [#allocation9], 0 }
   0xc   :  { %31 = vsyncpa [#allocation12], 0 }
   0xd   :  { %32 = vsyncpa [#allocation4], 0  ;;  %s74_s24 = sshll.u32 %s5594_s13, 4  ;;  %s3015_s25 = smov [#allocation5]   ;;  %s75_s24 = int_to_ptr.hbm [resolvable:$true] %s74_s24 }
   0xe   :  { %s76_s5 = sshll.u32 %s3015_s25, 4  ;;  %s102_s2 = sshll.u32 %s5597_s16, 4  ;;  %s77_s5 = int_to_ptr.vmem [resolvable:$true] %s76_s5  ;;  %s103_s2 = int_to_ptr.hbm [resolvable:$true] %s102_s2 }
   0xf   :  { %s3016_s6 = smov 128   ;;  %s3017_s27 = smov 8  }
  0x10   :  { %82 = dma.hbm_to_vmem [thread:$0]  %s75_s24, 2048, %s77_s5, [#allocation6], %s3016_s6, %s3016_s6, %s3017_s27  }
  0x11   :  { %s3018_s7 = smov [#allocation8]   ;;  %s57_s13 = sshll.u32 %s5591_s10, 4  ;;  %s58_s13 = int_to_ptr.hbm [resolvable:$true] %s57_s13 }
  0x12   :  { %s104_s28 = sshll.u32 %s3018_s7, 4  ;;  %s89_s4 = sshll.u32 %s5596_s15, 4  ;;  %s105_s28 = int_to_ptr.vmem [resolvable:$true] %s104_s28  ;;  %s90_s4 = int_to_ptr.hbm [resolvable:$true] %s89_s4 }
  0x13   :  { %110 = dma.hbm_to_vmem [thread:$0]  %s103_s2, 2048, %s105_s28, [#allocation9], %s3016_s6, %s3016_s6, %s3017_s27  }
  0x14   :  { %s3019_s30 = smov [#allocation2]   ;;  %s3020_s24 = smov [#allocation7]  }
  0x15   :  { %s59_s25 = sshll.u32 %s3019_s30, 4  ;;  %s91_s10 = sshll.u32 %s3020_s24, 4  ;;  %s60_s25 = int_to_ptr.vmem [resolvable:$true] %s59_s25  ;;  %s92_s10 = int_to_ptr.vmem [resolvable:$true] %s91_s10 }
  0x16   :  { %65 = dma.hbm_to_vmem [thread:$0]  %s58_s13, 2048, %s60_s25, [#allocation3], %s3016_s6, %s3016_s6, %s3017_s27  }
  0x17   :  { %s117_s26 = sshll.u32 %s5599_s18, 4  ;;  %s130_s7 = sshll.u32 %s5600_s19, 4  ;;  %s118_s26 = int_to_ptr.hbm [resolvable:$true] %s117_s26  ;;  %s131_s7 = int_to_ptr.hbm [resolvable:$true] %s130_s7 }
  0x18   :  { %97 = dma.hbm_to_vmem [thread:$0]  %s90_s4, 2048, %s92_s10, [#allocation6], %s3016_s6, %s3016_s6, %s3017_s27  }
  0x19   :  { %s3021_s28 = smov [#allocation10]   ;;  %s3022_s3 = smov [#allocation11]  }
  0x1a   :  { %s119_s29 = sshll.u32 %s3021_s28, 4  ;;  %s132_s18 = sshll.u32 %s3022_s3, 4  ;;  %s120_s29 = int_to_ptr.vmem [resolvable:$true] %s119_s29  ;;  %s133_s18 = int_to_ptr.vmem [resolvable:$true] %s132_s18 }
  0x1b   :  { %125 = dma.hbm_to_vmem [thread:$0]  %s118_s26, 2048, %s120_s29, [#allocation9], %s3016_s6, %s3016_s6, %s3017_s27  }
  0x1c   :  { %138 = dma.hbm_to_vmem [thread:$0]  %s131_s7, 2048, %s133_s18, [#allocation12], %s3016_s6, %s3016_s6, %s3017_s27  }
  0x1d   :  { %3005 = dma.done.wait [#allocation3], 2048  }
  0x1e   :  { %3006 = vsyncadd [#allocation3], 4294965248 }
  0x1f   :  { %3007 = dma.done.wait [#allocation6], 4096  }
  0x20   :  { %3008 = vsyncadd [#allocation6], 4294963200 }
  0x21   :  { %3009 = dma.done.wait [#allocation9], 4096  }
  0x22   :  { %3010 = vsyncadd [#allocation9], 4294963200 }
  0x23   :  { %3011 = dma.done.wait [#allocation12], 2048  }
  0x24   :  { %3012 = vsyncadd [#allocation12], 4294965248  ;;  %s5620_s16 = sld [smem:[#allocation22_spill]]  ;;  %vm197_vm0 = vcmask 1041409   ;;  %vm199_vm1 = vcmask 130048   ;;  %vm2507_vm2 = vcmask 122880  }
  0x25   :  { %s5621_s24 = sld [smem:[#allocation19_spill]]  ;;  %s2691_s25 = sshll.u32 %s5604_s23, 4  ;;  %s2692_s25 = int_to_ptr.hbm [resolvable:$true] %s2691_s25 }
  0x26   :  { %s5622_s15 = sld [smem:[#allocation23_spill]] }
  0x27   :  { %s5623_s10 = sld [smem:[#allocation21_spill]] }
  0x28   :  { %s5624_s1 = sld [smem:[#allocation24_spill]] }
  0x29   :  { %s5625_s7 = sld [smem:[#allocation25_spill]] }
  0x2a   :  { %v172_v0 = vld [vmem:[%s5620_s16 + $0x8] sm:$0xff]  ;;  %v171_v1 = vld [vmem:[%s5620_s16] sm:$0xff] }
  0x2b   :  { %216 = vmatpush.msra.mxu0 %v172_v0  ;;  %v3189_v2 = vld [vmem:[%s5621_s24] sm:$0xff]  ;;  %v3194_v3 = vld [vmem:[%s5621_s24 + $0x8] sm:$0xff]  ;;  %240 = vmatpush.msra.mxu1 %v172_v0 }
  0x2c   :  { %v196_v4 = vrot.slane %v3194_v3, 7  ;;  %265 = vmatpush.msra.mxu2 %v172_v0  ;;  %290 = vmatpush.msra.mxu3 %v172_v0  ;;  %v3202_v6 = vld [vmem:[%s5622_s15 + $0x78] sm:$0xff]  ;;  %v3208_v7 = vld [vmem:[%s5622_s15 + $0x70] sm:$0xff]  ;;  %v296_v8 = vrot.slane %v3189_v2, 4  ;;  %v3215_v9 = vld [vmem:[%s5622_s15 + $0x68] sm:$0xff]  ;;  %v297_v10 = vrot.slane %v3194_v3, 3 }
  0x2d   :  { %217 = vmatpush.msra.mxu0 %v171_v1  ;;  %241 = vmatpush.msra.mxu1 %v171_v1  ;;  %v3222_v11 = vld [vmem:[%s5622_s15 + $0x60] sm:$0xff]  ;;  %v3229_v13 = vld [vmem:[%s5622_s15 + $0x58] sm:$0xff]  ;;  %v3235_v14 = vld [vmem:[%s5622_s15 + $0x50] sm:$0xff]  ;;  %v222_v26 = vrot.slane %v3189_v2, 1  ;;  %v321_v28 = vrot.slane %v3189_v2, 5  ;;  %v322_v29 = vrot.slane %v3194_v3, 4 }
  0x2e   :  { %v198_v5 = vsel %vm197_vm0, %v196_v4, %v3189_v2  ;;  %266 = vmatpush.msra.mxu2 %v171_v1  ;;  %291 = vmatpush.msra.mxu3 %v171_v1  ;;  %v298_v12 = vsel %vm197_vm0, %v297_v10, %v296_v8  ;;  %v3242_v15 = vld [vmem:[%s5622_s15 + $0x48] sm:$0xff]  ;;  %v3248_v16 = vld [vmem:[%s5622_s15 + $0x40] sm:$0xff]  ;;  %v3254_v17 = vld [vmem:[%s5622_s15 + $0x38] sm:$0xff]  ;;  %v246_v38 = vrot.slane %v3189_v2, 2  ;;  %v247_v39 = vrot.slane %v3194_v3, 1 }
  0x2f   :  { %315 = vmatpush.msrb.mxu0 %v172_v0  ;;  %340 = vmatpush.msrb.mxu1 %v172_v0  ;;  %v3260_v18 = vld [vmem:[%s5622_s15 + $0x30] sm:$0xff]  ;;  %v3266_v19 = vld [vmem:[%s5622_s15 + $0x28] sm:$0xff]  ;;  %v3272_v20 = vld [vmem:[%s5622_s15 + $0x20] sm:$0xff]  ;;  %v223_v27 = vsel %vm197_vm0, %v3194_v3, %v222_v26  ;;  %v323_v30 = vsel %vm197_vm0, %v322_v29, %v321_v28  ;;  %v346_v41 = vrot.slane %v3189_v2, 6  ;;  %v347_v42 = vrot.slane %v3194_v3, 5 }
  0x30   :  { %2707 = vmatmul.msk.f32.vlgmr.msra.gmra.mxu0 %vm199_vm1, %v198_v5  ;;  %365 = vmatpush.msrb.mxu2 %v172_v0  ;;  %v3278_v21 = vld [vmem:[%s5622_s15 + $0x18] sm:$0xff]  ;;  %v3284_v22 = vld [vmem:[%s5622_s15 + $0x10] sm:$0xff]  ;;  %v3290_v23 = vld [vmem:[%s5622_s15 + $0x8] sm:$0xff]  ;;  %v248_v40 = vsel %vm197_vm0, %v247_v39, %v246_v38  ;;  %v271_v49 = vrot.slane %v3189_v2, 3  ;;  %v272_v50 = vrot.slane %v3194_v3, 2  ;;  %v371_v53 = vrot.slane %v3189_v2, 7 }
  0x31   :  { %316 = vmatpush.msrb.mxu0 %v171_v1  ;;  %341 = vmatpush.msrb.mxu1 %v171_v1  ;;  %v3296_v24 = vld [vmem:[%s5622_s15] sm:$0xff]  ;;  %v348_v43 = vsel %vm197_vm0, %v347_v42, %v346_v41  ;;  %v372_v54 = vrot.slane %v3194_v3, 6  ;;  %v3447_v56 = vld [vmem:[%s5625_s7 + $0x78] sm:$0xff]  ;;  %v3452_v57 = vld [vmem:[%s5625_s7 + $0x70] sm:$0xff] }
  0x32   :  { %366 = vmatpush.msrb.mxu2 %v171_v1  ;;  %390 = vmatpush.msrb.mxu3 %v172_v0  ;;  %v190_v25 = vld [vmem:[%s5623_s10] sm:$0x3]  ;;  %v273_v51 = vsel %vm197_vm0, %v272_v50, %v271_v49  ;;  %v3459_v58 = vld [vmem:[%s5625_s7 + $0x68] sm:$0xff]  ;;  %v3497_v2 = vld [vmem:[%s5625_s7 + $0x58] sm:$0xff] }
  0x33   :  { %396 = vmatpush.msra.mxu0 %v3202_v6  ;;  %2708 = vmatmul.msk.f32.vlgmr.msra.gmra.mxu1 %vm199_vm1, %v223_v27  ;;  %v3360_v33 = vld [vmem:[%s5624_s1] ss:$0 sm:$0xff]  ;;  %v373_v55 = vsel %vm197_vm0, %v372_v54, %v371_v53  ;;  %v3504_v3 = vld [vmem:[%s5625_s7 + $0x50] sm:$0xff]  ;;  %v3513_v4 = vld [vmem:[%s5625_s7 + $0x48] sm:$0xff]  ;;  %s5626_s1 = sld [smem:[#allocation26_spill]] }
  0x34   :  { %391 = vmatpush.msrb.mxu3 %v171_v1  ;;  %418 = vmatpush.msra.mxu1 %v3202_v6  ;;  %v3492_v1 = vld [vmem:[%s5625_s7 + $0x60] sm:$0xff]  ;;  %v3549_v8 = vld [vmem:[%s5625_s7 + $0x28] sm:$0xff]  ;;  %v3571_v10 = vld [vmem:[%s5625_s7 + $0x18] sm:$0xff] }
  0x35   :  { %397 = vmatpush.msra.mxu0 %v3208_v7  ;;  %2709 = vmatmul.msk.f32.vlgmr.msra.gmra.mxu2 %vm199_vm1, %v248_v40  ;;  %v3528_v5 = vld [vmem:[%s5625_s7 + $0x40] sm:$0xff] }
  0x36   :  { %419 = vmatpush.msra.mxu1 %v3208_v7  ;;  %440 = vmatpush.msra.mxu2 %v3202_v6  ;;  %v2715_v42 = vld [vmem:[%s5623_s10 + $0x2] sm:$0x3] }
  0x37   :  { %398 = vmatpush.msra.mxu0 %v3215_v9  ;;  %2710 = vmatmul.msk.f32.vlgmr.msra.gmra.mxu3 %vm199_vm1, %v273_v51 }
  0x38   :  { %2711 = vmatmul.msk.f32.vlgmr.msrb.gmra.mxu0 %vm199_vm1, %v298_v12  ;;  %420 = vmatpush.msra.mxu1 %v3215_v9  ;;  %v3585_v12 = vld [vmem:[%s5625_s7 + $0x8] sm:$0xff] }
  0x39   :  { %399 = vmatpush.msra.mxu0 %v3222_v11  ;;  %441 = vmatpush.msra.mxu2 %v3208_v7  ;;  %v3667_v26 = vld [vmem:[%s5626_s1 + $0x48] sm:$0xff]  ;;  %v3674_v27 = vld [vmem:[%s5626_s1 + $0x40] sm:$0xff]  ;;  %v3680_v28 = vld [vmem:[%s5626_s1 + $0x38] sm:$0xff] }
  0x3a   :  { %421 = vmatpush.msra.mxu1 %v3222_v11  ;;  %462 = vmatpush.msra.mxu3 %v3202_v6  ;;  %v3686_v29 = vld [vmem:[%s5626_s1 + $0x30] sm:$0xff] }
  0x3b   :  { %400 = vmatpush.msra.mxu0 %v3229_v13  ;;  %2712 = vmatmul.msk.f32.vlgmr.msrb.gmra.mxu1 %vm199_vm1, %v323_v30  ;;  %v3691_v30 = vld [vmem:[%s5626_s1 + $0x28] sm:$0xff] }
  0x3c   :  { %422 = vmatpush.msra.mxu1 %v3229_v13  ;;  %442 = vmatpush.msra.mxu2 %v3215_v9 }
  0x3d   :  { %401 = vmatpush.msra.mxu0 %v3235_v14  ;;  %2713 = vmatmul.msk.f32.vlgmr.msrb.gmra.mxu2 %vm199_vm1, %v348_v43 }
  0x3e   :  { %423 = vmatpush.msra.mxu1 %v3235_v14  ;;  %443 = vmatpush.msra.mxu2 %v3222_v11 }
  0x3f   :  { %402 = vmatpush.msra.mxu0 %v3242_v15  ;;  %463 = vmatpush.msra.mxu3 %v3208_v7 }
  0x40   :  { %424 = vmatpush.msra.mxu1 %v3242_v15  ;;  %444 = vmatpush.msra.mxu2 %v3229_v13 }
  0x41   :  { %403 = vmatpush.msra.mxu0 %v3248_v16  ;;  %464 = vmatpush.msra.mxu3 %v3215_v9 }
  0x42   :  { %425 = vmatpush.msra.mxu1 %v3248_v16  ;;  %445 = vmatpush.msra.mxu2 %v3235_v14 }
  0x43   :  { %404 = vmatpush.msra.mxu0 %v3254_v17  ;;  %465 = vmatpush.msra.mxu3 %v3222_v11 }
  0x44   :  { %426 = vmatpush.msra.mxu1 %v3254_v17  ;;  %446 = vmatpush.msra.mxu2 %v3242_v15 }
  0x45   :  { %405 = vmatpush.msra.mxu0 %v3260_v18  ;;  %466 = vmatpush.msra.mxu3 %v3229_v13 }
  0x46   :  { %427 = vmatpush.msra.mxu1 %v3260_v18  ;;  %447 = vmatpush.msra.mxu2 %v3248_v16 }
  0x47   :  { %406 = vmatpush.msra.mxu0 %v3266_v19  ;;  %467 = vmatpush.msra.mxu3 %v3235_v14 }
  0x48   :  { %428 = vmatpush.msra.mxu1 %v3266_v19  ;;  %448 = vmatpush.msra.mxu2 %v3254_v17 }
  0x49   :  { %407 = vmatpush.msra.mxu0 %v3272_v20  ;;  %468 = vmatpush.msra.mxu3 %v3242_v15 }
  0x4a   :  { %429 = vmatpush.msra.mxu1 %v3272_v20  ;;  %449 = vmatpush.msra.mxu2 %v3260_v18 }
  0x4b   :  { %408 = vmatpush.msra.mxu0 %v3278_v21  ;;  %469 = vmatpush.msra.mxu3 %v3248_v16 }
  0x4c   :  { %430 = vmatpush.msra.mxu1 %v3278_v21  ;;  %450 = vmatpush.msra.mxu2 %v3266_v19 }
  0x4d   :  { %409 = vmatpush.msra.mxu0 %v3284_v22  ;;  %470 = vmatpush.msra.mxu3 %v3254_v17 }
  0x4e   :  { %431 = vmatpush.msra.mxu1 %v3284_v22  ;;  %451 = vmatpush.msra.mxu2 %v3272_v20 }
  0x4f   :  { %410 = vmatpush.msra.mxu0 %v3290_v23  ;;  %471 = vmatpush.msra.mxu3 %v3260_v18 }
  0x50   :  { %432 = vmatpush.msra.mxu1 %v3290_v23  ;;  %452 = vmatpush.msra.mxu2 %v3278_v21 }
  0x51   :  { %411 = vmatpush.msra.mxu0 %v3296_v24  ;;  %472 = vmatpush.msra.mxu3 %v3266_v19 }
  0x52   :  { %412 = vmatmul.f32.vlgmr.msra.gmra.mxu0 %v190_v25  ;;  %433 = vmatpush.msra.mxu1 %v3296_v24  ;;  %v3661_v25 = vld [vmem:[%s5626_s1 + $0x50] sm:$0xff] }
  0x53   :  { %484 = vmatpush.msrb.mxu0 %v3202_v6  ;;  %453 = vmatpush.msra.mxu2 %v3284_v22 }
  0x54   :  { %506 = vmatpush.msrb.mxu1 %v3202_v6  ;;  %473 = vmatpush.msra.mxu3 %v3272_v20 }
  0x55   :  { %485 = vmatpush.msrb.mxu0 %v3208_v7  ;;  %454 = vmatpush.msra.mxu2 %v3290_v23 }
  0x56   :  { %507 = vmatpush.msrb.mxu1 %v3208_v7  ;;  %474 = vmatpush.msra.mxu3 %v3278_v21 }
  0x57   :  { %486 = vmatpush.msrb.mxu0 %v3215_v9  ;;  %455 = vmatpush.msra.mxu2 %v3296_v24 }
  0x58   :  { %508 = vmatpush.msrb.mxu1 %v3215_v9  ;;  %475 = vmatpush.msra.mxu3 %v3284_v22 }
  0x59   :  { %487 = vmatpush.msrb.mxu0 %v3222_v11  ;;  %528 = vmatpush.msrb.mxu2 %v3202_v6 }
  0x5a   :  { %509 = vmatpush.msrb.mxu1 %v3222_v11  ;;  %476 = vmatpush.msra.mxu3 %v3290_v23 }
  0x5b   :  { %488 = vmatpush.msrb.mxu0 %v3229_v13  ;;  %529 = vmatpush.msrb.mxu2 %v3208_v7 }
  0x5c   :  { %510 = vmatpush.msrb.mxu1 %v3229_v13  ;;  %477 = vmatpush.msra.mxu3 %v3296_v24 }
  0x5d   :  { %489 = vmatpush.msrb.mxu0 %v3235_v14  ;;  %530 = vmatpush.msrb.mxu2 %v3215_v9 }
  0x5e   :  { %511 = vmatpush.msrb.mxu1 %v3235_v14  ;;  %2714 = vmatmul.msk.f32.vlgmr.msrb.gmra.mxu3 %vm199_vm1, %v373_v55 }
  0x5f   :  { %490 = vmatpush.msrb.mxu0 %v3242_v15  ;;  %531 = vmatpush.msrb.mxu2 %v3222_v11 }
  0x60   :  { %512 = vmatpush.msrb.mxu1 %v3242_v15  ;;  %550 = vmatpush.msrb.mxu3 %v3202_v6  ;;  %v3535_v6 = vld [vmem:[%s5625_s7 + $0x38] sm:$0xff] }
  0x61   :  { %491 = vmatpush.msrb.mxu0 %v3248_v16  ;;  %532 = vmatpush.msrb.mxu2 %v3229_v13 }
  0x62   :  { %513 = vmatpush.msrb.mxu1 %v3248_v16  ;;  %551 = vmatpush.msrb.mxu3 %v3208_v7  ;;  %v3543_v7 = vld [vmem:[%s5625_s7 + $0x30] sm:$0xff] }
  0x63   :  { %492 = vmatpush.msrb.mxu0 %v3254_v17  ;;  %533 = vmatpush.msrb.mxu2 %v3235_v14 }
  0x64   :  { %514 = vmatpush.msrb.mxu1 %v3254_v17  ;;  %552 = vmatpush.msrb.mxu3 %v3215_v9  ;;  %v3558_v9 = vld [vmem:[%s5625_s7 + $0x20] sm:$0xff] }
  0x65   :  { %493 = vmatpush.msrb.mxu0 %v3260_v18  ;;  %534 = vmatpush.msrb.mxu2 %v3242_v15 }
  0x66   :  { %515 = vmatpush.msrb.mxu1 %v3260_v18  ;;  %553 = vmatpush.msrb.mxu3 %v3222_v11  ;;  %v3576_v11 = vld [vmem:[%s5625_s7 + $0x10] sm:$0xff] }
  0x67   :  { %494 = vmatpush.msrb.mxu0 %v3266_v19  ;;  %535 = vmatpush.msrb.mxu2 %v3248_v16 }
  0x68   :  { %516 = vmatpush.msrb.mxu1 %v3266_v19  ;;  %554 = vmatpush.msrb.mxu3 %v3229_v13 }
  0x69   :  { %495 = vmatpush.msrb.mxu0 %v3272_v20  ;;  %536 = vmatpush.msrb.mxu2 %v3254_v17 }
  0x6a   :  { %517 = vmatpush.msrb.mxu1 %v3272_v20  ;;  %555 = vmatpush.msrb.mxu3 %v3235_v14  ;;  %v3594_v14 = vld [vmem:[%s5625_s7] sm:$0xff] }
  0x6b   :  { %496 = vmatpush.msrb.mxu0 %v3278_v21  ;;  %537 = vmatpush.msrb.mxu2 %v3260_v18 }
  0x6c   :  { %518 = vmatpush.msrb.mxu1 %v3278_v21  ;;  %556 = vmatpush.msrb.mxu3 %v3242_v15 }
  0x6d   :  { %497 = vmatpush.msrb.mxu0 %v3284_v22  ;;  %538 = vmatpush.msrb.mxu2 %v3266_v19 }
  0x6e   :  { %519 = vmatpush.msrb.mxu1 %v3284_v22  ;;  %557 = vmatpush.msrb.mxu3 %v3248_v16 }
  0x6f   :  { %498 = vmatpush.msrb.mxu0 %v3290_v23  ;;  %539 = vmatpush.msrb.mxu2 %v3272_v20 }
  0x70   :  { %520 = vmatpush.msrb.mxu1 %v3290_v23  ;;  %558 = vmatpush.msrb.mxu3 %v3254_v17 }
  0x71   :  { %499 = vmatpush.msrb.mxu0 %v3296_v24  ;;  %540 = vmatpush.msrb.mxu2 %v3278_v21 }
  0x72   :  { %521 = vmatpush.msrb.mxu1 %v3296_v24  ;;  %559 = vmatpush.msrb.mxu3 %v3260_v18 }
  0x73   :  { %541 = vmatpush.msrb.mxu2 %v3284_v22  ;;  %610 = vmatpush.msra.mxu0 %v3447_v56 }
  0x74   :  { %560 = vmatpush.msrb.mxu3 %v3266_v19 }
  0x75   :  { %542 = vmatpush.msrb.mxu2 %v3290_v23  ;;  %611 = vmatpush.msra.mxu0 %v3452_v57 }
  0x76   :  { %561 = vmatpush.msrb.mxu3 %v3272_v20  ;;  %v3631_v20 = vld [vmem:[%s5626_s1 + $0x78] sm:$0xff] }
  0x77   :  { %543 = vmatpush.msrb.mxu2 %v3296_v24  ;;  %612 = vmatpush.msra.mxu0 %v3459_v58 }
  0x78   :  { %562 = vmatpush.msrb.mxu3 %v3278_v21  ;;  %v3637_v21 = vld [vmem:[%s5626_s1 + $0x70] sm:$0xff] }
  0x79   :  { %613 = vmatpush.msra.mxu0 %v3492_v1 }
  0x7a   :  { %563 = vmatpush.msrb.mxu3 %v3284_v22  ;;  %v3643_v22 = vld [vmem:[%s5626_s1 + $0x68] sm:$0xff] }
  0x7b   :  { %614 = vmatpush.msra.mxu0 %v3497_v2 }
  0x7c   :  { %564 = vmatpush.msrb.mxu3 %v3290_v23  ;;  %v3649_v23 = vld [vmem:[%s5626_s1 + $0x60] sm:$0xff] }
  0x7d   :  { %615 = vmatpush.msra.mxu0 %v3504_v3 }
  0x7e   :  { %565 = vmatpush.msrb.mxu3 %v3296_v24  ;;  %v3655_v24 = vld [vmem:[%s5626_s1 + $0x58] sm:$0xff] }
  0x7f   :  { %616 = vmatpush.msra.mxu0 %v3513_v4 }
  0x81   :  { %617 = vmatpush.msra.mxu0 %v3528_v5 }
  0x83   :  { %618 = vmatpush.msra.mxu0 %v3535_v6 }
  0x85   :  { %619 = vmatpush.msra.mxu0 %v3543_v7 }
  0x87   :  { %620 = vmatpush.msra.mxu0 %v3549_v8 }
  0x89   :  { %621 = vmatpush.msra.mxu0 %v3558_v9 }
  0x8b   :  { %622 = vmatpush.msra.mxu0 %v3571_v10 }
  0x8d   :  { %623 = vmatpush.msra.mxu0 %v3576_v11 }
  0x8f   :  { %624 = vmatpush.msra.mxu0 %v3585_v12 }
  0x91   :  { %625 = vmatpush.msra.mxu0 %v3594_v14 }
  0xad   :  { %v219_v31 = vpop.f32.mrf.mxu0 }
  0xae   :  { %v220_v34 = vadd.f32 %v3360_v33, %v219_v31  ;;  %v3698_v31 = vld [vmem:[%s5626_s1 + $0x20] sm:$0xff] }
  0xb0   :  { %v243_v44 = vpop.f32.mrf.mxu1 }
  0xb1   :  { %v244_v46 = vadd.f32 %v3360_v33, %v243_v44 }
  0xb5   :  { %v3352_v32 = vpop.f32.mrf.mxu0 }
  0xb6   :  { %v319_v38 = vadd.f32 %v3360_v33, %v3352_v32 }
  0xb8   :  { %v3404_v45 = vpop.f32.mrf.mxu1  ;;  %v268_v59 = vpop.f32.mrf.mxu2 }
  0xb9   :  { %v269_v61 = vadd.f32 %v3360_v33, %v268_v59  ;;  %v344_v43 = vadd.f32 %v3360_v33, %v3404_v45 }
  0xba   :  { %v293_v13 = vpop.f32.mrf.mxu3 }
  0xbb   :  { %v294_v16 = vadd.f32 %v3360_v33, %v293_v13 }
  0xc0   :  { %v3473_v60 = vpop.f32.mrf.mxu2 }
  0xc1   :  { %v369_v55 = vadd.f32 %v3360_v33, %v3473_v60 }
  0xcf   :  { %v413_v35 = vpop.f32.mrf.mxu0 }
  0xd0   :  { %v416_v36 = vadd.f32 %v413_v35, %v220_v34  ;;  %v3704_v34 = vld [vmem:[%s5626_s1 + $0x18] sm:$0xff]  ;;  %v3709_v35 = vld [vmem:[%s5626_s1 + $0x10] sm:$0xff] }
  0xd2   :  { %2741 = vtanh.f32 %v416_v36  ;;  %v3715_v36 = vld [vmem:[%s5626_s1 + $0x8] sm:$0xff] }
  0xd8   :  { %v3367_v37 = vpop.eup %2741 }
  0xd9   :  { %434 = vmatmul.f32.vlgmr.msra.gmra.mxu1 %v3367_v37 }
  0xda   :  { %630 = vmatpush.msra.mxu1 %v3447_v56 }
  0xdc   :  { %631 = vmatpush.msra.mxu1 %v3452_v57 }
  0xde   :  { %632 = vmatpush.msra.mxu1 %v3459_v58 }
  0xe0   :  { %633 = vmatpush.msra.mxu1 %v3492_v1 }
  0xe1   :  { %v3606_v15 = vpop.f32.mrf.mxu3 }
  0xe2   :  { %634 = vmatpush.msra.mxu1 %v3497_v2 }
  0xe4   :  { %635 = vmatpush.msra.mxu1 %v3504_v3 }
  0xe6   :  { %636 = vmatpush.msra.mxu1 %v3513_v4 }
  0xe8   :  { %637 = vmatpush.msra.mxu1 %v3528_v5 }
  0xea   :  { %638 = vmatpush.msra.mxu1 %v3535_v6 }
  0xec   :  { %639 = vmatpush.msra.mxu1 %v3543_v7 }
  0xee   :  { %640 = vmatpush.msra.mxu1 %v3549_v8 }
  0xf0   :  { %641 = vmatpush.msra.mxu1 %v3558_v9 }
  0xf2   :  { %642 = vmatpush.msra.mxu1 %v3571_v10 }
  0xf4   :  { %643 = vmatpush.msra.mxu1 %v3576_v11 }
  0xf6   :  { %644 = vmatpush.msra.mxu1 %v3585_v12 }
  0xf8   :  { %645 = vmatpush.msra.mxu1 %v3594_v14 }
 0x156   :  { %v435_v47 = vpop.f32.mrf.mxu1 }
 0x157   :  { %v438_v48 = vadd.f32 %v435_v47, %v244_v46 }
 0x159   :  { %2743 = vtanh.f32 %v438_v48  ;;  %v3786_v48 = vld [vmem:[%s5589_s8] ss:$0 sm:$0xff]  ;;  %s5627_s8 = sld [smem:[#allocation20_spill]] }
 0x15f   :  { %v3419_v52 = vpop.eup %2743 }
 0x160   :  { %456 = vmatmul.f32.vlgmr.msra.gmra.mxu2 %v3419_v52 }
 0x161   :  { %650 = vmatpush.msra.mxu2 %v3447_v56 }
 0x163   :  { %651 = vmatpush.msra.mxu2 %v3452_v57 }
 0x165   :  { %652 = vmatpush.msra.mxu2 %v3459_v58 }
 0x167   :  { %653 = vmatpush.msra.mxu2 %v3492_v1 }
 0x169   :  { %654 = vmatpush.msra.mxu2 %v3497_v2 }
 0x16b   :  { %655 = vmatpush.msra.mxu2 %v3504_v3 }
 0x16d   :  { %656 = vmatpush.msra.mxu2 %v3513_v4 }
 0x16f   :  { %657 = vmatpush.msra.mxu2 %v3528_v5 }
 0x171   :  { %658 = vmatpush.msra.mxu2 %v3535_v6 }
 0x173   :  { %659 = vmatpush.msra.mxu2 %v3543_v7 }
 0x175   :  { %660 = vmatpush.msra.mxu2 %v3549_v8 }
 0x177   :  { %661 = vmatpush.msra.mxu2 %v3558_v9 }
 0x179   :  { %662 = vmatpush.msra.mxu2 %v3571_v10 }
 0x17b   :  { %663 = vmatpush.msra.mxu2 %v3576_v11 }
 0x17d   :  { %664 = vmatpush.msra.mxu2 %v3585_v12 }
 0x17f   :  { %665 = vmatpush.msra.mxu2 %v3594_v14 }
 0x1e3   :  { %v457_v62 = vpop.f32.mrf.mxu2 }
 0x1e4   :  { %v460_v63 = vadd.f32 %v457_v62, %v269_v61 }
 0x1e6   :  { %2745 = vtanh.f32 %v460_v63 }
 0x1ec   :  { %v3483_v0 = vpop.eup %2745 }
 0x1ed   :  { %478 = vmatmul.f32.vlgmr.msra.gmra.mxu3 %v3483_v0 }
 0x1ee   :  { %670 = vmatpush.msra.mxu3 %v3447_v56 }
 0x1f0   :  { %671 = vmatpush.msra.mxu3 %v3452_v57 }
 0x1f2   :  { %672 = vmatpush.msra.mxu3 %v3459_v58 }
 0x1f4   :  { %673 = vmatpush.msra.mxu3 %v3492_v1 }
 0x1f6   :  { %674 = vmatpush.msra.mxu3 %v3497_v2 }
 0x1f8   :  { %675 = vmatpush.msra.mxu3 %v3504_v3 }
 0x1fa   :  { %676 = vmatpush.msra.mxu3 %v3513_v4 }
 0x1fc   :  { %677 = vmatpush.msra.mxu3 %v3528_v5 }
 0x1fe   :  { %678 = vmatpush.msra.mxu3 %v3535_v6 }
 0x200   :  { %679 = vmatpush.msra.mxu3 %v3543_v7 }
 0x202   :  { %680 = vmatpush.msra.mxu3 %v3549_v8 }
 0x204   :  { %681 = vmatpush.msra.mxu3 %v3558_v9 }
 0x206   :  { %682 = vmatpush.msra.mxu3 %v3571_v10 }
 0x208   :  { %683 = vmatpush.msra.mxu3 %v3576_v11 }
 0x20a   :  { %684 = vmatpush.msra.mxu3 %v3585_v12 }
 0x20c   :  { %685 = vmatpush.msra.mxu3 %v3594_v14 }
 0x270   :  { %v479_v17 = vpop.f32.mrf.mxu3 }
 0x271   :  { %v482_v18 = vadd.f32 %v479_v17, %v294_v16  ;;  %v3998_v16 = vld [vmem:[%s5590_s9 + $0x38] sm:$0xff]  ;;  %v4006_v17 = vld [vmem:[%s5590_s9 + $0x30] sm:$0xff] }
 0x273   :  { %2747 = vtanh.f32 %v482_v18  ;;  %v4012_v18 = vld [vmem:[%s5590_s9 + $0x28] sm:$0xff] }
 0x279   :  { %v3609_v19 = vpop.eup %2747 }
 0x27a   :  { %500 = vmatmul.f32.vlgmr.msrb.gmra.mxu0 %v3609_v19 }
 0x27b   :  { %690 = vmatpush.msrb.mxu0 %v3447_v56 }
 0x27d   :  { %691 = vmatpush.msrb.mxu0 %v3452_v57 }
 0x27f   :  { %692 = vmatpush.msrb.mxu0 %v3459_v58 }
 0x281   :  { %693 = vmatpush.msrb.mxu0 %v3492_v1 }
 0x282   :  { %626 = vmatmul.f32.vlgmr.msra.gmra.mxu0 %v3367_v37  ;;  %v3721_v37 = vld [vmem:[%s5626_s1] sm:$0xff] }
 0x283   :  { %694 = vmatpush.msrb.mxu0 %v3497_v2 }
 0x285   :  { %695 = vmatpush.msrb.mxu0 %v3504_v3 }
 0x287   :  { %696 = vmatpush.msrb.mxu0 %v3513_v4 }
 0x289   :  { %697 = vmatpush.msrb.mxu0 %v3528_v5 }
 0x28b   :  { %698 = vmatpush.msrb.mxu0 %v3535_v6 }
 0x28d   :  { %699 = vmatpush.msrb.mxu0 %v3543_v7 }
 0x28f   :  { %700 = vmatpush.msrb.mxu0 %v3549_v8 }
 0x291   :  { %701 = vmatpush.msrb.mxu0 %v3558_v9 }
 0x293   :  { %702 = vmatpush.msrb.mxu0 %v3571_v10 }
 0x295   :  { %703 = vmatpush.msrb.mxu0 %v3576_v11 }
 0x297   :  { %704 = vmatpush.msrb.mxu0 %v3585_v12 }
 0x299   :  { %705 = vmatpush.msrb.mxu0 %v3594_v14 }
 0x29b   :  { %770 = vmatpush.msra.mxu0 %v3631_v20 }
 0x29d   :  { %771 = vmatpush.msra.mxu0 %v3637_v21 }
 0x29f   :  { %772 = vmatpush.msra.mxu0 %v3643_v22 }
 0x2a1   :  { %773 = vmatpush.msra.mxu0 %v3649_v23 }
 0x2a3   :  { %774 = vmatpush.msra.mxu0 %v3655_v24 }
 0x2a5   :  { %775 = vmatpush.msra.mxu0 %v3661_v25 }
 0x2a7   :  { %776 = vmatpush.msra.mxu0 %v3667_v26 }
 0x2a9   :  { %777 = vmatpush.msra.mxu0 %v3674_v27 }
 0x2ab   :  { %778 = vmatpush.msra.mxu0 %v3680_v28 }
 0x2ad   :  { %779 = vmatpush.msra.mxu0 %v3686_v29 }
 0x2af   :  { %780 = vmatpush.msra.mxu0 %v3691_v30 }
 0x2b1   :  { %781 = vmatpush.msra.mxu0 %v3698_v31 }
 0x2b3   :  { %782 = vmatpush.msra.mxu0 %v3704_v34 }
 0x2b5   :  { %783 = vmatpush.msra.mxu0 %v3709_v35 }
 0x2b7   :  { %784 = vmatpush.msra.mxu0 %v3715_v36 }
 0x2b9   :  { %785 = vmatpush.msra.mxu0 %v3721_v37 }
 0x2f7   :  { %v501_v39 = vpop.f32.mrf.mxu0 }
 0x2f8   :  { %v504_v40 = vadd.f32 %v501_v39, %v319_v38  ;;  %v4109_v38 = vld [vmem:[#allocation2 + $0x48] sm:$0xff]  ;;  %v4113_v39 = vld [vmem:[#allocation2 + $0x40] sm:$0xff] }
 0x2fa   :  { %2749 = vtanh.f32 %v504_v40  ;;  %v4116_v40 = vld [vmem:[#allocation2 + $0x38] sm:$0xff] }
 0x2ff   :  { %v627_v32 = vpop.f32.mrf.mxu0 }
 0x300   :  { %v2750_v41 = vpop.eup %2749  ;;  %v628_v49 = vadd.f32 %v3786_v48, %v627_v32  ;;  %v4125_v32 = vld [vmem:[#allocation2 + $0x20] sm:$0xff] }
 0x301   :  { %522 = vmatmul.f32.vlgmr.msrb.gmra.mxu1 %v2750_v41  ;;  %706 = vmatmul.f32.vlgmr.msrb.gmra.mxu0 %v2750_v41  ;;  %v4119_v41 = vld [vmem:[#allocation2 + $0x30] sm:$0xff] }
 0x302   :  { %710 = vmatpush.msrb.mxu1 %v3447_v56  ;;  %858 = vmatpush.msrb.mxu0 %v3631_v20 }
 0x304   :  { %711 = vmatpush.msrb.mxu1 %v3452_v57  ;;  %859 = vmatpush.msrb.mxu0 %v3637_v21 }
 0x306   :  { %712 = vmatpush.msrb.mxu1 %v3459_v58  ;;  %860 = vmatpush.msrb.mxu0 %v3643_v22 }
 0x308   :  { %713 = vmatpush.msrb.mxu1 %v3492_v1  ;;  %861 = vmatpush.msrb.mxu0 %v3649_v23 }
 0x309   :  { %646 = vmatmul.f32.vlgmr.msra.gmra.mxu1 %v3419_v52  ;;  %786 = vmatmul.f32.vlgmr.msra.gmra.mxu0 %v2715_v42  ;;  %v4121_v42 = vld [vmem:[#allocation2 + $0x28] sm:$0xff] }
 0x30a   :  { %714 = vmatpush.msrb.mxu1 %v3497_v2  ;;  %862 = vmatpush.msrb.mxu0 %v3655_v24 }
 0x30c   :  { %715 = vmatpush.msrb.mxu1 %v3504_v3  ;;  %863 = vmatpush.msrb.mxu0 %v3661_v25 }
 0x30e   :  { %716 = vmatpush.msrb.mxu1 %v3513_v4  ;;  %864 = vmatpush.msrb.mxu0 %v3667_v26 }
 0x310   :  { %717 = vmatpush.msrb.mxu1 %v3528_v5  ;;  %865 = vmatpush.msrb.mxu0 %v3674_v27 }
 0x312   :  { %718 = vmatpush.msrb.mxu1 %v3535_v6  ;;  %866 = vmatpush.msrb.mxu0 %v3680_v28 }
 0x314   :  { %719 = vmatpush.msrb.mxu1 %v3543_v7  ;;  %867 = vmatpush.msrb.mxu0 %v3686_v29 }
 0x316   :  { %720 = vmatpush.msrb.mxu1 %v3549_v8  ;;  %868 = vmatpush.msrb.mxu0 %v3691_v30 }
 0x318   :  { %721 = vmatpush.msrb.mxu1 %v3558_v9  ;;  %869 = vmatpush.msrb.mxu0 %v3698_v31 }
 0x31a   :  { %722 = vmatpush.msrb.mxu1 %v3571_v10  ;;  %870 = vmatpush.msrb.mxu0 %v3704_v34 }
 0x31c   :  { %723 = vmatpush.msrb.mxu1 %v3576_v11  ;;  %871 = vmatpush.msrb.mxu0 %v3709_v35 }
 0x31e   :  { %724 = vmatpush.msrb.mxu1 %v3585_v12  ;;  %872 = vmatpush.msrb.mxu0 %v3715_v36 }
 0x320   :  { %725 = vmatpush.msrb.mxu1 %v3594_v14  ;;  %873 = vmatpush.msrb.mxu0 %v3721_v37 }
 0x322   :  { %792 = vmatpush.msra.mxu1 %v3631_v20 }
 0x324   :  { %793 = vmatpush.msra.mxu1 %v3637_v21 }
 0x326   :  { %794 = vmatpush.msra.mxu1 %v3643_v22 }
 0x328   :  { %795 = vmatpush.msra.mxu1 %v3649_v23 }
 0x32a   :  { %796 = vmatpush.msra.mxu1 %v3655_v24 }
 0x32c   :  { %797 = vmatpush.msra.mxu1 %v3661_v25 }
 0x32e   :  { %798 = vmatpush.msra.mxu1 %v3667_v26 }
 0x330   :  { %799 = vmatpush.msra.mxu1 %v3674_v27 }
 0x332   :  { %800 = vmatpush.msra.mxu1 %v3680_v28 }
 0x334   :  { %801 = vmatpush.msra.mxu1 %v3686_v29 }
 0x336   :  { %802 = vmatpush.msra.mxu1 %v3691_v30 }
 0x338   :  { %803 = vmatpush.msra.mxu1 %v3698_v31 }
 0x33a   :  { %804 = vmatpush.msra.mxu1 %v3704_v34 }
 0x33c   :  { %805 = vmatpush.msra.mxu1 %v3709_v35 }
 0x33e   :  { %806 = vmatpush.msra.mxu1 %v3715_v36 }
 0x340   :  { %807 = vmatpush.msra.mxu1 %v3721_v37 }
 0x37e   :  { %v523_v44 = vpop.f32.mrf.mxu1  ;;  %v3781_v46 = vpop.f32.mrf.mxu0 }
 0x37f   :  { %v526_v47 = vadd.f32 %v523_v44, %v344_v43  ;;  %v4128_v43 = vld [vmem:[#allocation2 + $0x18] sm:$0xff]  ;;  %v4130_v44 = vld [vmem:[#allocation2 + $0x10] sm:$0xff] }
 0x381   :  { %2751 = vtanh.f32 %v526_v47  ;;  %v4133_v47 = vld [vmem:[#allocation2 + $0x8] sm:$0xff] }
 0x386   :  { %v787_v50 = vpop.f32.mrf.mxu0  ;;  %v647_v53 = vpop.f32.mrf.mxu1 }
 0x387   :  { %v2752_v51 = vpop.eup %2751  ;;  %v790_v52 = vadd.f32 %v787_v50, %v628_v49  ;;  %v648_v63 = vadd.f32 %v3786_v48, %v647_v53  ;;  %v4136_v49 = vld [vmem:[#allocation2] sm:$0xff]  ;;  %v708_v50 = vadd.f32 %v3786_v48, %v3781_v46 }
 0x388   :  { %544 = vmatmul.f32.vlgmr.msrb.gmra.mxu2 %v2752_v51  ;;  %726 = vmatmul.f32.vlgmr.msrb.gmra.mxu1 %v2752_v51  ;;  %v2716_v53 = vld [vmem:[%s5623_s10 + $0x4] sm:$0x3] }
 0x389   :  { %2753 = vtanh.f32 %v790_v52  ;;  %730 = vmatpush.msrb.mxu2 %v3447_v56  ;;  %880 = vmatpush.msrb.mxu1 %v3631_v20 }
 0x38b   :  { %731 = vmatpush.msrb.mxu2 %v3452_v57  ;;  %881 = vmatpush.msrb.mxu1 %v3637_v21 }
 0x38d   :  { %732 = vmatpush.msrb.mxu2 %v3459_v58  ;;  %882 = vmatpush.msrb.mxu1 %v3643_v22 }
 0x38f   :  { %v3795_v45 = vpop.eup %2753  ;;  %733 = vmatpush.msrb.mxu2 %v3492_v1  ;;  %883 = vmatpush.msrb.mxu1 %v3649_v23 }
 0x390   :  { %666 = vmatmul.f32.vlgmr.msra.gmra.mxu2 %v3483_v0  ;;  %808 = vmatmul.f32.vlgmr.msra.gmra.mxu1 %v3795_v45 }
 0x391   :  { %734 = vmatpush.msrb.mxu2 %v3497_v2  ;;  %884 = vmatpush.msrb.mxu1 %v3655_v24 }
 0x393   :  { %735 = vmatpush.msrb.mxu2 %v3504_v3  ;;  %885 = vmatpush.msrb.mxu1 %v3661_v25 }
 0x395   :  { %736 = vmatpush.msrb.mxu2 %v3513_v4  ;;  %886 = vmatpush.msrb.mxu1 %v3667_v26 }
 0x397   :  { %737 = vmatpush.msrb.mxu2 %v3528_v5  ;;  %887 = vmatpush.msrb.mxu1 %v3674_v27 }
 0x399   :  { %738 = vmatpush.msrb.mxu2 %v3535_v6  ;;  %888 = vmatpush.msrb.mxu1 %v3680_v28 }
 0x39b   :  { %739 = vmatpush.msrb.mxu2 %v3543_v7  ;;  %889 = vmatpush.msrb.mxu1 %v3686_v29 }
 0x39d   :  { %740 = vmatpush.msrb.mxu2 %v3549_v8  ;;  %890 = vmatpush.msrb.mxu1 %v3691_v30 }
 0x39f   :  { %741 = vmatpush.msrb.mxu2 %v3558_v9  ;;  %891 = vmatpush.msrb.mxu1 %v3698_v31 }
 0x3a1   :  { %742 = vmatpush.msrb.mxu2 %v3571_v10  ;;  %892 = vmatpush.msrb.mxu1 %v3704_v34 }
 0x3a3   :  { %743 = vmatpush.msrb.mxu2 %v3576_v11  ;;  %893 = vmatpush.msrb.mxu1 %v3709_v35 }
 0x3a5   :  { %744 = vmatpush.msrb.mxu2 %v3585_v12  ;;  %894 = vmatpush.msrb.mxu1 %v3715_v36 }
 0x3a7   :  { %745 = vmatpush.msrb.mxu2 %v3594_v14  ;;  %895 = vmatpush.msrb.mxu1 %v3721_v37 }
 0x3a9   :  { %814 = vmatpush.msra.mxu2 %v3631_v20 }
 0x3ab   :  { %815 = vmatpush.msra.mxu2 %v3637_v21 }
 0x3ad   :  { %816 = vmatpush.msra.mxu2 %v3643_v22 }
 0x3af   :  { %817 = vmatpush.msra.mxu2 %v3649_v23 }
 0x3b1   :  { %818 = vmatpush.msra.mxu2 %v3655_v24 }
 0x3b3   :  { %819 = vmatpush.msra.mxu2 %v3661_v25 }
 0x3b5   :  { %820 = vmatpush.msra.mxu2 %v3667_v26 }
 0x3b7   :  { %821 = vmatpush.msra.mxu2 %v3674_v27 }
 0x3b9   :  { %822 = vmatpush.msra.mxu2 %v3680_v28 }
 0x3bb   :  { %823 = vmatpush.msra.mxu2 %v3686_v29 }
 0x3bd   :  { %824 = vmatpush.msra.mxu2 %v3691_v30 }
 0x3bf   :  { %825 = vmatpush.msra.mxu2 %v3698_v31 }
 0x3c1   :  { %826 = vmatpush.msra.mxu2 %v3704_v34 }
 0x3c3   :  { %827 = vmatpush.msra.mxu2 %v3709_v35 }
 0x3c5   :  { %828 = vmatpush.msra.mxu2 %v3715_v36 }
 0x3c7   :  { %829 = vmatpush.msra.mxu2 %v3721_v37 }
 0x405   :  { %v3841_v54 = vpop.f32.mrf.mxu1 }
 0x40b   :  { %v545_v59 = vpop.f32.mrf.mxu2 }
 0x40c   :  { %v548_v61 = vadd.f32 %v545_v59, %v369_v55  ;;  %v728_v55 = vadd.f32 %v3786_v48, %v3841_v54 }
 0x40d   :  { %v809_v62 = vpop.f32.mrf.mxu1 }
 0x40e   :  { %2755 = vtanh.f32 %v548_v61  ;;  %v812_v0 = vadd.f32 %v809_v62, %v648_v63  ;;  %v4201_v63 = vld [vmem:[%s5592_s11] ss:$0 sm:$0xff] }
 0x410   :  { %2757 = vtanh.f32 %v812_v0 }
 0x414   :  { %v2756_v13 = vpop.eup %2755 }
 0x415   :  { %566 = vmatmul.f32.vlgmr.msrb.gmra.mxu3 %v2756_v13  ;;  %746 = vmatmul.f32.vlgmr.msrb.gmra.mxu2 %v2756_v13 }
 0x416   :  { %750 = vmatpush.msrb.mxu3 %v3447_v56  ;;  %902 = vmatpush.msrb.mxu2 %v3631_v20  ;;  %v3852_v60 = vpop.eup %2757  ;;  %v3901_v56 = vld [vmem:[%s5590_s9 + $0x78] sm:$0xff] }
 0x417   :  { %984 = vmatpush.msra.mxu0 %v3901_v56  ;;  %1004 = vmatpush.msra.mxu1 %v3901_v56 }
 0x418   :  { %751 = vmatpush.msrb.mxu3 %v3452_v57  ;;  %903 = vmatpush.msrb.mxu2 %v3637_v21  ;;  %v3906_v57 = vld [vmem:[%s5590_s9 + $0x70] sm:$0xff] }
 0x419   :  { %985 = vmatpush.msra.mxu0 %v3906_v57  ;;  %1005 = vmatpush.msra.mxu1 %v3906_v57 }
 0x41a   :  { %752 = vmatpush.msrb.mxu3 %v3459_v58  ;;  %904 = vmatpush.msrb.mxu2 %v3643_v22  ;;  %v3913_v58 = vld [vmem:[%s5590_s9 + $0x68] sm:$0xff] }
 0x41b   :  { %986 = vmatpush.msra.mxu0 %v3913_v58  ;;  %1006 = vmatpush.msra.mxu1 %v3913_v58 }
 0x41c   :  { %753 = vmatpush.msrb.mxu3 %v3492_v1  ;;  %905 = vmatpush.msrb.mxu2 %v3649_v23  ;;  %v667_v1 = vpop.f32.mrf.mxu2 }
 0x41d   :  { %686 = vmatmul.f32.vlgmr.msra.gmra.mxu3 %v3609_v19  ;;  %830 = vmatmul.f32.vlgmr.msra.gmra.mxu2 %v3852_v60  ;;  %v4021_v19 = vld [vmem:[%s5590_s9 + $0x20] sm:$0xff] }
 0x41e   :  { %754 = vmatpush.msrb.mxu3 %v3497_v2  ;;  %906 = vmatpush.msrb.mxu2 %v3655_v24  ;;  %v394_v2 = vadd.f32 %v3360_v33, %v3606_v15  ;;  %v3989_v15 = vld [vmem:[%s5590_s9 + $0x40] sm:$0xff] }
 0x420   :  { %755 = vmatpush.msrb.mxu3 %v3504_v3  ;;  %907 = vmatpush.msrb.mxu2 %v3661_v25 }
 0x422   :  { %756 = vmatpush.msrb.mxu3 %v3513_v4  ;;  %908 = vmatpush.msrb.mxu2 %v3667_v26 }
 0x424   :  { %757 = vmatpush.msrb.mxu3 %v3528_v5  ;;  %909 = vmatpush.msrb.mxu2 %v3674_v27 }
 0x426   :  { %758 = vmatpush.msrb.mxu3 %v3535_v6  ;;  %910 = vmatpush.msrb.mxu2 %v3680_v28  ;;  %v668_v6 = vadd.f32 %v3786_v48, %v667_v1 }
 0x428   :  { %759 = vmatpush.msrb.mxu3 %v3543_v7  ;;  %911 = vmatpush.msrb.mxu2 %v3686_v29 }
 0x42a   :  { %760 = vmatpush.msrb.mxu3 %v3549_v8  ;;  %912 = vmatpush.msrb.mxu2 %v3691_v30 }
 0x42c   :  { %761 = vmatpush.msrb.mxu3 %v3558_v9  ;;  %913 = vmatpush.msrb.mxu2 %v3698_v31 }
 0x42e   :  { %762 = vmatpush.msrb.mxu3 %v3571_v10  ;;  %914 = vmatpush.msrb.mxu2 %v3704_v34  ;;  %v3955_v10 = vld [vmem:[%s5590_s9 + $0x60] sm:$0xff] }
 0x42f   :  { %987 = vmatpush.msra.mxu0 %v3955_v10  ;;  %1007 = vmatpush.msra.mxu1 %v3955_v10 }
 0x430   :  { %763 = vmatpush.msrb.mxu3 %v3576_v11  ;;  %915 = vmatpush.msrb.mxu2 %v3709_v35  ;;  %v3961_v11 = vld [vmem:[%s5590_s9 + $0x58] sm:$0xff] }
 0x431   :  { %988 = vmatpush.msra.mxu0 %v3961_v11  ;;  %1008 = vmatpush.msra.mxu1 %v3961_v11 }
 0x432   :  { %764 = vmatpush.msrb.mxu3 %v3585_v12  ;;  %916 = vmatpush.msrb.mxu2 %v3715_v36  ;;  %v3967_v12 = vld [vmem:[%s5590_s9 + $0x50] sm:$0xff] }
 0x433   :  { %989 = vmatpush.msra.mxu0 %v3967_v12  ;;  %1009 = vmatpush.msra.mxu1 %v3967_v12 }
 0x434   :  { %765 = vmatpush.msrb.mxu3 %v3594_v14  ;;  %917 = vmatpush.msrb.mxu2 %v3721_v37  ;;  %v3976_v14 = vld [vmem:[%s5590_s9 + $0x48] sm:$0xff] }
 0x435   :  { %990 = vmatpush.msra.mxu0 %v3976_v14  ;;  %1010 = vmatpush.msra.mxu1 %v3976_v14 }
 0x436   :  { %836 = vmatpush.msra.mxu3 %v3631_v20  ;;  %1024 = vmatpush.msra.mxu2 %v3901_v56 }
 0x437   :  { %991 = vmatpush.msra.mxu0 %v3989_v15  ;;  %1011 = vmatpush.msra.mxu1 %v3989_v15 }
 0x438   :  { %837 = vmatpush.msra.mxu3 %v3637_v21  ;;  %1025 = vmatpush.msra.mxu2 %v3906_v57 }
 0x439   :  { %992 = vmatpush.msra.mxu0 %v3998_v16  ;;  %1012 = vmatpush.msra.mxu1 %v3998_v16 }
 0x43a   :  { %838 = vmatpush.msra.mxu3 %v3643_v22  ;;  %1026 = vmatpush.msra.mxu2 %v3913_v58 }
 0x43b   :  { %993 = vmatpush.msra.mxu0 %v4006_v17  ;;  %1013 = vmatpush.msra.mxu1 %v4006_v17 }
 0x43c   :  { %839 = vmatpush.msra.mxu3 %v3649_v23  ;;  %1027 = vmatpush.msra.mxu2 %v3955_v10 }
 0x43d   :  { %994 = vmatpush.msra.mxu0 %v4012_v18  ;;  %1014 = vmatpush.msra.mxu1 %v4012_v18 }
 0x43e   :  { %840 = vmatpush.msra.mxu3 %v3655_v24  ;;  %1028 = vmatpush.msra.mxu2 %v3961_v11 }
 0x43f   :  { %995 = vmatpush.msra.mxu0 %v4021_v19  ;;  %1015 = vmatpush.msra.mxu1 %v4021_v19 }
 0x440   :  { %841 = vmatpush.msra.mxu3 %v3661_v25  ;;  %1029 = vmatpush.msra.mxu2 %v3967_v12 }
 0x442   :  { %842 = vmatpush.msra.mxu3 %v3667_v26  ;;  %1030 = vmatpush.msra.mxu2 %v3976_v14 }
 0x444   :  { %843 = vmatpush.msra.mxu3 %v3674_v27  ;;  %1031 = vmatpush.msra.mxu2 %v3989_v15 }
 0x446   :  { %844 = vmatpush.msra.mxu3 %v3680_v28  ;;  %1032 = vmatpush.msra.mxu2 %v3998_v16 }
 0x448   :  { %845 = vmatpush.msra.mxu3 %v3686_v29  ;;  %1033 = vmatpush.msra.mxu2 %v4006_v17 }
 0x44a   :  { %846 = vmatpush.msra.mxu3 %v3691_v30  ;;  %1034 = vmatpush.msra.mxu2 %v4012_v18 }
 0x44c   :  { %847 = vmatpush.msra.mxu3 %v3698_v31  ;;  %1035 = vmatpush.msra.mxu2 %v4021_v19 }
 0x44e   :  { %848 = vmatpush.msra.mxu3 %v3704_v34 }
 0x450   :  { %849 = vmatpush.msra.mxu3 %v3709_v35 }
 0x452   :  { %850 = vmatpush.msra.mxu3 %v3715_v36 }
 0x454   :  { %851 = vmatpush.msra.mxu3 %v3721_v37 }
 0x498   :  { %v567_v3 = vpop.f32.mrf.mxu3  ;;  %v3924_v4 = vpop.f32.mrf.mxu2 }
 0x499   :  { %v570_v5 = vadd.f32 %v567_v3, %v394_v2 }
 0x49b   :  { %2759 = vtanh.f32 %v570_v5  ;;  %v748_v5 = vadd.f32 %v3786_v48, %v3924_v4 }
 0x4a0   :  { %v831_v7 = vpop.f32.mrf.mxu2 }
 0x4a1   :  { %v3927_v8 = vpop.eup %2759  ;;  %v834_v9 = vadd.f32 %v831_v7, %v668_v6 }
 0x4a2   :  { %766 = vmatmul.f32.vlgmr.msrb.gmra.mxu3 %v3927_v8 }
 0x4a3   :  { %2761 = vtanh.f32 %v834_v9  ;;  %924 = vmatpush.msrb.mxu3 %v3631_v20  ;;  %v4034_v20 = vld [vmem:[%s5590_s9 + $0x18] sm:$0xff] }
 0x4a4   :  { %996 = vmatpush.msra.mxu0 %v4034_v20  ;;  %1016 = vmatpush.msra.mxu1 %v4034_v20 }
 0x4a5   :  { %925 = vmatpush.msrb.mxu3 %v3637_v21  ;;  %v4039_v21 = vld [vmem:[%s5590_s9 + $0x10] sm:$0xff]  ;;  %1036 = vmatpush.msra.mxu2 %v4034_v20 }
 0x4a6   :  { %997 = vmatpush.msra.mxu0 %v4039_v21  ;;  %1017 = vmatpush.msra.mxu1 %v4039_v21 }
 0x4a7   :  { %926 = vmatpush.msrb.mxu3 %v3643_v22  ;;  %v4048_v22 = vld [vmem:[%s5590_s9 + $0x8] sm:$0xff]  ;;  %1037 = vmatpush.msra.mxu2 %v4039_v21 }
 0x4a8   :  { %998 = vmatpush.msra.mxu0 %v4048_v22  ;;  %1018 = vmatpush.msra.mxu1 %v4048_v22 }
 0x4a9   :  { %v3933_v33 = vpop.eup %2761  ;;  %927 = vmatpush.msrb.mxu3 %v3649_v23  ;;  %v4057_v23 = vld [vmem:[%s5590_s9] sm:$0xff]  ;;  %1038 = vmatpush.msra.mxu2 %v4048_v22 }
 0x4aa   :  { %852 = vmatmul.f32.vlgmr.msra.gmra.mxu3 %v3933_v33  ;;  %999 = vmatpush.msra.mxu0 %v4057_v23 }
 0x4ab   :  { %928 = vmatpush.msrb.mxu3 %v3655_v24  ;;  %v687_v24 = vpop.f32.mrf.mxu3  ;;  %1019 = vmatpush.msra.mxu1 %v4057_v23 }
 0x4ac   :  { %1039 = vmatpush.msra.mxu2 %v4057_v23 }
 0x4ad   :  { %929 = vmatpush.msrb.mxu3 %v3661_v25 }
 0x4af   :  { %930 = vmatpush.msrb.mxu3 %v3667_v26  ;;  %v688_v26 = vadd.f32 %v3786_v48, %v687_v24 }
 0x4b1   :  { %931 = vmatpush.msrb.mxu3 %v3674_v27 }
 0x4b3   :  { %932 = vmatpush.msrb.mxu3 %v3680_v28 }
 0x4b5   :  { %933 = vmatpush.msrb.mxu3 %v3686_v29 }
 0x4b7   :  { %934 = vmatpush.msrb.mxu3 %v3691_v30  ;;  %v4091_v30 = vld [vmem:[#allocation2 + $0x78] sm:$0xff] }
 0x4b9   :  { %935 = vmatpush.msrb.mxu3 %v3698_v31  ;;  %v4094_v31 = vld [vmem:[#allocation2 + $0x70] sm:$0xff] }
 0x4bb   :  { %936 = vmatpush.msrb.mxu3 %v3704_v34  ;;  %v4097_v34 = vld [vmem:[#allocation2 + $0x68] sm:$0xff] }
 0x4bd   :  { %937 = vmatpush.msrb.mxu3 %v3709_v35  ;;  %v4100_v35 = vld [vmem:[#allocation2 + $0x60] sm:$0xff] }
 0x4bf   :  { %938 = vmatpush.msrb.mxu3 %v3715_v36  ;;  %v4103_v36 = vld [vmem:[#allocation2 + $0x58] sm:$0xff] }
 0x4c1   :  { %939 = vmatpush.msrb.mxu3 %v3721_v37  ;;  %v4106_v37 = vld [vmem:[#allocation2 + $0x50] sm:$0xff] }
 0x4c3   :  { %1044 = vmatpush.msra.mxu3 %v3901_v56 }
 0x4c5   :  { %1045 = vmatpush.msra.mxu3 %v3906_v57 }
 0x4c7   :  { %1046 = vmatpush.msra.mxu3 %v3913_v58 }
 0x4c9   :  { %1047 = vmatpush.msra.mxu3 %v3955_v10 }
 0x4cb   :  { %1048 = vmatpush.msra.mxu3 %v3961_v11 }
 0x4cd   :  { %1049 = vmatpush.msra.mxu3 %v3967_v12 }
 0x4cf   :  { %1050 = vmatpush.msra.mxu3 %v3976_v14 }
 0x4d1   :  { %1051 = vmatpush.msra.mxu3 %v3989_v15 }
 0x4d3   :  { %1052 = vmatpush.msra.mxu3 %v3998_v16 }
 0x4d5   :  { %1053 = vmatpush.msra.mxu3 %v4006_v17 }
 0x4d7   :  { %1054 = vmatpush.msra.mxu3 %v4012_v18 }
 0x4d9   :  { %1055 = vmatpush.msra.mxu3 %v4021_v19 }
 0x4db   :  { %1056 = vmatpush.msra.mxu3 %v4034_v20 }
 0x4dd   :  { %1057 = vmatpush.msra.mxu3 %v4039_v21 }
 0x4df   :  { %1058 = vmatpush.msra.mxu3 %v4048_v22 }
 0x4e1   :  { %1059 = vmatpush.msra.mxu3 %v4057_v23 }
 0x525   :  { %v4069_v25 = vpop.f32.mrf.mxu3 }
 0x52d   :  { %v853_v27 = vpop.f32.mrf.mxu3 }
 0x52e   :  { %v856_v28 = vadd.f32 %v853_v27, %v688_v26 }
 0x530   :  { %2763 = vtanh.f32 %v856_v28 }
 0x536   :  { %v4072_v29 = vpop.eup %2763 }
 0x537   :  { %874 = vmatmul.f32.vlgmr.msrb.gmra.mxu0 %v4072_v29 }
 0x538   :  { %1064 = vmatpush.msrb.mxu0 %v3901_v56 }
 0x53a   :  { %1065 = vmatpush.msrb.mxu0 %v3906_v57 }
 0x53c   :  { %1066 = vmatpush.msrb.mxu0 %v3913_v58 }
 0x53e   :  { %1067 = vmatpush.msrb.mxu0 %v3955_v10 }
 0x53f   :  { %1000 = vmatmul.f32.vlgmr.msra.gmra.mxu0 %v3795_v45 }
 0x540   :  { %1068 = vmatpush.msrb.mxu0 %v3961_v11 }
 0x542   :  { %1069 = vmatpush.msrb.mxu0 %v3967_v12 }
 0x544   :  { %1070 = vmatpush.msrb.mxu0 %v3976_v14 }
 0x546   :  { %1071 = vmatpush.msrb.mxu0 %v3989_v15 }
 0x548   :  { %1072 = vmatpush.msrb.mxu0 %v3998_v16 }
 0x54a   :  { %1073 = vmatpush.msrb.mxu0 %v4006_v17 }
 0x54c   :  { %1074 = vmatpush.msrb.mxu0 %v4012_v18 }
 0x54e   :  { %1075 = vmatpush.msrb.mxu0 %v4021_v19 }
 0x550   :  { %1076 = vmatpush.msrb.mxu0 %v4034_v20 }
 0x552   :  { %1077 = vmatpush.msrb.mxu0 %v4039_v21 }
 0x554   :  { %1078 = vmatpush.msrb.mxu0 %v4048_v22 }
 0x556   :  { %1079 = vmatpush.msrb.mxu0 %v4057_v23 }
 0x558   :  { %1144 = vmatpush.msra.mxu0 %v4091_v30 }
 0x55a   :  { %1145 = vmatpush.msra.mxu0 %v4094_v31 }
 0x55c   :  { %1146 = vmatpush.msra.mxu0 %v4097_v34 }
 0x55e   :  { %1147 = vmatpush.msra.mxu0 %v4100_v35 }
 0x560   :  { %1148 = vmatpush.msra.mxu0 %v4103_v36 }
 0x562   :  { %1149 = vmatpush.msra.mxu0 %v4106_v37 }
 0x564   :  { %1150 = vmatpush.msra.mxu0 %v4109_v38 }
 0x566   :  { %1151 = vmatpush.msra.mxu0 %v4113_v39 }
 0x568   :  { %1152 = vmatpush.msra.mxu0 %v4116_v40 }
 0x56a   :  { %1153 = vmatpush.msra.mxu0 %v4119_v41 }
 0x56c   :  { %1154 = vmatpush.msra.mxu0 %v4121_v42 }
 0x56e   :  { %1155 = vmatpush.msra.mxu0 %v4125_v32 }
 0x570   :  { %1156 = vmatpush.msra.mxu0 %v4128_v43 }
 0x572   :  { %1157 = vmatpush.msra.mxu0 %v4130_v44 }
 0x574   :  { %1158 = vmatpush.msra.mxu0 %v4133_v47 }
 0x576   :  { %1159 = vmatpush.msra.mxu0 %v4136_v49 }
 0x5b4   :  { %v875_v51 = vpop.f32.mrf.mxu0 }
 0x5b5   :  { %v878_v52 = vadd.f32 %v875_v51, %v708_v50  ;;  %v4407_v50 = vld [vmem:[#allocation5 + $0x18] sm:$0xff]  ;;  %v4410_v51 = vld [vmem:[#allocation5 + $0x10] sm:$0xff] }
 0x5b7   :  { %2765 = vtanh.f32 %v878_v52  ;;  %v4413_v52 = vld [vmem:[#allocation5 + $0x8] sm:$0xff] }
 0x5bc   :  { %v1001_v46 = vpop.f32.mrf.mxu0 }
 0x5bd   :  { %v2766_v45 = vpop.eup %2765  ;;  %v1002_v0 = vadd.f32 %v4201_v63, %v1001_v46 }
 0x5be   :  { %896 = vmatmul.f32.vlgmr.msrb.gmra.mxu1 %v2766_v45  ;;  %1080 = vmatmul.f32.vlgmr.msrb.gmra.mxu0 %v2766_v45  ;;  %v4416_v45 = vld [vmem:[#allocation5] sm:$0xff] }
 0x5bf   :  { %1084 = vmatpush.msrb.mxu1 %v3901_v56  ;;  %1232 = vmatpush.msrb.mxu0 %v4091_v30 }
 0x5c1   :  { %1085 = vmatpush.msrb.mxu1 %v3906_v57  ;;  %1233 = vmatpush.msrb.mxu0 %v4094_v31 }
 0x5c3   :  { %1086 = vmatpush.msrb.mxu1 %v3913_v58  ;;  %1234 = vmatpush.msrb.mxu0 %v4097_v34 }
 0x5c5   :  { %1087 = vmatpush.msrb.mxu1 %v3955_v10  ;;  %1235 = vmatpush.msrb.mxu0 %v4100_v35 }
 0x5c6   :  { %1020 = vmatmul.f32.vlgmr.msra.gmra.mxu1 %v3852_v60  ;;  %1160 = vmatmul.f32.vlgmr.msra.gmra.mxu0 %v2716_v53 }
 0x5c7   :  { %1088 = vmatpush.msrb.mxu1 %v3961_v11  ;;  %1236 = vmatpush.msrb.mxu0 %v4103_v36 }
 0x5c9   :  { %1089 = vmatpush.msrb.mxu1 %v3967_v12  ;;  %1237 = vmatpush.msrb.mxu0 %v4106_v37 }
 0x5cb   :  { %1090 = vmatpush.msrb.mxu1 %v3976_v14  ;;  %1238 = vmatpush.msrb.mxu0 %v4109_v38 }
 0x5cd   :  { %1091 = vmatpush.msrb.mxu1 %v3989_v15  ;;  %1239 = vmatpush.msrb.mxu0 %v4113_v39 }
 0x5cf   :  { %1092 = vmatpush.msrb.mxu1 %v3998_v16  ;;  %1240 = vmatpush.msrb.mxu0 %v4116_v40 }
 0x5d1   :  { %1093 = vmatpush.msrb.mxu1 %v4006_v17  ;;  %1241 = vmatpush.msrb.mxu0 %v4119_v41 }
 0x5d3   :  { %1094 = vmatpush.msrb.mxu1 %v4012_v18  ;;  %1242 = vmatpush.msrb.mxu0 %v4121_v42 }
 0x5d5   :  { %1095 = vmatpush.msrb.mxu1 %v4021_v19  ;;  %1243 = vmatpush.msrb.mxu0 %v4125_v32 }
 0x5d7   :  { %1096 = vmatpush.msrb.mxu1 %v4034_v20  ;;  %1244 = vmatpush.msrb.mxu0 %v4128_v43 }
 0x5d9   :  { %1097 = vmatpush.msrb.mxu1 %v4039_v21  ;;  %1245 = vmatpush.msrb.mxu0 %v4130_v44 }
 0x5db   :  { %1098 = vmatpush.msrb.mxu1 %v4048_v22  ;;  %1246 = vmatpush.msrb.mxu0 %v4133_v47 }
 0x5dd   :  { %1099 = vmatpush.msrb.mxu1 %v4057_v23  ;;  %1247 = vmatpush.msrb.mxu0 %v4136_v49 }
 0x5df   :  { %1166 = vmatpush.msra.mxu1 %v4091_v30 }
 0x5e1   :  { %1167 = vmatpush.msra.mxu1 %v4094_v31 }
 0x5e3   :  { %1168 = vmatpush.msra.mxu1 %v4097_v34 }
 0x5e5   :  { %1169 = vmatpush.msra.mxu1 %v4100_v35 }
 0x5e7   :  { %1170 = vmatpush.msra.mxu1 %v4103_v36 }
 0x5e9   :  { %1171 = vmatpush.msra.mxu1 %v4106_v37 }
 0x5eb   :  { %1172 = vmatpush.msra.mxu1 %v4109_v38 }
 0x5ed   :  { %1173 = vmatpush.msra.mxu1 %v4113_v39 }
 0x5ef   :  { %1174 = vmatpush.msra.mxu1 %v4116_v40 }
 0x5f1   :  { %1175 = vmatpush.msra.mxu1 %v4119_v41 }
 0x5f3   :  { %1176 = vmatpush.msra.mxu1 %v4121_v42 }
 0x5f5   :  { %1177 = vmatpush.msra.mxu1 %v4125_v32 }
 0x5f7   :  { %1178 = vmatpush.msra.mxu1 %v4128_v43 }
 0x5f9   :  { %1179 = vmatpush.msra.mxu1 %v4130_v44 }
 0x5fb   :  { %1180 = vmatpush.msra.mxu1 %v4133_v47 }
 0x5fd   :  { %1181 = vmatpush.msra.mxu1 %v4136_v49 }
 0x63b   :  { %v897_v59 = vpop.f32.mrf.mxu1  ;;  %v4196_v61 = vpop.f32.mrf.mxu0 }
 0x63c   :  { %v900_v62 = vadd.f32 %v897_v59, %v728_v55 }
 0x63e   :  { %2767 = vtanh.f32 %v900_v62 }
 0x643   :  { %v1161_v13 = vpop.f32.mrf.mxu0  ;;  %v1021_v2 = vpop.f32.mrf.mxu1 }
 0x644   :  { %v2768_v60 = vpop.eup %2767  ;;  %v1164_v1 = vadd.f32 %v1161_v13, %v1002_v0 }
 0x645   :  { %918 = vmatmul.f32.vlgmr.msrb.gmra.mxu2 %v2768_v60  ;;  %1100 = vmatmul.f32.vlgmr.msrb.gmra.mxu1 %v2768_v60 }
 0x646   :  { %2769 = vtanh.f32 %v1164_v1  ;;  %1104 = vmatpush.msrb.mxu2 %v3901_v56  ;;  %1254 = vmatpush.msrb.mxu1 %v4091_v30 }
 0x648   :  { %1105 = vmatpush.msrb.mxu2 %v3906_v57  ;;  %1255 = vmatpush.msrb.mxu1 %v4094_v31 }
 0x64a   :  { %1106 = vmatpush.msrb.mxu2 %v3913_v58  ;;  %1256 = vmatpush.msrb.mxu1 %v4097_v34 }
 0x64c   :  { %v2770_v54 = vpop.eup %2769  ;;  %1107 = vmatpush.msrb.mxu2 %v3955_v10  ;;  %1257 = vmatpush.msrb.mxu1 %v4100_v35 }
 0x64d   :  { %1040 = vmatmul.f32.vlgmr.msra.gmra.mxu2 %v3933_v33  ;;  %1182 = vmatmul.f32.vlgmr.msra.gmra.mxu1 %v2770_v54  ;;  %v1022_v33 = vadd.f32 %v4201_v63, %v1021_v2  ;;  %v4462_v54 = vld [vmem:[%s5595_s14] ss:$0 sm:$0xff] }
 0x64e   :  { %1108 = vmatpush.msrb.mxu2 %v3961_v11  ;;  %1258 = vmatpush.msrb.mxu1 %v4103_v36 }
 0x650   :  { %1109 = vmatpush.msrb.mxu2 %v3967_v12  ;;  %1259 = vmatpush.msrb.mxu1 %v4106_v37 }
 0x652   :  { %1110 = vmatpush.msrb.mxu2 %v3976_v14  ;;  %1260 = vmatpush.msrb.mxu1 %v4109_v38 }
 0x654   :  { %1111 = vmatpush.msrb.mxu2 %v3989_v15  ;;  %1261 = vmatpush.msrb.mxu1 %v4113_v39 }
 0x656   :  { %1112 = vmatpush.msrb.mxu2 %v3998_v16  ;;  %1262 = vmatpush.msrb.mxu1 %v4116_v40 }
 0x658   :  { %1113 = vmatpush.msrb.mxu2 %v4006_v17  ;;  %1263 = vmatpush.msrb.mxu1 %v4119_v41 }
 0x65a   :  { %1114 = vmatpush.msrb.mxu2 %v4012_v18  ;;  %1264 = vmatpush.msrb.mxu1 %v4121_v42 }
 0x65c   :  { %1115 = vmatpush.msrb.mxu2 %v4021_v19  ;;  %1265 = vmatpush.msrb.mxu1 %v4125_v32 }
 0x65e   :  { %1116 = vmatpush.msrb.mxu2 %v4034_v20  ;;  %1266 = vmatpush.msrb.mxu1 %v4128_v43 }
 0x660   :  { %1117 = vmatpush.msrb.mxu2 %v4039_v21  ;;  %1267 = vmatpush.msrb.mxu1 %v4130_v44 }
 0x662   :  { %1118 = vmatpush.msrb.mxu2 %v4048_v22  ;;  %1268 = vmatpush.msrb.mxu1 %v4133_v47 }
 0x664   :  { %1119 = vmatpush.msrb.mxu2 %v4057_v23  ;;  %1269 = vmatpush.msrb.mxu1 %v4136_v49 }
 0x666   :  { %1188 = vmatpush.msra.mxu2 %v4091_v30 }
 0x668   :  { %1189 = vmatpush.msra.mxu2 %v4094_v31 }
 0x66a   :  { %1190 = vmatpush.msra.mxu2 %v4097_v34 }
 0x66c   :  { %1191 = vmatpush.msra.mxu2 %v4100_v35 }
 0x66e   :  { %1192 = vmatpush.msra.mxu2 %v4103_v36 }
 0x670   :  { %1193 = vmatpush.msra.mxu2 %v4106_v37 }
 0x672   :  { %1194 = vmatpush.msra.mxu2 %v4109_v38 }
 0x674   :  { %1195 = vmatpush.msra.mxu2 %v4113_v39 }
 0x676   :  { %1196 = vmatpush.msra.mxu2 %v4116_v40 }
 0x678   :  { %1197 = vmatpush.msra.mxu2 %v4119_v41 }
 0x67a   :  { %1198 = vmatpush.msra.mxu2 %v4121_v42 }
 0x67c   :  { %1199 = vmatpush.msra.mxu2 %v4125_v32 }
 0x67e   :  { %1200 = vmatpush.msra.mxu2 %v4128_v43 }
 0x680   :  { %1201 = vmatpush.msra.mxu2 %v4130_v44 }
 0x682   :  { %1202 = vmatpush.msra.mxu2 %v4133_v47 }
 0x684   :  { %1203 = vmatpush.msra.mxu2 %v4136_v49 }
 0x6c2   :  { %v4253_v3 = vpop.f32.mrf.mxu1 }
 0x6c8   :  { %v919_v6 = vpop.f32.mrf.mxu2 }
 0x6c9   :  { %v922_v7 = vadd.f32 %v919_v6, %v748_v5 }
 0x6ca   :  { %v1183_v9 = vpop.f32.mrf.mxu1 }
 0x6cb   :  { %2771 = vtanh.f32 %v922_v7  ;;  %v1186_v24 = vadd.f32 %v1183_v9, %v1022_v33  ;;  %v1102_v9 = vadd.f32 %v4201_v63, %v4253_v3 }
 0x6cd   :  { %2773 = vtanh.f32 %v1186_v24 }
 0x6d1   :  { %v2772_v26 = vpop.eup %2771 }
 0x6d2   :  { %940 = vmatmul.f32.vlgmr.msrb.gmra.mxu3 %v2772_v26  ;;  %1120 = vmatmul.f32.vlgmr.msrb.gmra.mxu2 %v2772_v26 }
 0x6d3   :  { %1124 = vmatpush.msrb.mxu3 %v3901_v56  ;;  %1276 = vmatpush.msrb.mxu2 %v4091_v30  ;;  %v2774_v4 = vpop.eup %2773  ;;  %v1041_v56 = vpop.f32.mrf.mxu2 }
 0x6d5   :  { %1125 = vmatpush.msrb.mxu3 %v3906_v57  ;;  %1277 = vmatpush.msrb.mxu2 %v4094_v31  ;;  %v768_v57 = vadd.f32 %v3786_v48, %v4069_v25  ;;  %v4355_v25 = vld [vmem:[%s5627_s8 + $0x8] sm:$0xff] }
 0x6d6   :  { %v1346_v28 = vrot.slane %v4355_v25, 7  ;;  %v1470_v0 = vrot.slane %v4355_v25, 4 }
 0x6d7   :  { %1126 = vmatpush.msrb.mxu3 %v3913_v58  ;;  %1278 = vmatpush.msrb.mxu2 %v4097_v34 }
 0x6d9   :  { %1127 = vmatpush.msrb.mxu3 %v3955_v10  ;;  %1279 = vmatpush.msrb.mxu2 %v4100_v35 }
 0x6da   :  { %1060 = vmatmul.f32.vlgmr.msra.gmra.mxu3 %v4072_v29  ;;  %1204 = vmatmul.f32.vlgmr.msra.gmra.mxu2 %v2774_v4  ;;  %v4362_v29 = vld [vmem:[%s5627_s8] sm:$0xff] }
 0x6db   :  { %1128 = vmatpush.msrb.mxu3 %v3961_v11  ;;  %1280 = vmatpush.msrb.mxu2 %v4103_v36  ;;  %v1370_v59 = vrot.slane %v4362_v29, 1  ;;  %v1394_v4 = vrot.slane %v4362_v29, 2  ;;  %v1494_v3 = vrot.slane %v4362_v29, 6 }
 0x6dd   :  { %1129 = vmatpush.msrb.mxu3 %v3967_v12  ;;  %1281 = vmatpush.msrb.mxu2 %v4106_v37  ;;  %v1042_v12 = vadd.f32 %v4201_v63, %v1041_v56  ;;  %v1371_v62 = vsel %vm197_vm0, %v4355_v25, %v1370_v59  ;;  %v1395_v56 = vrot.slane %v4355_v25, 1  ;;  %v4680_v59 = vld [vmem:[#allocation7] sm:$0xff] }
 0x6df   :  { %1130 = vmatpush.msrb.mxu3 %v3976_v14  ;;  %1282 = vmatpush.msrb.mxu2 %v4109_v38 }
 0x6e1   :  { %1131 = vmatpush.msrb.mxu3 %v3989_v15  ;;  %1283 = vmatpush.msrb.mxu2 %v4113_v39 }
 0x6e3   :  { %1132 = vmatpush.msrb.mxu3 %v3998_v16  ;;  %1284 = vmatpush.msrb.mxu2 %v4116_v40 }
 0x6e5   :  { %1133 = vmatpush.msrb.mxu3 %v4006_v17  ;;  %1285 = vmatpush.msrb.mxu2 %v4119_v41  ;;  %v4334_v17 = vld [vmem:[%s5593_s12 + $0x8] sm:$0xff] }
 0x6e6   :  { %1364 = vmatpush.msra.mxu0 %v4334_v17  ;;  %1388 = vmatpush.msra.mxu1 %v4334_v17 }
 0x6e7   :  { %1134 = vmatpush.msrb.mxu3 %v4012_v18  ;;  %1286 = vmatpush.msrb.mxu2 %v4121_v42  ;;  %v4339_v18 = vld [vmem:[%s5593_s12] sm:$0xff] }
 0x6e8   :  { %1365 = vmatpush.msra.mxu0 %v4339_v18  ;;  %1389 = vmatpush.msra.mxu1 %v4339_v18 }
 0x6e9   :  { %1135 = vmatpush.msrb.mxu3 %v4021_v19  ;;  %1287 = vmatpush.msrb.mxu2 %v4125_v32 }
 0x6eb   :  { %1136 = vmatpush.msrb.mxu3 %v4034_v20  ;;  %1288 = vmatpush.msrb.mxu2 %v4128_v43 }
 0x6ed   :  { %1137 = vmatpush.msrb.mxu3 %v4039_v21  ;;  %1289 = vmatpush.msrb.mxu2 %v4130_v44 }
 0x6ef   :  { %1138 = vmatpush.msrb.mxu3 %v4048_v22  ;;  %1290 = vmatpush.msrb.mxu2 %v4133_v47 }
 0x6f1   :  { %1139 = vmatpush.msrb.mxu3 %v4057_v23  ;;  %1291 = vmatpush.msrb.mxu2 %v4136_v49 }
 0x6f3   :  { %1210 = vmatpush.msra.mxu3 %v4091_v30  ;;  %1413 = vmatpush.msra.mxu2 %v4334_v17 }
 0x6f5   :  { %1211 = vmatpush.msra.mxu3 %v4094_v31  ;;  %1414 = vmatpush.msra.mxu2 %v4339_v18 }
 0x6f7   :  { %1212 = vmatpush.msra.mxu3 %v4097_v34 }
 0x6f9   :  { %1213 = vmatpush.msra.mxu3 %v4100_v35 }
 0x6fb   :  { %1214 = vmatpush.msra.mxu3 %v4103_v36 }
 0x6fd   :  { %1215 = vmatpush.msra.mxu3 %v4106_v37 }
 0x6ff   :  { %1216 = vmatpush.msra.mxu3 %v4109_v38 }
 0x701   :  { %1217 = vmatpush.msra.mxu3 %v4113_v39 }
 0x703   :  { %1218 = vmatpush.msra.mxu3 %v4116_v40 }
 0x705   :  { %1219 = vmatpush.msra.mxu3 %v4119_v41 }
 0x707   :  { %1220 = vmatpush.msra.mxu3 %v4121_v42 }
 0x709   :  { %1221 = vmatpush.msra.mxu3 %v4125_v32 }
 0x70b   :  { %1222 = vmatpush.msra.mxu3 %v4128_v43 }
 0x70d   :  { %1223 = vmatpush.msra.mxu3 %v4130_v44 }
 0x70f   :  { %1224 = vmatpush.msra.mxu3 %v4133_v47 }
 0x711   :  { %1225 = vmatpush.msra.mxu3 %v4136_v49 }
 0x755   :  { %v941_v58 = vpop.f32.mrf.mxu3  ;;  %v4309_v10 = vpop.f32.mrf.mxu2 }
 0x756   :  { %v944_v11 = vadd.f32 %v941_v58, %v768_v57  ;;  %v1396_v57 = vsel %vm197_vm0, %v1395_v56, %v1394_v4  ;;  %v1495_v58 = vrot.slane %v4355_v25, 5  ;;  %v4739_v4 = vld [vmem:[#allocation8 + $0x38] sm:$0xff]  ;;  %v4742_v56 = vld [vmem:[#allocation8 + $0x30] sm:$0xff] }
 0x758   :  { %2775 = vtanh.f32 %v944_v11 }
 0x75d   :  { %v1205_v14 = vpop.f32.mrf.mxu2  ;;  %v1061_v19 = vpop.f32.mrf.mxu3 }
 0x75e   :  { %v4312_v15 = vpop.eup %2775  ;;  %v1208_v16 = vadd.f32 %v1205_v14, %v1042_v12  ;;  %v1062_v21 = vadd.f32 %v4201_v63, %v1061_v19  ;;  %v1496_v12 = vsel %vm197_vm0, %v1495_v58, %v1494_v3  ;;  %v4748_v3 = vld [vmem:[#allocation8 + $0x20] sm:$0xff]  ;;  %v4751_v58 = vld [vmem:[#allocation8 + $0x18] sm:$0xff] }
 0x75f   :  { %1140 = vmatmul.f32.vlgmr.msrb.gmra.mxu3 %v4312_v15 }
 0x760   :  { %2777 = vtanh.f32 %v1208_v16  ;;  %1298 = vmatpush.msrb.mxu3 %v4091_v30  ;;  %v1347_v30 = vsel %vm197_vm0, %v1346_v28, %v4362_v29 }
 0x762   :  { %1299 = vmatpush.msrb.mxu3 %v4094_v31  ;;  %v4367_v31 = vld [vmem:[#allocation5 + $0x78] sm:$0xff] }
 0x764   :  { %1300 = vmatpush.msrb.mxu3 %v4097_v34  ;;  %v4370_v34 = vld [vmem:[#allocation5 + $0x70] sm:$0xff] }
 0x766   :  { %v2778_v48 = vpop.eup %2777  ;;  %1301 = vmatpush.msrb.mxu3 %v4100_v35  ;;  %v1444_v35 = vrot.slane %v4362_v29, 4 }
 0x767   :  { %1226 = vmatmul.f32.vlgmr.msra.gmra.mxu3 %v2778_v48 }
 0x768   :  { %1302 = vmatpush.msrb.mxu3 %v4103_v36  ;;  %v1445_v36 = vrot.slane %v4355_v25, 3 }
 0x76a   :  { %1303 = vmatpush.msrb.mxu3 %v4106_v37  ;;  %v4375_v37 = vld [vmem:[#allocation5 + $0x68] sm:$0xff] }
 0x76c   :  { %1304 = vmatpush.msrb.mxu3 %v4109_v38  ;;  %v4378_v38 = vld [vmem:[#allocation5 + $0x60] sm:$0xff] }
 0x76e   :  { %1305 = vmatpush.msrb.mxu3 %v4113_v39  ;;  %v1446_v39 = vsel %vm197_vm0, %v1445_v36, %v1444_v35  ;;  %v1420_v35 = vrot.slane %v4355_v25, 2 }
 0x770   :  { %1306 = vmatpush.msrb.mxu3 %v4116_v40  ;;  %v4382_v40 = vld [vmem:[#allocation5 + $0x58] sm:$0xff] }
 0x772   :  { %1307 = vmatpush.msrb.mxu3 %v4119_v41  ;;  %v4385_v41 = vld [vmem:[#allocation5 + $0x50] sm:$0xff] }
 0x774   :  { %1308 = vmatpush.msrb.mxu3 %v4121_v42  ;;  %v4389_v42 = vld [vmem:[#allocation5 + $0x48] sm:$0xff] }
 0x776   :  { %1309 = vmatpush.msrb.mxu3 %v4125_v32  ;;  %v4392_v32 = vld [vmem:[#allocation5 + $0x40] sm:$0xff] }
 0x778   :  { %1310 = vmatpush.msrb.mxu3 %v4128_v43  ;;  %v4395_v43 = vld [vmem:[#allocation5 + $0x38] sm:$0xff] }
 0x77a   :  { %1311 = vmatpush.msrb.mxu3 %v4130_v44  ;;  %v4398_v44 = vld [vmem:[#allocation5 + $0x30] sm:$0xff] }
 0x77c   :  { %1312 = vmatpush.msrb.mxu3 %v4133_v47  ;;  %v4401_v47 = vld [vmem:[#allocation5 + $0x28] sm:$0xff] }
 0x77e   :  { %1313 = vmatpush.msrb.mxu3 %v4136_v49  ;;  %v4404_v49 = vld [vmem:[#allocation5 + $0x20] sm:$0xff] }
 0x780   :  { %1438 = vmatpush.msra.mxu3 %v4334_v17 }
 0x782   :  { %1439 = vmatpush.msra.mxu3 %v4339_v18 }
 0x7e2   :  { %v4349_v20 = vpop.f32.mrf.mxu3 }
 0x7ea   :  { %v1227_v22 = vpop.f32.mrf.mxu3 }
 0x7eb   :  { %v1230_v23 = vadd.f32 %v1227_v22, %v1062_v21  ;;  %v1122_v22 = vadd.f32 %v4201_v63, %v4309_v10  ;;  %v1519_v10 = vrot.slane %v4362_v29, 7 }
 0x7ed   :  { %2779 = vtanh.f32 %v1230_v23 }
 0x7f3   :  { %v2780_v27 = vpop.eup %2779 }
 0x7f4   :  { %1248 = vmatmul.f32.vlgmr.msrb.gmra.mxu0 %v2780_v27 }
 0x7f5   :  { %1463 = vmatpush.msrb.mxu0 %v4334_v17 }
 0x7f7   :  { %1464 = vmatpush.msrb.mxu0 %v4339_v18 }
 0x7fc   :  { %2717 = vmatmul.msk.f32.vlgmr.msra.gmra.mxu0 %vm199_vm1, %v1347_v30  ;;  %v1419_v30 = vrot.slane %v4362_v29, 3 }
 0x7fd   :  { %1544 = vmatpush.msra.mxu0 %v4367_v31 }
 0x7fe   :  { %v1421_v36 = vsel %vm197_vm0, %v1420_v35, %v1419_v30  ;;  %v4822_v30 = vld [vmem:[%s5598_s17] ss:$0 sm:$0xff] }
 0x7ff   :  { %1545 = vmatpush.msra.mxu0 %v4370_v34 }
 0x801   :  { %1546 = vmatpush.msra.mxu0 %v4375_v37 }
 0x803   :  { %1547 = vmatpush.msra.mxu0 %v4378_v38 }
 0x804   :  { %2721 = vmatmul.msk.f32.vlgmr.msrb.gmra.mxu0 %vm199_vm1, %v1446_v39  ;;  %v1520_v39 = vrot.slane %v4355_v25, 6 }
 0x805   :  { %1548 = vmatpush.msra.mxu0 %v4382_v40 }
 0x807   :  { %1549 = vmatpush.msra.mxu0 %v4385_v41 }
 0x809   :  { %1550 = vmatpush.msra.mxu0 %v4389_v42 }
 0x80b   :  { %1551 = vmatpush.msra.mxu0 %v4392_v32 }
 0x80d   :  { %1552 = vmatpush.msra.mxu0 %v4395_v43 }
 0x80f   :  { %1553 = vmatpush.msra.mxu0 %v4398_v44 }
 0x811   :  { %1554 = vmatpush.msra.mxu0 %v4401_v47 }
 0x813   :  { %1555 = vmatpush.msra.mxu0 %v4404_v49 }
 0x815   :  { %1556 = vmatpush.msra.mxu0 %v4407_v50 }
 0x817   :  { %1557 = vmatpush.msra.mxu0 %v4410_v51 }
 0x819   :  { %1558 = vmatpush.msra.mxu0 %v4413_v52 }
 0x81b   :  { %1559 = vmatpush.msra.mxu0 %v4416_v45 }
 0x81c   :  { %1560 = vmatmul.f32.vlgmr.msra.gmra.mxu0 %v3927_v8  ;;  %v1082_v8 = vadd.f32 %v4201_v63, %v4196_v61  ;;  %v1469_v61 = vrot.slane %v4362_v29, 5 }
 0x81d   :  { %1632 = vmatpush.msrb.mxu0 %v4367_v31 }
 0x81e   :  { %v1471_v60 = vsel %vm197_vm0, %v1470_v0, %v1469_v61 }
 0x81f   :  { %1633 = vmatpush.msrb.mxu0 %v4370_v34 }
 0x821   :  { %1634 = vmatpush.msrb.mxu0 %v4375_v37 }
 0x823   :  { %1635 = vmatpush.msrb.mxu0 %v4378_v38 }
 0x825   :  { %1636 = vmatpush.msrb.mxu0 %v4382_v40 }
 0x827   :  { %1637 = vmatpush.msrb.mxu0 %v4385_v41 }
 0x829   :  { %1638 = vmatpush.msrb.mxu0 %v4389_v42 }
 0x82b   :  { %1639 = vmatpush.msrb.mxu0 %v4392_v32 }
 0x82d   :  { %1640 = vmatpush.msrb.mxu0 %v4395_v43 }
 0x82f   :  { %1641 = vmatpush.msrb.mxu0 %v4398_v44 }
 0x831   :  { %1642 = vmatpush.msrb.mxu0 %v4401_v47 }
 0x833   :  { %1643 = vmatpush.msrb.mxu0 %v4404_v49 }
 0x835   :  { %1644 = vmatpush.msrb.mxu0 %v4407_v50 }
 0x837   :  { %1645 = vmatpush.msrb.mxu0 %v4410_v51 }
 0x839   :  { %1646 = vmatpush.msrb.mxu0 %v4413_v52 }
 0x83b   :  { %1647 = vmatpush.msrb.mxu0 %v4416_v45 }
 0x871   :  { %v1249_v53 = vpop.f32.mrf.mxu0 }
 0x872   :  { %v1252_v46 = vadd.f32 %v1249_v53, %v1082_v8 }
 0x874   :  { %2781 = vtanh.f32 %v1252_v46 }
 0x879   :  { %v1367_v13 = vpop.f32.mrf.mxu0 }
 0x87a   :  { %v2782_v55 = vpop.eup %2781  ;;  %v1368_v2 = vadd.f32 %v4462_v54, %v1367_v13 }
 0x87b   :  { %1270 = vmatmul.f32.vlgmr.msrb.gmra.mxu1 %v2782_v55 }
 0x87c   :  { %1488 = vmatpush.msrb.mxu1 %v4334_v17 }
 0x87e   :  { %1489 = vmatpush.msrb.mxu1 %v4339_v18 }
 0x881   :  { %v4455_v1 = vpop.f32.mrf.mxu0 }
 0x883   :  { %2718 = vmatmul.msk.f32.vlgmr.msra.gmra.mxu1 %vm199_vm1, %v1371_v62 }
 0x884   :  { %1566 = vmatpush.msra.mxu1 %v4367_v31 }
 0x886   :  { %1567 = vmatpush.msra.mxu1 %v4370_v34 }
 0x888   :  { %1568 = vmatpush.msra.mxu1 %v4375_v37 }
 0x88a   :  { %1569 = vmatpush.msra.mxu1 %v4378_v38 }
 0x88b   :  { %2722 = vmatmul.msk.f32.vlgmr.msrb.gmra.mxu1 %vm199_vm1, %v1471_v60 }
 0x88c   :  { %1570 = vmatpush.msra.mxu1 %v4382_v40 }
 0x88e   :  { %1571 = vmatpush.msra.mxu1 %v4385_v41 }
 0x890   :  { %1572 = vmatpush.msra.mxu1 %v4389_v42 }
 0x892   :  { %1573 = vmatpush.msra.mxu1 %v4392_v32 }
 0x894   :  { %1574 = vmatpush.msra.mxu1 %v4395_v43 }
 0x896   :  { %1575 = vmatpush.msra.mxu1 %v4398_v44 }
 0x898   :  { %1576 = vmatpush.msra.mxu1 %v4401_v47 }
 0x899   :  { %v1561_v5 = vpop.f32.mrf.mxu0 }
 0x89a   :  { %v1564_v6 = vadd.f32 %v1561_v5, %v1368_v2  ;;  %1577 = vmatpush.msra.mxu1 %v4404_v49  ;;  %v4714_v2 = vld [vmem:[#allocation8 + $0x78] sm:$0xff]  ;;  %v4717_v5 = vld [vmem:[#allocation8 + $0x70] sm:$0xff] }
 0x89c   :  { %2783 = vtanh.f32 %v1564_v6  ;;  %1578 = vmatpush.msra.mxu1 %v4407_v50  ;;  %v4720_v6 = vld [vmem:[#allocation8 + $0x68] sm:$0xff] }
 0x89e   :  { %1579 = vmatpush.msra.mxu1 %v4410_v51 }
 0x8a0   :  { %1580 = vmatpush.msra.mxu1 %v4413_v52 }
 0x8a2   :  { %v4472_v7 = vpop.eup %2783  ;;  %1581 = vmatpush.msra.mxu1 %v4416_v45 }
 0x8a3   :  { %1582 = vmatmul.f32.vlgmr.msra.gmra.mxu1 %v4472_v7 }
 0x8a4   :  { %1654 = vmatpush.msrb.mxu1 %v4367_v31 }
 0x8a6   :  { %1655 = vmatpush.msrb.mxu1 %v4370_v34 }
 0x8a8   :  { %1656 = vmatpush.msrb.mxu1 %v4375_v37 }
 0x8aa   :  { %1657 = vmatpush.msrb.mxu1 %v4378_v38 }
 0x8ac   :  { %1658 = vmatpush.msrb.mxu1 %v4382_v40 }
 0x8ae   :  { %1659 = vmatpush.msrb.mxu1 %v4385_v41 }
 0x8b0   :  { %1660 = vmatpush.msrb.mxu1 %v4389_v42 }
 0x8b2   :  { %1661 = vmatpush.msrb.mxu1 %v4392_v32 }
 0x8b4   :  { %1662 = vmatpush.msrb.mxu1 %v4395_v43 }
 0x8b6   :  { %1663 = vmatpush.msrb.mxu1 %v4398_v44 }
 0x8b8   :  { %1664 = vmatpush.msrb.mxu1 %v4401_v47 }
 0x8ba   :  { %1665 = vmatpush.msrb.mxu1 %v4404_v49 }
 0x8bc   :  { %1666 = vmatpush.msrb.mxu1 %v4407_v50 }
 0x8be   :  { %1667 = vmatpush.msrb.mxu1 %v4410_v51 }
 0x8c0   :  { %1668 = vmatpush.msrb.mxu1 %v4413_v52 }
 0x8c2   :  { %1669 = vmatpush.msrb.mxu1 %v4416_v45 }
 0x8f8   :  { %v1271_v33 = vpop.f32.mrf.mxu1 }
 0x8f9   :  { %v1274_v24 = vadd.f32 %v1271_v33, %v1102_v9  ;;  %v4726_v9 = vld [vmem:[#allocation8 + $0x58] sm:$0xff]  ;;  %v4729_v33 = vld [vmem:[#allocation8 + $0x50] sm:$0xff] }
 0x8fb   :  { %2785 = vtanh.f32 %v1274_v24  ;;  %v4732_v24 = vld [vmem:[#allocation8 + $0x48] sm:$0xff] }
 0x900   :  { %v1391_v11 = vpop.f32.mrf.mxu1 }
 0x901   :  { %v2786_v26 = vpop.eup %2785  ;;  %v1392_v16 = vadd.f32 %v4462_v54, %v1391_v11  ;;  %v4753_v11 = vld [vmem:[#allocation8 + $0x10] sm:$0xff] }
 0x902   :  { %1292 = vmatmul.f32.vlgmr.msrb.gmra.mxu2 %v2786_v26  ;;  %v4736_v26 = vld [vmem:[#allocation8 + $0x40] sm:$0xff] }
 0x903   :  { %1513 = vmatpush.msrb.mxu2 %v4334_v17 }
 0x905   :  { %1514 = vmatpush.msrb.mxu2 %v4339_v18 }
 0x908   :  { %v4510_v14 = vpop.f32.mrf.mxu1 }
 0x90a   :  { %2719 = vmatmul.msk.f32.vlgmr.msra.gmra.mxu2 %vm199_vm1, %v1396_v57  ;;  %v4744_v57 = vld [vmem:[#allocation8 + $0x28] sm:$0xff] }
 0x90b   :  { %1588 = vmatpush.msra.mxu2 %v4367_v31 }
 0x90d   :  { %1589 = vmatpush.msra.mxu2 %v4370_v34 }
 0x90f   :  { %1590 = vmatpush.msra.mxu2 %v4375_v37 }
 0x911   :  { %1591 = vmatpush.msra.mxu2 %v4378_v38 }
 0x912   :  { %2723 = vmatmul.msk.f32.vlgmr.msrb.gmra.mxu2 %vm199_vm1, %v1496_v12  ;;  %v4756_v12 = vld [vmem:[#allocation8 + $0x8] sm:$0xff] }
 0x913   :  { %1592 = vmatpush.msra.mxu2 %v4382_v40 }
 0x915   :  { %1593 = vmatpush.msra.mxu2 %v4385_v41 }
 0x917   :  { %1594 = vmatpush.msra.mxu2 %v4389_v42 }
 0x919   :  { %1595 = vmatpush.msra.mxu2 %v4392_v32 }
 0x91b   :  { %1596 = vmatpush.msra.mxu2 %v4395_v43 }
 0x91d   :  { %1597 = vmatpush.msra.mxu2 %v4398_v44 }
 0x91f   :  { %1598 = vmatpush.msra.mxu2 %v4401_v47 }
 0x920   :  { %v1583_v48 = vpop.f32.mrf.mxu1 }
 0x921   :  { %v1586_v19 = vadd.f32 %v1583_v48, %v1392_v16  ;;  %1599 = vmatpush.msra.mxu2 %v4404_v49  ;;  %v4759_v16 = vld [vmem:[#allocation8] sm:$0xff]  ;;  %v1467_v48 = vadd.f32 %v4462_v54, %v4455_v1  ;;  %v1492_v1 = vadd.f32 %v4462_v54, %v4510_v14 }
 0x923   :  { %2787 = vtanh.f32 %v1586_v19  ;;  %1600 = vmatpush.msra.mxu2 %v4407_v50 }
 0x925   :  { %1601 = vmatpush.msra.mxu2 %v4410_v51 }
 0x927   :  { %1602 = vmatpush.msra.mxu2 %v4413_v52 }
 0x929   :  { %v4522_v21 = vpop.eup %2787  ;;  %1603 = vmatpush.msra.mxu2 %v4416_v45 }
 0x92a   :  { %1604 = vmatmul.f32.vlgmr.msra.gmra.mxu2 %v4522_v21 }
 0x92b   :  { %1676 = vmatpush.msrb.mxu2 %v4367_v31 }
 0x92d   :  { %1677 = vmatpush.msrb.mxu2 %v4370_v34 }
 0x92f   :  { %1678 = vmatpush.msrb.mxu2 %v4375_v37 }
 0x931   :  { %1679 = vmatpush.msrb.mxu2 %v4378_v38 }
 0x933   :  { %1680 = vmatpush.msrb.mxu2 %v4382_v40 }
 0x935   :  { %1681 = vmatpush.msrb.mxu2 %v4385_v41 }
 0x937   :  { %1682 = vmatpush.msrb.mxu2 %v4389_v42 }
 0x939   :  { %1683 = vmatpush.msrb.mxu2 %v4392_v32 }
 0x93b   :  { %1684 = vmatpush.msrb.mxu2 %v4395_v43 }
 0x93d   :  { %1685 = vmatpush.msrb.mxu2 %v4398_v44 }
 0x93f   :  { %1686 = vmatpush.msrb.mxu2 %v4401_v47 }
 0x941   :  { %1687 = vmatpush.msrb.mxu2 %v4404_v49 }
 0x943   :  { %1688 = vmatpush.msrb.mxu2 %v4407_v50 }
 0x945   :  { %1689 = vmatpush.msrb.mxu2 %v4410_v51 }
 0x947   :  { %1690 = vmatpush.msrb.mxu2 %v4413_v52 }
 0x949   :  { %1691 = vmatpush.msrb.mxu2 %v4416_v45 }
 0x985   :  { %v1293_v23 = vpop.f32.mrf.mxu2 }
 0x986   :  { %v1296_v27 = vadd.f32 %v1293_v23, %v1122_v22 }
 0x988   :  { %2789 = vtanh.f32 %v1296_v27 }
 0x98d   :  { %v1416_v8 = vpop.f32.mrf.mxu2 }
 0x98e   :  { %v2790_v28 = vpop.eup %2789  ;;  %v1417_v25 = vadd.f32 %v4462_v54, %v1416_v8 }
 0x98f   :  { %1314 = vmatmul.f32.vlgmr.msrb.gmra.mxu3 %v2790_v28 }
 0x990   :  { %1538 = vmatpush.msrb.mxu3 %v4334_v17  ;;  %v1521_v17 = vsel %vm197_vm0, %v1520_v39, %v1519_v10 }
 0x992   :  { %1539 = vmatpush.msrb.mxu3 %v4339_v18 }
 0x995   :  { %v4560_v18 = vpop.f32.mrf.mxu2 }
 0x997   :  { %2720 = vmatmul.msk.f32.vlgmr.msra.gmra.mxu3 %vm199_vm1, %v1421_v36 }
 0x998   :  { %1610 = vmatpush.msra.mxu3 %v4367_v31 }
 0x99a   :  { %1611 = vmatpush.msra.mxu3 %v4370_v34 }
 0x99c   :  { %1612 = vmatpush.msra.mxu3 %v4375_v37 }
 0x99e   :  { %1613 = vmatpush.msra.mxu3 %v4378_v38 }
 0x99f   :  { %2724 = vmatmul.msk.f32.vlgmr.msrb.gmra.mxu3 %vm199_vm1, %v1521_v17 }
 0x9a0   :  { %1614 = vmatpush.msra.mxu3 %v4382_v40 }
 0x9a2   :  { %1615 = vmatpush.msra.mxu3 %v4385_v41 }
 0x9a4   :  { %1616 = vmatpush.msra.mxu3 %v4389_v42 }
 0x9a6   :  { %1617 = vmatpush.msra.mxu3 %v4392_v32 }
 0x9a8   :  { %1618 = vmatpush.msra.mxu3 %v4395_v43 }
 0x9aa   :  { %1619 = vmatpush.msra.mxu3 %v4398_v44 }
 0x9ac   :  { %1620 = vmatpush.msra.mxu3 %v4401_v47 }
 0x9ad   :  { %v1605_v29 = vpop.f32.mrf.mxu2 }
 0x9ae   :  { %v1608_v53 = vadd.f32 %v1605_v29, %v1417_v25  ;;  %1621 = vmatpush.msra.mxu3 %v4404_v49  ;;  %v1517_v25 = vadd.f32 %v4462_v54, %v4560_v18 }
 0x9b0   :  { %2791 = vtanh.f32 %v1608_v53  ;;  %1622 = vmatpush.msra.mxu3 %v4407_v50 }
 0x9b2   :  { %1623 = vmatpush.msra.mxu3 %v4410_v51 }
 0x9b4   :  { %1624 = vmatpush.msra.mxu3 %v4413_v52 }
 0x9b6   :  { %v4572_v46 = vpop.eup %2791  ;;  %1625 = vmatpush.msra.mxu3 %v4416_v45 }
 0x9b7   :  { %1626 = vmatmul.f32.vlgmr.msra.gmra.mxu3 %v4572_v46 }
 0x9b8   :  { %1698 = vmatpush.msrb.mxu3 %v4367_v31  ;;  %v4592_v31 = vld [vmem:[#allocation7 + $0x78] sm:$0xff] }
 0x9b9   :  { %1756 = vmatpush.msra.mxu0 %v4592_v31  ;;  %1776 = vmatpush.msra.mxu1 %v4592_v31 }
 0x9ba   :  { %1699 = vmatpush.msrb.mxu3 %v4370_v34  ;;  %v4594_v34 = vld [vmem:[#allocation7 + $0x70] sm:$0xff]  ;;  %1796 = vmatpush.msra.mxu2 %v4592_v31 }
 0x9bb   :  { %1757 = vmatpush.msra.mxu0 %v4594_v34  ;;  %1777 = vmatpush.msra.mxu1 %v4594_v34 }
 0x9bc   :  { %1700 = vmatpush.msrb.mxu3 %v4375_v37  ;;  %v4598_v37 = vld [vmem:[#allocation7 + $0x68] sm:$0xff]  ;;  %1797 = vmatpush.msra.mxu2 %v4594_v34 }
 0x9bd   :  { %1758 = vmatpush.msra.mxu0 %v4598_v37  ;;  %1778 = vmatpush.msra.mxu1 %v4598_v37 }
 0x9be   :  { %1701 = vmatpush.msrb.mxu3 %v4378_v38  ;;  %1798 = vmatpush.msra.mxu2 %v4598_v37  ;;  %v4610_v38 = vld [vmem:[#allocation7 + $0x60] sm:$0xff] }
 0x9bf   :  { %1759 = vmatpush.msra.mxu0 %v4610_v38  ;;  %1779 = vmatpush.msra.mxu1 %v4610_v38 }
 0x9c0   :  { %1702 = vmatpush.msrb.mxu3 %v4382_v40  ;;  %v4612_v40 = vld [vmem:[#allocation7 + $0x58] sm:$0xff]  ;;  %1799 = vmatpush.msra.mxu2 %v4610_v38 }
 0x9c1   :  { %1760 = vmatpush.msra.mxu0 %v4612_v40  ;;  %1780 = vmatpush.msra.mxu1 %v4612_v40 }
 0x9c2   :  { %1703 = vmatpush.msrb.mxu3 %v4385_v41  ;;  %v4616_v41 = vld [vmem:[#allocation7 + $0x50] sm:$0xff]  ;;  %1800 = vmatpush.msra.mxu2 %v4612_v40 }
 0x9c3   :  { %1761 = vmatpush.msra.mxu0 %v4616_v41  ;;  %1781 = vmatpush.msra.mxu1 %v4616_v41 }
 0x9c4   :  { %1704 = vmatpush.msrb.mxu3 %v4389_v42  ;;  %v4622_v42 = vld [vmem:[#allocation7 + $0x48] sm:$0xff]  ;;  %1801 = vmatpush.msra.mxu2 %v4616_v41 }
 0x9c5   :  { %1762 = vmatpush.msra.mxu0 %v4622_v42  ;;  %1782 = vmatpush.msra.mxu1 %v4622_v42 }
 0x9c6   :  { %1705 = vmatpush.msrb.mxu3 %v4392_v32  ;;  %1802 = vmatpush.msra.mxu2 %v4622_v42  ;;  %v1142_v32 = vadd.f32 %v4201_v63, %v4349_v20  ;;  %v4650_v63 = vld [vmem:[#allocation7 + $0x28] sm:$0xff]  ;;  %v4656_v20 = vld [vmem:[#allocation7 + $0x20] sm:$0xff] }
 0x9c8   :  { %1706 = vmatpush.msrb.mxu3 %v4395_v43 }
 0x9ca   :  { %1707 = vmatpush.msrb.mxu3 %v4398_v44 }
 0x9cc   :  { %1708 = vmatpush.msrb.mxu3 %v4401_v47  ;;  %v4638_v47 = vld [vmem:[#allocation7 + $0x40] sm:$0xff] }
 0x9cd   :  { %1763 = vmatpush.msra.mxu0 %v4638_v47  ;;  %1783 = vmatpush.msra.mxu1 %v4638_v47 }
 0x9ce   :  { %1709 = vmatpush.msrb.mxu3 %v4404_v49  ;;  %v4642_v49 = vld [vmem:[#allocation7 + $0x38] sm:$0xff]  ;;  %1803 = vmatpush.msra.mxu2 %v4638_v47 }
 0x9cf   :  { %1764 = vmatpush.msra.mxu0 %v4642_v49  ;;  %1784 = vmatpush.msra.mxu1 %v4642_v49 }
 0x9d0   :  { %1710 = vmatpush.msrb.mxu3 %v4407_v50  ;;  %v4647_v50 = vld [vmem:[#allocation7 + $0x30] sm:$0xff]  ;;  %1804 = vmatpush.msra.mxu2 %v4642_v49 }
 0x9d1   :  { %1765 = vmatpush.msra.mxu0 %v4647_v50  ;;  %1785 = vmatpush.msra.mxu1 %v4647_v50 }
 0x9d2   :  { %1711 = vmatpush.msrb.mxu3 %v4410_v51  ;;  %1805 = vmatpush.msra.mxu2 %v4647_v50  ;;  %v4666_v51 = vld [vmem:[#allocation7 + $0x18] sm:$0xff] }
 0x9d3   :  { %1766 = vmatpush.msra.mxu0 %v4650_v63  ;;  %1786 = vmatpush.msra.mxu1 %v4650_v63 }
 0x9d4   :  { %1712 = vmatpush.msrb.mxu3 %v4413_v52  ;;  %1806 = vmatpush.msra.mxu2 %v4650_v63  ;;  %v4668_v52 = vld [vmem:[#allocation7 + $0x10] sm:$0xff] }
 0x9d5   :  { %1767 = vmatpush.msra.mxu0 %v4656_v20  ;;  %1787 = vmatpush.msra.mxu1 %v4656_v20 }
 0x9d6   :  { %1713 = vmatpush.msrb.mxu3 %v4416_v45  ;;  %1807 = vmatpush.msra.mxu2 %v4656_v20  ;;  %v4674_v45 = vld [vmem:[#allocation7 + $0x8] sm:$0xff] }
 0x9d7   :  { %1768 = vmatpush.msra.mxu0 %v4666_v51  ;;  %1788 = vmatpush.msra.mxu1 %v4666_v51 }
 0x9d8   :  { %1816 = vmatpush.msra.mxu3 %v4592_v31  ;;  %1808 = vmatpush.msra.mxu2 %v4666_v51 }
 0x9d9   :  { %1769 = vmatpush.msra.mxu0 %v4668_v52  ;;  %1789 = vmatpush.msra.mxu1 %v4668_v52 }
 0x9da   :  { %1817 = vmatpush.msra.mxu3 %v4594_v34  ;;  %1809 = vmatpush.msra.mxu2 %v4668_v52 }
 0x9db   :  { %1770 = vmatpush.msra.mxu0 %v4674_v45  ;;  %1790 = vmatpush.msra.mxu1 %v4674_v45 }
 0x9dc   :  { %1818 = vmatpush.msra.mxu3 %v4598_v37  ;;  %1810 = vmatpush.msra.mxu2 %v4674_v45 }
 0x9dd   :  { %1771 = vmatpush.msra.mxu0 %v4680_v59  ;;  %1791 = vmatpush.msra.mxu1 %v4680_v59 }
 0x9de   :  { %1819 = vmatpush.msra.mxu3 %v4610_v38  ;;  %1811 = vmatpush.msra.mxu2 %v4680_v59 }
 0x9e0   :  { %1820 = vmatpush.msra.mxu3 %v4612_v40 }
 0x9e2   :  { %1821 = vmatpush.msra.mxu3 %v4616_v41 }
 0x9e4   :  { %1822 = vmatpush.msra.mxu3 %v4622_v42 }
 0x9e6   :  { %1823 = vmatpush.msra.mxu3 %v4638_v47 }
 0x9e8   :  { %1824 = vmatpush.msra.mxu3 %v4642_v49 }
 0x9ea   :  { %1825 = vmatpush.msra.mxu3 %v4647_v50 }
 0x9ec   :  { %1826 = vmatpush.msra.mxu3 %v4650_v63 }
 0x9ee   :  { %1827 = vmatpush.msra.mxu3 %v4656_v20 }
 0x9f0   :  { %1828 = vmatpush.msra.mxu3 %v4666_v51 }
 0x9f2   :  { %1829 = vmatpush.msra.mxu3 %v4668_v52 }
 0x9f4   :  { %1830 = vmatpush.msra.mxu3 %v4674_v45 }
 0x9f6   :  { %1831 = vmatpush.msra.mxu3 %v4680_v59 }
 0xa12   :  { %v1315_v43 = vpop.f32.mrf.mxu3 }
 0xa13   :  { %v4636_v44 = vadd.f32 %v1315_v43, %v1142_v32 }
 0xa1a   :  { %v1441_v55 = vpop.f32.mrf.mxu3 }
 0xa1b   :  { %v1442_v61 = vadd.f32 %v4462_v54, %v1441_v55 }
 0xa22   :  { %v4692_v62 = vpop.f32.mrf.mxu3 }
 0xa3a   :  { %v1627_v0 = vpop.f32.mrf.mxu3 }
 0xa3b   :  { %v1630_v13 = vadd.f32 %v1627_v0, %v1442_v61  ;;  %v5004_v61 = vld [vmem:[#allocation10 + $0x38] sm:$0xff]  ;;  %v5009_v0 = vld [vmem:[#allocation10 + $0x30] sm:$0xff] }
 0xa3d   :  { %2793 = vtanh.f32 %v1630_v13  ;;  %v5012_v13 = vld [vmem:[#allocation10 + $0x28] sm:$0xff] }
 0xa43   :  { %v4695_v60 = vpop.eup %2793 }
 0xa44   :  { %1648 = vmatmul.f32.vlgmr.msrb.gmra.mxu0 %v4695_v60 }
 0xa45   :  { %1836 = vmatpush.msrb.mxu0 %v4592_v31 }
 0xa47   :  { %1837 = vmatpush.msrb.mxu0 %v4594_v34 }
 0xa49   :  { %1838 = vmatpush.msrb.mxu0 %v4598_v37 }
 0xa4b   :  { %1839 = vmatpush.msrb.mxu0 %v4610_v38 }
 0xa4c   :  { %1772 = vmatmul.f32.vlgmr.msra.gmra.mxu0 %v4472_v7  ;;  %v4723_v7 = vld [vmem:[#allocation8 + $0x60] sm:$0xff] }
 0xa4d   :  { %1840 = vmatpush.msrb.mxu0 %v4612_v40 }
 0xa4f   :  { %1841 = vmatpush.msrb.mxu0 %v4616_v41 }
 0xa51   :  { %1842 = vmatpush.msrb.mxu0 %v4622_v42 }
 0xa53   :  { %1843 = vmatpush.msrb.mxu0 %v4638_v47 }
 0xa55   :  { %1844 = vmatpush.msrb.mxu0 %v4642_v49 }
 0xa57   :  { %1845 = vmatpush.msrb.mxu0 %v4647_v50 }
 0xa59   :  { %1846 = vmatpush.msrb.mxu0 %v4650_v63 }
 0xa5b   :  { %1847 = vmatpush.msrb.mxu0 %v4656_v20 }
 0xa5d   :  { %1848 = vmatpush.msrb.mxu0 %v4666_v51 }
 0xa5f   :  { %1849 = vmatpush.msrb.mxu0 %v4668_v52 }
 0xa61   :  { %1850 = vmatpush.msrb.mxu0 %v4674_v45 }
 0xa63   :  { %1851 = vmatpush.msrb.mxu0 %v4680_v59 }
 0xa65   :  { %1916 = vmatpush.msra.mxu0 %v4714_v2 }
 0xa67   :  { %1917 = vmatpush.msra.mxu0 %v4717_v5 }
 0xa69   :  { %1918 = vmatpush.msra.mxu0 %v4720_v6 }
 0xa6b   :  { %1919 = vmatpush.msra.mxu0 %v4723_v7 }
 0xa6d   :  { %1920 = vmatpush.msra.mxu0 %v4726_v9 }
 0xa6f   :  { %1921 = vmatpush.msra.mxu0 %v4729_v33 }
 0xa71   :  { %1922 = vmatpush.msra.mxu0 %v4732_v24 }
 0xa73   :  { %1923 = vmatpush.msra.mxu0 %v4736_v26 }
 0xa75   :  { %1924 = vmatpush.msra.mxu0 %v4739_v4 }
 0xa77   :  { %1925 = vmatpush.msra.mxu0 %v4742_v56 }
 0xa79   :  { %1926 = vmatpush.msra.mxu0 %v4744_v57 }
 0xa7b   :  { %1927 = vmatpush.msra.mxu0 %v4748_v3 }
 0xa7d   :  { %1928 = vmatpush.msra.mxu0 %v4751_v58 }
 0xa7f   :  { %1929 = vmatpush.msra.mxu0 %v4753_v11 }
 0xa81   :  { %1930 = vmatpush.msra.mxu0 %v4756_v12 }
 0xa83   :  { %1931 = vmatpush.msra.mxu0 %v4759_v16 }
 0xac1   :  { %v1649_v19 = vpop.f32.mrf.mxu0 }
 0xac2   :  { %v1652_v22 = vadd.f32 %v1649_v19, %v1467_v48  ;;  %v5094_v48 = vld [vmem:[#allocation11 + $0x48] sm:$0xff]  ;;  %v5098_v19 = vld [vmem:[#allocation11 + $0x40] sm:$0xff] }
 0xac4   :  { %2795 = vtanh.f32 %v1652_v22  ;;  %v5101_v22 = vld [vmem:[#allocation11 + $0x38] sm:$0xff] }
 0xaca   :  { %v2796_v23 = vpop.eup %2795 }
 0xacb   :  { %1670 = vmatmul.f32.vlgmr.msrb.gmra.mxu1 %v2796_v23  ;;  %1852 = vmatmul.f32.vlgmr.msrb.gmra.mxu0 %v2796_v23  ;;  %v5104_v23 = vld [vmem:[#allocation11 + $0x30] sm:$0xff] }
 0xacc   :  { %1856 = vmatpush.msrb.mxu1 %v4592_v31  ;;  %2004 = vmatpush.msrb.mxu0 %v4714_v2 }
 0xace   :  { %1857 = vmatpush.msrb.mxu1 %v4594_v34  ;;  %2005 = vmatpush.msrb.mxu0 %v4717_v5 }
 0xad0   :  { %1858 = vmatpush.msrb.mxu1 %v4598_v37  ;;  %2006 = vmatpush.msrb.mxu0 %v4720_v6 }
 0xad2   :  { %1859 = vmatpush.msrb.mxu1 %v4610_v38  ;;  %2007 = vmatpush.msrb.mxu0 %v4723_v7 }
 0xad3   :  { %1792 = vmatmul.f32.vlgmr.msra.gmra.mxu1 %v4522_v21  ;;  %1932 = vmatmul.f32.vlgmr.msra.gmra.mxu0 %v4312_v15  ;;  %v1773_v15 = vpop.f32.mrf.mxu0 }
 0xad4   :  { %1860 = vmatpush.msrb.mxu1 %v4612_v40  ;;  %2008 = vmatpush.msrb.mxu0 %v4726_v9  ;;  %v1774_v35 = vadd.f32 %v4822_v30, %v1773_v15  ;;  %v5106_v15 = vld [vmem:[#allocation11 + $0x28] sm:$0xff] }
 0xad6   :  { %1861 = vmatpush.msrb.mxu1 %v4616_v41  ;;  %2009 = vmatpush.msrb.mxu0 %v4729_v33 }
 0xad8   :  { %1862 = vmatpush.msrb.mxu1 %v4622_v42  ;;  %2010 = vmatpush.msrb.mxu0 %v4732_v24 }
 0xada   :  { %1863 = vmatpush.msrb.mxu1 %v4638_v47  ;;  %2011 = vmatpush.msrb.mxu0 %v4736_v26 }
 0xadc   :  { %1864 = vmatpush.msrb.mxu1 %v4642_v49  ;;  %2012 = vmatpush.msrb.mxu0 %v4739_v4 }
 0xade   :  { %1865 = vmatpush.msrb.mxu1 %v4647_v50  ;;  %2013 = vmatpush.msrb.mxu0 %v4742_v56 }
 0xae0   :  { %1866 = vmatpush.msrb.mxu1 %v4650_v63  ;;  %2014 = vmatpush.msrb.mxu0 %v4744_v57 }
 0xae2   :  { %1867 = vmatpush.msrb.mxu1 %v4656_v20  ;;  %2015 = vmatpush.msrb.mxu0 %v4748_v3 }
 0xae4   :  { %1868 = vmatpush.msrb.mxu1 %v4666_v51  ;;  %2016 = vmatpush.msrb.mxu0 %v4751_v58 }
 0xae6   :  { %1869 = vmatpush.msrb.mxu1 %v4668_v52  ;;  %2017 = vmatpush.msrb.mxu0 %v4753_v11 }
 0xae8   :  { %1870 = vmatpush.msrb.mxu1 %v4674_v45  ;;  %2018 = vmatpush.msrb.mxu0 %v4756_v12 }
 0xaea   :  { %1871 = vmatpush.msrb.mxu1 %v4680_v59  ;;  %2019 = vmatpush.msrb.mxu0 %v4759_v16 }
 0xaec   :  { %1938 = vmatpush.msra.mxu1 %v4714_v2 }
 0xaee   :  { %1939 = vmatpush.msra.mxu1 %v4717_v5 }
 0xaf0   :  { %1940 = vmatpush.msra.mxu1 %v4720_v6 }
 0xaf2   :  { %1941 = vmatpush.msra.mxu1 %v4723_v7 }
 0xaf4   :  { %1942 = vmatpush.msra.mxu1 %v4726_v9 }
 0xaf6   :  { %1943 = vmatpush.msra.mxu1 %v4729_v33 }
 0xaf8   :  { %1944 = vmatpush.msra.mxu1 %v4732_v24 }
 0xafa   :  { %1945 = vmatpush.msra.mxu1 %v4736_v26 }
 0xafc   :  { %1946 = vmatpush.msra.mxu1 %v4739_v4 }
 0xafe   :  { %1947 = vmatpush.msra.mxu1 %v4742_v56 }
 0xb00   :  { %1948 = vmatpush.msra.mxu1 %v4744_v57 }
 0xb02   :  { %1949 = vmatpush.msra.mxu1 %v4748_v3 }
 0xb04   :  { %1950 = vmatpush.msra.mxu1 %v4751_v58 }
 0xb06   :  { %1951 = vmatpush.msra.mxu1 %v4753_v11 }
 0xb08   :  { %1952 = vmatpush.msra.mxu1 %v4756_v12 }
 0xb0a   :  { %1953 = vmatpush.msra.mxu1 %v4759_v16 }
 0xb48   :  { %v1671_v21 = vpop.f32.mrf.mxu1  ;;  %v4817_v27 = vpop.f32.mrf.mxu0 }
 0xb49   :  { %v1674_v28 = vadd.f32 %v1671_v21, %v1492_v1  ;;  %v5110_v1 = vld [vmem:[#allocation11 + $0x20] sm:$0xff]  ;;  %v5113_v21 = vld [vmem:[#allocation11 + $0x18] sm:$0xff] }
 0xb4b   :  { %2797 = vtanh.f32 %v1674_v28  ;;  %v5115_v28 = vld [vmem:[#allocation11 + $0x10] sm:$0xff] }
 0xb50   :  { %v1933_v36 = vpop.f32.mrf.mxu0  ;;  %v1793_v8 = vpop.f32.mrf.mxu1 }
 0xb51   :  { %v2798_v10 = vpop.eup %2797  ;;  %v1936_v39 = vadd.f32 %v1933_v36, %v1774_v35  ;;  %v1794_v32 = vadd.f32 %v4822_v30, %v1793_v8  ;;  %v5118_v35 = vld [vmem:[#allocation11 + $0x8] sm:$0xff]  ;;  %v5121_v36 = vld [vmem:[#allocation11] sm:$0xff] }
 0xb52   :  { %1692 = vmatmul.f32.vlgmr.msrb.gmra.mxu2 %v2798_v10  ;;  %1872 = vmatmul.f32.vlgmr.msrb.gmra.mxu1 %v2798_v10  ;;  %v1854_v10 = vadd.f32 %v4822_v30, %v4817_v27 }
 0xb53   :  { %2799 = vtanh.f32 %v1936_v39  ;;  %1876 = vmatpush.msrb.mxu2 %v4592_v31  ;;  %2026 = vmatpush.msrb.mxu1 %v4714_v2 }
 0xb55   :  { %1877 = vmatpush.msrb.mxu2 %v4594_v34  ;;  %2027 = vmatpush.msrb.mxu1 %v4717_v5 }
 0xb57   :  { %1878 = vmatpush.msrb.mxu2 %v4598_v37  ;;  %2028 = vmatpush.msrb.mxu1 %v4720_v6 }
 0xb59   :  { %v4831_v14 = vpop.eup %2799  ;;  %1879 = vmatpush.msrb.mxu2 %v4610_v38  ;;  %2029 = vmatpush.msrb.mxu1 %v4723_v7 }
 0xb5a   :  { %1812 = vmatmul.f32.vlgmr.msra.gmra.mxu2 %v4572_v46  ;;  %1954 = vmatmul.f32.vlgmr.msra.gmra.mxu1 %v4831_v14 }
 0xb5b   :  { %1880 = vmatpush.msrb.mxu2 %v4612_v40  ;;  %2030 = vmatpush.msrb.mxu1 %v4726_v9 }
 0xb5d   :  { %1881 = vmatpush.msrb.mxu2 %v4616_v41  ;;  %2031 = vmatpush.msrb.mxu1 %v4729_v33 }
 0xb5f   :  { %1882 = vmatpush.msrb.mxu2 %v4622_v42  ;;  %2032 = vmatpush.msrb.mxu1 %v4732_v24 }
 0xb61   :  { %1883 = vmatpush.msrb.mxu2 %v4638_v47  ;;  %2033 = vmatpush.msrb.mxu1 %v4736_v26 }
 0xb63   :  { %1884 = vmatpush.msrb.mxu2 %v4642_v49  ;;  %2034 = vmatpush.msrb.mxu1 %v4739_v4 }
 0xb65   :  { %1885 = vmatpush.msrb.mxu2 %v4647_v50  ;;  %2035 = vmatpush.msrb.mxu1 %v4742_v56 }
 0xb67   :  { %1886 = vmatpush.msrb.mxu2 %v4650_v63  ;;  %2036 = vmatpush.msrb.mxu1 %v4744_v57 }
 0xb69   :  { %1887 = vmatpush.msrb.mxu2 %v4656_v20  ;;  %2037 = vmatpush.msrb.mxu1 %v4748_v3 }
 0xb6b   :  { %1888 = vmatpush.msrb.mxu2 %v4666_v51  ;;  %2038 = vmatpush.msrb.mxu1 %v4751_v58 }
 0xb6d   :  { %1889 = vmatpush.msrb.mxu2 %v4668_v52  ;;  %2039 = vmatpush.msrb.mxu1 %v4753_v11 }
 0xb6f   :  { %1890 = vmatpush.msrb.mxu2 %v4674_v45  ;;  %2040 = vmatpush.msrb.mxu1 %v4756_v12 }
 0xb71   :  { %1891 = vmatpush.msrb.mxu2 %v4680_v59  ;;  %2041 = vmatpush.msrb.mxu1 %v4759_v16 }
 0xb73   :  { %1960 = vmatpush.msra.mxu2 %v4714_v2 }
 0xb75   :  { %1961 = vmatpush.msra.mxu2 %v4717_v5 }
 0xb77   :  { %1962 = vmatpush.msra.mxu2 %v4720_v6 }
 0xb79   :  { %1963 = vmatpush.msra.mxu2 %v4723_v7 }
 0xb7b   :  { %1964 = vmatpush.msra.mxu2 %v4726_v9 }
 0xb7d   :  { %1965 = vmatpush.msra.mxu2 %v4729_v33 }
 0xb7f   :  { %1966 = vmatpush.msra.mxu2 %v4732_v24 }
 0xb81   :  { %1967 = vmatpush.msra.mxu2 %v4736_v26 }
 0xb83   :  { %1968 = vmatpush.msra.mxu2 %v4739_v4 }
 0xb85   :  { %1969 = vmatpush.msra.mxu2 %v4742_v56 }
 0xb87   :  { %1970 = vmatpush.msra.mxu2 %v4744_v57 }
 0xb89   :  { %1971 = vmatpush.msra.mxu2 %v4748_v3 }
 0xb8b   :  { %1972 = vmatpush.msra.mxu2 %v4751_v58 }
 0xb8d   :  { %1973 = vmatpush.msra.mxu2 %v4753_v11 }
 0xb8f   :  { %1974 = vmatpush.msra.mxu2 %v4756_v12 }
 0xb91   :  { %1975 = vmatpush.msra.mxu2 %v4759_v16 }
 0xbcf   :  { %v4877_v17 = vpop.f32.mrf.mxu1 }
 0xbd5   :  { %v1693_v29 = vpop.f32.mrf.mxu2 }
 0xbd6   :  { %v1696_v53 = vadd.f32 %v1693_v29, %v1517_v25  ;;  %v1874_v25 = vadd.f32 %v4822_v30, %v4877_v17 }
 0xbd7   :  { %v1955_v46 = vpop.f32.mrf.mxu1 }
 0xbd8   :  { %2801 = vtanh.f32 %v1696_v53  ;;  %v1958_v43 = vadd.f32 %v1955_v46, %v1794_v32  ;;  %v5184_v32 = vld [vmem:[%s5601_s20] ss:$0 sm:$0xff] }
 0xbda   :  { %2803 = vtanh.f32 %v1958_v43 }
 0xbde   :  { %v2802_v55 = vpop.eup %2801 }
 0xbdf   :  { %1714 = vmatmul.f32.vlgmr.msrb.gmra.mxu3 %v2802_v55  ;;  %1892 = vmatmul.f32.vlgmr.msrb.gmra.mxu2 %v2802_v55 }
 0xbe0   :  { %1896 = vmatpush.msrb.mxu3 %v4592_v31  ;;  %2048 = vmatpush.msrb.mxu2 %v4714_v2  ;;  %v4888_v18 = vpop.eup %2803  ;;  %v4934_v31 = vld [vmem:[#allocation10 + $0x78] sm:$0xff] }
 0xbe1   :  { %2128 = vmatpush.msra.mxu0 %v4934_v31  ;;  %2148 = vmatpush.msra.mxu1 %v4934_v31 }
 0xbe2   :  { %1897 = vmatpush.msrb.mxu3 %v4594_v34  ;;  %2049 = vmatpush.msrb.mxu2 %v4717_v5  ;;  %v4936_v34 = vld [vmem:[#allocation10 + $0x70] sm:$0xff] }
 0xbe3   :  { %2129 = vmatpush.msra.mxu0 %v4936_v34  ;;  %2149 = vmatpush.msra.mxu1 %v4936_v34 }
 0xbe4   :  { %1898 = vmatpush.msrb.mxu3 %v4598_v37  ;;  %2050 = vmatpush.msrb.mxu2 %v4720_v6  ;;  %v4940_v37 = vld [vmem:[#allocation10 + $0x68] sm:$0xff] }
 0xbe5   :  { %2130 = vmatpush.msra.mxu0 %v4940_v37  ;;  %2150 = vmatpush.msra.mxu1 %v4940_v37 }
 0xbe6   :  { %1899 = vmatpush.msrb.mxu3 %v4610_v38  ;;  %2051 = vmatpush.msrb.mxu2 %v4723_v7  ;;  %v1813_v38 = vpop.f32.mrf.mxu2 }
 0xbe7   :  { %1832 = vmatmul.f32.vlgmr.msra.gmra.mxu3 %v4695_v60  ;;  %1976 = vmatmul.f32.vlgmr.msra.gmra.mxu2 %v4888_v18  ;;  %v5018_v60 = vld [vmem:[#allocation10 + $0x20] sm:$0xff] }
 0xbe8   :  { %1900 = vmatpush.msrb.mxu3 %v4612_v40  ;;  %2052 = vmatpush.msrb.mxu2 %v4726_v9  ;;  %v1542_v40 = vadd.f32 %v4462_v54, %v4692_v62  ;;  %v4976_v54 = vld [vmem:[#allocation10 + $0x60] sm:$0xff] }
 0xbe9   :  { %2131 = vmatpush.msra.mxu0 %v4976_v54  ;;  %2151 = vmatpush.msra.mxu1 %v4976_v54  ;;  %v4998_v62 = vld [vmem:[#allocation10 + $0x40] sm:$0xff] }
 0xbea   :  { %1901 = vmatpush.msrb.mxu3 %v4616_v41  ;;  %2053 = vmatpush.msrb.mxu2 %v4729_v33 }
 0xbec   :  { %1902 = vmatpush.msrb.mxu3 %v4622_v42  ;;  %2054 = vmatpush.msrb.mxu2 %v4732_v24 }
 0xbee   :  { %1903 = vmatpush.msrb.mxu3 %v4638_v47  ;;  %2055 = vmatpush.msrb.mxu2 %v4736_v26 }
 0xbf0   :  { %1904 = vmatpush.msrb.mxu3 %v4642_v49  ;;  %2056 = vmatpush.msrb.mxu2 %v4739_v4  ;;  %v1814_v49 = vadd.f32 %v4822_v30, %v1813_v38 }
 0xbf2   :  { %1905 = vmatpush.msrb.mxu3 %v4647_v50  ;;  %2057 = vmatpush.msrb.mxu2 %v4742_v56 }
 0xbf4   :  { %1906 = vmatpush.msrb.mxu3 %v4650_v63  ;;  %2058 = vmatpush.msrb.mxu2 %v4744_v57 }
 0xbf6   :  { %1907 = vmatpush.msrb.mxu3 %v4656_v20  ;;  %2059 = vmatpush.msrb.mxu2 %v4748_v3 }
 0xbf8   :  { %1908 = vmatpush.msrb.mxu3 %v4666_v51  ;;  %2060 = vmatpush.msrb.mxu2 %v4751_v58 }
 0xbfa   :  { %1909 = vmatpush.msrb.mxu3 %v4668_v52  ;;  %2061 = vmatpush.msrb.mxu2 %v4753_v11  ;;  %v4979_v52 = vld [vmem:[#allocation10 + $0x58] sm:$0xff] }
 0xbfb   :  { %2132 = vmatpush.msra.mxu0 %v4979_v52  ;;  %2152 = vmatpush.msra.mxu1 %v4979_v52 }
 0xbfc   :  { %1910 = vmatpush.msrb.mxu3 %v4674_v45  ;;  %2062 = vmatpush.msrb.mxu2 %v4756_v12  ;;  %v4982_v45 = vld [vmem:[#allocation10 + $0x50] sm:$0xff] }
 0xbfd   :  { %2133 = vmatpush.msra.mxu0 %v4982_v45  ;;  %2153 = vmatpush.msra.mxu1 %v4982_v45 }
 0xbfe   :  { %1911 = vmatpush.msrb.mxu3 %v4680_v59  ;;  %2063 = vmatpush.msrb.mxu2 %v4759_v16  ;;  %v4988_v59 = vld [vmem:[#allocation10 + $0x48] sm:$0xff] }
 0xbff   :  { %2134 = vmatpush.msra.mxu0 %v4988_v59  ;;  %2154 = vmatpush.msra.mxu1 %v4988_v59 }
 0xc00   :  { %1982 = vmatpush.msra.mxu3 %v4714_v2  ;;  %2168 = vmatpush.msra.mxu2 %v4934_v31 }
 0xc01   :  { %2135 = vmatpush.msra.mxu0 %v4998_v62  ;;  %2155 = vmatpush.msra.mxu1 %v4998_v62 }
 0xc02   :  { %1983 = vmatpush.msra.mxu3 %v4717_v5  ;;  %2169 = vmatpush.msra.mxu2 %v4936_v34 }
 0xc03   :  { %2136 = vmatpush.msra.mxu0 %v5004_v61  ;;  %2156 = vmatpush.msra.mxu1 %v5004_v61 }
 0xc04   :  { %1984 = vmatpush.msra.mxu3 %v4720_v6  ;;  %2170 = vmatpush.msra.mxu2 %v4940_v37 }
 0xc05   :  { %2137 = vmatpush.msra.mxu0 %v5009_v0  ;;  %2157 = vmatpush.msra.mxu1 %v5009_v0 }
 0xc06   :  { %1985 = vmatpush.msra.mxu3 %v4723_v7  ;;  %2171 = vmatpush.msra.mxu2 %v4976_v54 }
 0xc07   :  { %2138 = vmatpush.msra.mxu0 %v5012_v13  ;;  %2158 = vmatpush.msra.mxu1 %v5012_v13 }
 0xc08   :  { %1986 = vmatpush.msra.mxu3 %v4726_v9  ;;  %2172 = vmatpush.msra.mxu2 %v4979_v52 }
 0xc09   :  { %2139 = vmatpush.msra.mxu0 %v5018_v60  ;;  %2159 = vmatpush.msra.mxu1 %v5018_v60 }
 0xc0a   :  { %1987 = vmatpush.msra.mxu3 %v4729_v33  ;;  %2173 = vmatpush.msra.mxu2 %v4982_v45 }
 0xc0c   :  { %1988 = vmatpush.msra.mxu3 %v4732_v24  ;;  %2174 = vmatpush.msra.mxu2 %v4988_v59 }
 0xc0e   :  { %1989 = vmatpush.msra.mxu3 %v4736_v26  ;;  %2175 = vmatpush.msra.mxu2 %v4998_v62 }
 0xc10   :  { %1990 = vmatpush.msra.mxu3 %v4739_v4  ;;  %2176 = vmatpush.msra.mxu2 %v5004_v61 }
 0xc12   :  { %1991 = vmatpush.msra.mxu3 %v4742_v56  ;;  %2177 = vmatpush.msra.mxu2 %v5009_v0 }
 0xc14   :  { %1992 = vmatpush.msra.mxu3 %v4744_v57  ;;  %2178 = vmatpush.msra.mxu2 %v5012_v13 }
 0xc16   :  { %1993 = vmatpush.msra.mxu3 %v4748_v3  ;;  %2179 = vmatpush.msra.mxu2 %v5018_v60 }
 0xc18   :  { %1994 = vmatpush.msra.mxu3 %v4751_v58 }
 0xc1a   :  { %1995 = vmatpush.msra.mxu3 %v4753_v11 }
 0xc1c   :  { %1996 = vmatpush.msra.mxu3 %v4756_v12 }
 0xc1e   :  { %1997 = vmatpush.msra.mxu3 %v4759_v16 }
 0xc62   :  { %v1715_v41 = vpop.f32.mrf.mxu3  ;;  %v4951_v42 = vpop.f32.mrf.mxu2 }
 0xc63   :  { %v1718_v47 = vadd.f32 %v1715_v41, %v1542_v40 }
 0xc65   :  { %2805 = vtanh.f32 %v1718_v47  ;;  %v1894_v47 = vadd.f32 %v4822_v30, %v4951_v42 }
 0xc6a   :  { %v1977_v50 = vpop.f32.mrf.mxu2 }
 0xc6b   :  { %v2806_v63 = vpop.eup %2805  ;;  %v1980_v20 = vadd.f32 %v1977_v50, %v1814_v49 }
 0xc6c   :  { %1912 = vmatmul.f32.vlgmr.msrb.gmra.mxu3 %v2806_v63 }
 0xc6d   :  { %2807 = vtanh.f32 %v1980_v20  ;;  %2070 = vmatpush.msrb.mxu3 %v4714_v2  ;;  %v5028_v2 = vld [vmem:[#allocation10 + $0x18] sm:$0xff] }
 0xc6e   :  { %2140 = vmatpush.msra.mxu0 %v5028_v2  ;;  %2160 = vmatpush.msra.mxu1 %v5028_v2 }
 0xc6f   :  { %2071 = vmatpush.msrb.mxu3 %v4717_v5  ;;  %v5030_v5 = vld [vmem:[#allocation10 + $0x10] sm:$0xff]  ;;  %2180 = vmatpush.msra.mxu2 %v5028_v2 }
 0xc70   :  { %2141 = vmatpush.msra.mxu0 %v5030_v5  ;;  %2161 = vmatpush.msra.mxu1 %v5030_v5 }
 0xc71   :  { %2072 = vmatpush.msrb.mxu3 %v4720_v6  ;;  %v5036_v6 = vld [vmem:[#allocation10 + $0x8] sm:$0xff]  ;;  %2181 = vmatpush.msra.mxu2 %v5030_v5 }
 0xc72   :  { %2142 = vmatpush.msra.mxu0 %v5036_v6  ;;  %2162 = vmatpush.msra.mxu1 %v5036_v6 }
 0xc73   :  { %v4957_v51 = vpop.eup %2807  ;;  %2073 = vmatpush.msrb.mxu3 %v4723_v7  ;;  %v5042_v7 = vld [vmem:[#allocation10] sm:$0xff]  ;;  %2182 = vmatpush.msra.mxu2 %v5036_v6 }
 0xc74   :  { %1998 = vmatmul.f32.vlgmr.msra.gmra.mxu3 %v4957_v51  ;;  %2143 = vmatpush.msra.mxu0 %v5042_v7 }
 0xc75   :  { %2074 = vmatpush.msrb.mxu3 %v4726_v9  ;;  %v1833_v9 = vpop.f32.mrf.mxu3  ;;  %2163 = vmatpush.msra.mxu1 %v5042_v7 }
 0xc76   :  { %2183 = vmatpush.msra.mxu2 %v5042_v7 }
 0xc77   :  { %2075 = vmatpush.msrb.mxu3 %v4729_v33 }
 0xc79   :  { %2076 = vmatpush.msrb.mxu3 %v4732_v24  ;;  %v1834_v24 = vadd.f32 %v4822_v30, %v1833_v9 }
 0xc7b   :  { %2077 = vmatpush.msrb.mxu3 %v4736_v26 }
 0xc7d   :  { %2078 = vmatpush.msrb.mxu3 %v4739_v4 }
 0xc7f   :  { %2079 = vmatpush.msrb.mxu3 %v4742_v56 }
 0xc81   :  { %2080 = vmatpush.msrb.mxu3 %v4744_v57  ;;  %v5076_v57 = vld [vmem:[#allocation11 + $0x78] sm:$0xff] }
 0xc83   :  { %2081 = vmatpush.msrb.mxu3 %v4748_v3  ;;  %v5079_v3 = vld [vmem:[#allocation11 + $0x70] sm:$0xff] }
 0xc85   :  { %2082 = vmatpush.msrb.mxu3 %v4751_v58  ;;  %v5082_v58 = vld [vmem:[#allocation11 + $0x68] sm:$0xff] }
 0xc87   :  { %2083 = vmatpush.msrb.mxu3 %v4753_v11  ;;  %v5085_v11 = vld [vmem:[#allocation11 + $0x60] sm:$0xff] }
 0xc89   :  { %2084 = vmatpush.msrb.mxu3 %v4756_v12  ;;  %v5088_v12 = vld [vmem:[#allocation11 + $0x58] sm:$0xff] }
 0xc8b   :  { %2085 = vmatpush.msrb.mxu3 %v4759_v16  ;;  %v5091_v16 = vld [vmem:[#allocation11 + $0x50] sm:$0xff] }
 0xc8d   :  { %2188 = vmatpush.msra.mxu3 %v4934_v31 }
 0xc8f   :  { %2189 = vmatpush.msra.mxu3 %v4936_v34 }
 0xc91   :  { %2190 = vmatpush.msra.mxu3 %v4940_v37 }
 0xc93   :  { %2191 = vmatpush.msra.mxu3 %v4976_v54 }
 0xc95   :  { %2192 = vmatpush.msra.mxu3 %v4979_v52 }
 0xc97   :  { %2193 = vmatpush.msra.mxu3 %v4982_v45 }
 0xc99   :  { %2194 = vmatpush.msra.mxu3 %v4988_v59 }
 0xc9b   :  { %2195 = vmatpush.msra.mxu3 %v4998_v62 }
 0xc9d   :  { %2196 = vmatpush.msra.mxu3 %v5004_v61 }
 0xc9f   :  { %2197 = vmatpush.msra.mxu3 %v5009_v0 }
 0xca1   :  { %2198 = vmatpush.msra.mxu3 %v5012_v13 }
 0xca3   :  { %2199 = vmatpush.msra.mxu3 %v5018_v60 }
 0xca5   :  { %2200 = vmatpush.msra.mxu3 %v5028_v2 }
 0xca7   :  { %2201 = vmatpush.msra.mxu3 %v5030_v5 }
 0xca9   :  { %2202 = vmatpush.msra.mxu3 %v5036_v6 }
 0xcab   :  { %2203 = vmatpush.msra.mxu3 %v5042_v7 }
 0xcef   :  { %v5054_v33 = vpop.f32.mrf.mxu3 }
 0xcf7   :  { %v1999_v26 = vpop.f32.mrf.mxu3 }
 0xcf8   :  { %v2002_v4 = vadd.f32 %v1999_v26, %v1834_v24  ;;  %v5393_v24 = vld [vmem:[%s5602_s21 + $0x38] sm:$0xff]  ;;  %v5401_v26 = vld [vmem:[%s5602_s21 + $0x30] sm:$0xff] }
 0xcfa   :  { %2809 = vtanh.f32 %v2002_v4  ;;  %v5407_v4 = vld [vmem:[%s5602_s21 + $0x28] sm:$0xff] }
 0xd00   :  { %v5057_v56 = vpop.eup %2809 }
 0xd01   :  { %2020 = vmatmul.f32.vlgmr.msrb.gmra.mxu0 %v5057_v56 }
 0xd02   :  { %2208 = vmatpush.msrb.mxu0 %v4934_v31 }
 0xd04   :  { %2209 = vmatpush.msrb.mxu0 %v4936_v34 }
 0xd06   :  { %2210 = vmatpush.msrb.mxu0 %v4940_v37 }
 0xd08   :  { %2211 = vmatpush.msrb.mxu0 %v4976_v54 }
 0xd09   :  { %2144 = vmatmul.f32.vlgmr.msra.gmra.mxu0 %v4831_v14 }
 0xd0a   :  { %2212 = vmatpush.msrb.mxu0 %v4979_v52 }
 0xd0c   :  { %2213 = vmatpush.msrb.mxu0 %v4982_v45 }
 0xd0e   :  { %2214 = vmatpush.msrb.mxu0 %v4988_v59 }
 0xd10   :  { %2215 = vmatpush.msrb.mxu0 %v4998_v62 }
 0xd12   :  { %2216 = vmatpush.msrb.mxu0 %v5004_v61 }
 0xd14   :  { %2217 = vmatpush.msrb.mxu0 %v5009_v0 }
 0xd16   :  { %2218 = vmatpush.msrb.mxu0 %v5012_v13 }
 0xd18   :  { %2219 = vmatpush.msrb.mxu0 %v5018_v60 }
 0xd1a   :  { %2220 = vmatpush.msrb.mxu0 %v5028_v2 }
 0xd1c   :  { %2221 = vmatpush.msrb.mxu0 %v5030_v5 }
 0xd1e   :  { %2222 = vmatpush.msrb.mxu0 %v5036_v6 }
 0xd20   :  { %2223 = vmatpush.msrb.mxu0 %v5042_v7 }
 0xd22   :  { %2288 = vmatpush.msra.mxu0 %v5076_v57 }
 0xd24   :  { %2289 = vmatpush.msra.mxu0 %v5079_v3 }
 0xd26   :  { %2290 = vmatpush.msra.mxu0 %v5082_v58 }
 0xd28   :  { %2291 = vmatpush.msra.mxu0 %v5085_v11 }
 0xd2a   :  { %2292 = vmatpush.msra.mxu0 %v5088_v12 }
 0xd2c   :  { %2293 = vmatpush.msra.mxu0 %v5091_v16 }
 0xd2e   :  { %2294 = vmatpush.msra.mxu0 %v5094_v48 }
 0xd30   :  { %2295 = vmatpush.msra.mxu0 %v5098_v19 }
 0xd32   :  { %2296 = vmatpush.msra.mxu0 %v5101_v22 }
 0xd34   :  { %2297 = vmatpush.msra.mxu0 %v5104_v23 }
 0xd36   :  { %2298 = vmatpush.msra.mxu0 %v5106_v15 }
 0xd38   :  { %2299 = vmatpush.msra.mxu0 %v5110_v1 }
 0xd3a   :  { %2300 = vmatpush.msra.mxu0 %v5113_v21 }
 0xd3c   :  { %2301 = vmatpush.msra.mxu0 %v5115_v28 }
 0xd3e   :  { %2302 = vmatpush.msra.mxu0 %v5118_v35 }
 0xd40   :  { %2303 = vmatpush.msra.mxu0 %v5121_v36 }
 0xd7e   :  { %v2021_v39 = vpop.f32.mrf.mxu0 }
 0xd7f   :  { %v2024_v14 = vadd.f32 %v2021_v39, %v1854_v10 }
 0xd81   :  { %2811 = vtanh.f32 %v2024_v14 }
 0xd82   :  { %2813 = vtanh.f32 %v4636_v44 }
 0xd86   :  { %v2145_v44 = vpop.f32.mrf.mxu0 }
 0xd87   :  { %v2812_v8 = vpop.eup %2811  ;;  %v2146_v43 = vadd.f32 %v5184_v32, %v2145_v44 }
 0xd88   :  { %2042 = vmatmul.f32.vlgmr.msrb.gmra.mxu1 %v2812_v8  ;;  %2224 = vmatmul.f32.vlgmr.msrb.gmra.mxu0 %v2812_v8  ;;  %v2814_v27 = vpop.eup %2813 }
 0xd89   :  { %2228 = vmatpush.msrb.mxu1 %v4934_v31  ;;  %2376 = vmatpush.msrb.mxu0 %v5076_v57 }
 0xd8b   :  { %2229 = vmatpush.msrb.mxu1 %v4936_v34  ;;  %2377 = vmatpush.msrb.mxu0 %v5079_v3 }
 0xd8d   :  { %2230 = vmatpush.msrb.mxu1 %v4940_v37  ;;  %2378 = vmatpush.msrb.mxu0 %v5082_v58 }
 0xd8f   :  { %2231 = vmatpush.msrb.mxu1 %v4976_v54  ;;  %2379 = vmatpush.msrb.mxu0 %v5085_v11 }
 0xd90   :  { %2164 = vmatmul.f32.vlgmr.msra.gmra.mxu1 %v4888_v18  ;;  %2304 = vmatmul.f32.vlgmr.msra.gmra.mxu0 %v2814_v27 }
 0xd91   :  { %2232 = vmatpush.msrb.mxu1 %v4979_v52  ;;  %2380 = vmatpush.msrb.mxu0 %v5088_v12 }
 0xd93   :  { %2233 = vmatpush.msrb.mxu1 %v4982_v45  ;;  %2381 = vmatpush.msrb.mxu0 %v5091_v16 }
 0xd95   :  { %2234 = vmatpush.msrb.mxu1 %v4988_v59  ;;  %2382 = vmatpush.msrb.mxu0 %v5094_v48 }
 0xd97   :  { %2235 = vmatpush.msrb.mxu1 %v4998_v62  ;;  %2383 = vmatpush.msrb.mxu0 %v5098_v19 }
 0xd99   :  { %2236 = vmatpush.msrb.mxu1 %v5004_v61  ;;  %2384 = vmatpush.msrb.mxu0 %v5101_v22 }
 0xd9b   :  { %2237 = vmatpush.msrb.mxu1 %v5009_v0  ;;  %2385 = vmatpush.msrb.mxu0 %v5104_v23 }
 0xd9d   :  { %2238 = vmatpush.msrb.mxu1 %v5012_v13  ;;  %2386 = vmatpush.msrb.mxu0 %v5106_v15 }
 0xd9f   :  { %2239 = vmatpush.msrb.mxu1 %v5018_v60  ;;  %2387 = vmatpush.msrb.mxu0 %v5110_v1 }
 0xda1   :  { %2240 = vmatpush.msrb.mxu1 %v5028_v2  ;;  %2388 = vmatpush.msrb.mxu0 %v5113_v21 }
 0xda3   :  { %2241 = vmatpush.msrb.mxu1 %v5030_v5  ;;  %2389 = vmatpush.msrb.mxu0 %v5115_v28 }
 0xda5   :  { %2242 = vmatpush.msrb.mxu1 %v5036_v6  ;;  %2390 = vmatpush.msrb.mxu0 %v5118_v35 }
 0xda7   :  { %2243 = vmatpush.msrb.mxu1 %v5042_v7  ;;  %2391 = vmatpush.msrb.mxu0 %v5121_v36 }
 0xda9   :  { %2310 = vmatpush.msra.mxu1 %v5076_v57 }
 0xdab   :  { %2311 = vmatpush.msra.mxu1 %v5079_v3 }
 0xdad   :  { %2312 = vmatpush.msra.mxu1 %v5082_v58 }
 0xdaf   :  { %2313 = vmatpush.msra.mxu1 %v5085_v11 }
 0xdb1   :  { %2314 = vmatpush.msra.mxu1 %v5088_v12 }
 0xdb3   :  { %2315 = vmatpush.msra.mxu1 %v5091_v16 }
 0xdb5   :  { %2316 = vmatpush.msra.mxu1 %v5094_v48 }
 0xdb7   :  { %2317 = vmatpush.msra.mxu1 %v5098_v19 }
 0xdb9   :  { %2318 = vmatpush.msra.mxu1 %v5101_v22 }
 0xdbb   :  { %2319 = vmatpush.msra.mxu1 %v5104_v23 }
 0xdbd   :  { %2320 = vmatpush.msra.mxu1 %v5106_v15 }
 0xdbf   :  { %2321 = vmatpush.msra.mxu1 %v5110_v1 }
 0xdc1   :  { %2322 = vmatpush.msra.mxu1 %v5113_v21 }
 0xdc3   :  { %2323 = vmatpush.msra.mxu1 %v5115_v28 }
 0xdc5   :  { %2324 = vmatpush.msra.mxu1 %v5118_v35 }
 0xdc7   :  { %2325 = vmatpush.msra.mxu1 %v5121_v36 }
 0xe05   :  { %v2043_v29 = vpop.f32.mrf.mxu1  ;;  %v5179_v53 = vpop.f32.mrf.mxu0 }
 0xe06   :  { %v2046_v46 = vadd.f32 %v2043_v29, %v1874_v25 }
 0xe08   :  { %2815 = vtanh.f32 %v2046_v46 }
 0xe0d   :  { %v2305_v55 = vpop.f32.mrf.mxu0  ;;  %v2165_v40 = vpop.f32.mrf.mxu1 }
 0xe0e   :  { %v2816_v18 = vpop.eup %2815  ;;  %v2308_v38 = vadd.f32 %v2305_v55, %v2146_v43  ;;  %v2166_v20 = vadd.f32 %v5184_v32, %v2165_v40 }
 0xe0f   :  { %2064 = vmatmul.f32.vlgmr.msrb.gmra.mxu2 %v2816_v18  ;;  %2244 = vmatmul.f32.vlgmr.msrb.gmra.mxu1 %v2816_v18 }
 0xe10   :  { %2817 = vtanh.f32 %v2308_v38  ;;  %2248 = vmatpush.msrb.mxu2 %v4934_v31  ;;  %2398 = vmatpush.msrb.mxu1 %v5076_v57 }
 0xe12   :  { %2249 = vmatpush.msrb.mxu2 %v4936_v34  ;;  %2399 = vmatpush.msrb.mxu1 %v5079_v3 }
 0xe14   :  { %2250 = vmatpush.msrb.mxu2 %v4940_v37  ;;  %2400 = vmatpush.msrb.mxu1 %v5082_v58 }
 0xe16   :  { %v5193_v17 = vpop.eup %2817  ;;  %2251 = vmatpush.msrb.mxu2 %v4976_v54  ;;  %2401 = vmatpush.msrb.mxu1 %v5085_v11 }
 0xe17   :  { %2184 = vmatmul.f32.vlgmr.msra.gmra.mxu2 %v4957_v51  ;;  %2326 = vmatmul.f32.vlgmr.msra.gmra.mxu1 %v5193_v17 }
 0xe18   :  { %2252 = vmatpush.msrb.mxu2 %v4979_v52  ;;  %2402 = vmatpush.msrb.mxu1 %v5088_v12 }
 0xe1a   :  { %2253 = vmatpush.msrb.mxu2 %v4982_v45  ;;  %2403 = vmatpush.msrb.mxu1 %v5091_v16 }
 0xe1c   :  { %2254 = vmatpush.msrb.mxu2 %v4988_v59  ;;  %2404 = vmatpush.msrb.mxu1 %v5094_v48 }
 0xe1e   :  { %2255 = vmatpush.msrb.mxu2 %v4998_v62  ;;  %2405 = vmatpush.msrb.mxu1 %v5098_v19 }
 0xe20   :  { %2256 = vmatpush.msrb.mxu2 %v5004_v61  ;;  %2406 = vmatpush.msrb.mxu1 %v5101_v22 }
 0xe22   :  { %2257 = vmatpush.msrb.mxu2 %v5009_v0  ;;  %2407 = vmatpush.msrb.mxu1 %v5104_v23 }
 0xe24   :  { %2258 = vmatpush.msrb.mxu2 %v5012_v13  ;;  %2408 = vmatpush.msrb.mxu1 %v5106_v15 }
 0xe26   :  { %2259 = vmatpush.msrb.mxu2 %v5018_v60  ;;  %2409 = vmatpush.msrb.mxu1 %v5110_v1 }
 0xe28   :  { %2260 = vmatpush.msrb.mxu2 %v5028_v2  ;;  %2410 = vmatpush.msrb.mxu1 %v5113_v21 }
 0xe2a   :  { %2261 = vmatpush.msrb.mxu2 %v5030_v5  ;;  %2411 = vmatpush.msrb.mxu1 %v5115_v28 }
 0xe2c   :  { %2262 = vmatpush.msrb.mxu2 %v5036_v6  ;;  %2412 = vmatpush.msrb.mxu1 %v5118_v35 }
 0xe2e   :  { %2263 = vmatpush.msrb.mxu2 %v5042_v7  ;;  %2413 = vmatpush.msrb.mxu1 %v5121_v36 }
 0xe30   :  { %2332 = vmatpush.msra.mxu2 %v5076_v57 }
 0xe32   :  { %2333 = vmatpush.msra.mxu2 %v5079_v3 }
 0xe34   :  { %2334 = vmatpush.msra.mxu2 %v5082_v58 }
 0xe36   :  { %2335 = vmatpush.msra.mxu2 %v5085_v11 }
 0xe38   :  { %2336 = vmatpush.msra.mxu2 %v5088_v12 }
 0xe3a   :  { %2337 = vmatpush.msra.mxu2 %v5091_v16 }
 0xe3c   :  { %2338 = vmatpush.msra.mxu2 %v5094_v48 }
 0xe3e   :  { %2339 = vmatpush.msra.mxu2 %v5098_v19 }
 0xe40   :  { %2340 = vmatpush.msra.mxu2 %v5101_v22 }
 0xe42   :  { %2341 = vmatpush.msra.mxu2 %v5104_v23 }
 0xe44   :  { %2342 = vmatpush.msra.mxu2 %v5106_v15 }
 0xe46   :  { %2343 = vmatpush.msra.mxu2 %v5110_v1 }
 0xe48   :  { %2344 = vmatpush.msra.mxu2 %v5113_v21 }
 0xe4a   :  { %2345 = vmatpush.msra.mxu2 %v5115_v28 }
 0xe4c   :  { %2346 = vmatpush.msra.mxu2 %v5118_v35 }
 0xe4e   :  { %2347 = vmatpush.msra.mxu2 %v5121_v36 }
 0xe8c   :  { %v5239_v41 = vpop.f32.mrf.mxu1 }
 0xe8d   :  { %v2246_v14 = vadd.f32 %v5184_v32, %v5239_v41 }
 0xe92   :  { %v2065_v49 = vpop.f32.mrf.mxu2 }
 0xe93   :  { %v2068_v50 = vadd.f32 %v2065_v49, %v1894_v47 }
 0xe94   :  { %v2327_v63 = vpop.f32.mrf.mxu1 }
 0xe95   :  { %2819 = vtanh.f32 %v2068_v50  ;;  %v2330_v51 = vadd.f32 %v2327_v63, %v2166_v20 }
 0xe97   :  { %2821 = vtanh.f32 %v2330_v51 }
 0xe9b   :  { %v2820_v9 = vpop.eup %2819 }
 0xe9c   :  { %2086 = vmatmul.f32.vlgmr.msrb.gmra.mxu3 %v2820_v9  ;;  %2264 = vmatmul.f32.vlgmr.msrb.gmra.mxu2 %v2820_v9 }
 0xe9d   :  { %2268 = vmatpush.msrb.mxu3 %v4934_v31  ;;  %2420 = vmatpush.msrb.mxu2 %v5076_v57  ;;  %v5250_v42 = vpop.eup %2821  ;;  %v5299_v31 = vld [vmem:[%s5602_s21 + $0x78] sm:$0xff] }
 0xe9e   :  { %2484 = vmatpush.msra.mxu0 %v5299_v31  ;;  %2510 = vmatpush.msra.mxu1 %v5299_v31 }
 0xe9f   :  { %2269 = vmatpush.msrb.mxu3 %v4936_v34  ;;  %2421 = vmatpush.msrb.mxu2 %v5079_v3  ;;  %v5304_v34 = vld [vmem:[%s5602_s21 + $0x70] sm:$0xff] }
 0xea0   :  { %2485 = vmatpush.msra.mxu0 %v5304_v34  ;;  %2511 = vmatpush.msra.mxu1 %v5304_v34 }
 0xea1   :  { %2270 = vmatpush.msrb.mxu3 %v4940_v37  ;;  %2422 = vmatpush.msrb.mxu2 %v5082_v58  ;;  %v5311_v37 = vld [vmem:[%s5602_s21 + $0x68] sm:$0xff] }
 0xea2   :  { %2486 = vmatpush.msra.mxu0 %v5311_v37  ;;  %2512 = vmatpush.msra.mxu1 %v5311_v37 }
 0xea3   :  { %2271 = vmatpush.msrb.mxu3 %v4976_v54  ;;  %2423 = vmatpush.msrb.mxu2 %v5085_v11  ;;  %v2185_v54 = vpop.f32.mrf.mxu2 }
 0xea4   :  { %2204 = vmatmul.f32.vlgmr.msra.gmra.mxu3 %v5057_v56  ;;  %2348 = vmatmul.f32.vlgmr.msra.gmra.mxu2 %v5250_v42  ;;  %v5416_v56 = vld [vmem:[%s5602_s21 + $0x20] sm:$0xff] }
 0xea5   :  { %2272 = vmatpush.msrb.mxu3 %v4979_v52  ;;  %2424 = vmatpush.msrb.mxu2 %v5088_v12  ;;  %v1914_v52 = vadd.f32 %v4822_v30, %v5054_v33  ;;  %v5350_v30 = vld [vmem:[%s5602_s21 + $0x60] sm:$0xff] }
 0xea6   :  { %2487 = vmatpush.msra.mxu0 %v5350_v30  ;;  %2513 = vmatpush.msra.mxu1 %v5350_v30  ;;  %v5384_v33 = vld [vmem:[%s5602_s21 + $0x40] sm:$0xff] }
 0xea7   :  { %2273 = vmatpush.msrb.mxu3 %v4982_v45  ;;  %2425 = vmatpush.msrb.mxu2 %v5091_v16 }
 0xea9   :  { %2274 = vmatpush.msrb.mxu3 %v4988_v59  ;;  %2426 = vmatpush.msrb.mxu2 %v5094_v48 }
 0xeab   :  { %2275 = vmatpush.msrb.mxu3 %v4998_v62  ;;  %2427 = vmatpush.msrb.mxu2 %v5098_v19 }
 0xead   :  { %2276 = vmatpush.msrb.mxu3 %v5004_v61  ;;  %2428 = vmatpush.msrb.mxu2 %v5101_v22  ;;  %v2186_v61 = vadd.f32 %v5184_v32, %v2185_v54 }
 0xeaf   :  { %2277 = vmatpush.msrb.mxu3 %v5009_v0  ;;  %2429 = vmatpush.msrb.mxu2 %v5104_v23 }
 0xeb1   :  { %2278 = vmatpush.msrb.mxu3 %v5012_v13  ;;  %2430 = vmatpush.msrb.mxu2 %v5106_v15 }
 0xeb3   :  { %2279 = vmatpush.msrb.mxu3 %v5018_v60  ;;  %2431 = vmatpush.msrb.mxu2 %v5110_v1 }
 0xeb5   :  { %2280 = vmatpush.msrb.mxu3 %v5028_v2  ;;  %2432 = vmatpush.msrb.mxu2 %v5113_v21 }
 0xeb7   :  { %2281 = vmatpush.msrb.mxu3 %v5030_v5  ;;  %2433 = vmatpush.msrb.mxu2 %v5115_v28  ;;  %v5356_v5 = vld [vmem:[%s5602_s21 + $0x58] sm:$0xff] }
 0xeb8   :  { %2488 = vmatpush.msra.mxu0 %v5356_v5  ;;  %2514 = vmatpush.msra.mxu1 %v5356_v5 }
 0xeb9   :  { %2282 = vmatpush.msrb.mxu3 %v5036_v6  ;;  %2434 = vmatpush.msrb.mxu2 %v5118_v35  ;;  %v5362_v6 = vld [vmem:[%s5602_s21 + $0x50] sm:$0xff] }
 0xeba   :  { %2489 = vmatpush.msra.mxu0 %v5362_v6  ;;  %2515 = vmatpush.msra.mxu1 %v5362_v6 }
 0xebb   :  { %2283 = vmatpush.msrb.mxu3 %v5042_v7  ;;  %2435 = vmatpush.msrb.mxu2 %v5121_v36  ;;  %v5371_v7 = vld [vmem:[%s5602_s21 + $0x48] sm:$0xff] }
 0xebc   :  { %2490 = vmatpush.msra.mxu0 %v5371_v7  ;;  %2516 = vmatpush.msra.mxu1 %v5371_v7 }
 0xebd   :  { %2354 = vmatpush.msra.mxu3 %v5076_v57  ;;  %2535 = vmatpush.msra.mxu2 %v5299_v31 }
 0xebe   :  { %2491 = vmatpush.msra.mxu0 %v5384_v33  ;;  %2517 = vmatpush.msra.mxu1 %v5384_v33 }
 0xebf   :  { %2355 = vmatpush.msra.mxu3 %v5079_v3  ;;  %2536 = vmatpush.msra.mxu2 %v5304_v34 }
 0xec0   :  { %2492 = vmatpush.msra.mxu0 %v5393_v24  ;;  %2518 = vmatpush.msra.mxu1 %v5393_v24 }
 0xec1   :  { %2356 = vmatpush.msra.mxu3 %v5082_v58  ;;  %2537 = vmatpush.msra.mxu2 %v5311_v37 }
 0xec2   :  { %2493 = vmatpush.msra.mxu0 %v5401_v26  ;;  %2519 = vmatpush.msra.mxu1 %v5401_v26 }
 0xec3   :  { %2357 = vmatpush.msra.mxu3 %v5085_v11  ;;  %2538 = vmatpush.msra.mxu2 %v5350_v30 }
 0xec4   :  { %2494 = vmatpush.msra.mxu0 %v5407_v4  ;;  %2520 = vmatpush.msra.mxu1 %v5407_v4 }
 0xec5   :  { %2358 = vmatpush.msra.mxu3 %v5088_v12  ;;  %2539 = vmatpush.msra.mxu2 %v5356_v5 }
 0xec6   :  { %2495 = vmatpush.msra.mxu0 %v5416_v56  ;;  %2521 = vmatpush.msra.mxu1 %v5416_v56 }
 0xec7   :  { %2359 = vmatpush.msra.mxu3 %v5091_v16  ;;  %2540 = vmatpush.msra.mxu2 %v5362_v6 }
 0xec9   :  { %2360 = vmatpush.msra.mxu3 %v5094_v48  ;;  %2541 = vmatpush.msra.mxu2 %v5371_v7 }
 0xecb   :  { %2361 = vmatpush.msra.mxu3 %v5098_v19  ;;  %2542 = vmatpush.msra.mxu2 %v5384_v33 }
 0xecd   :  { %2362 = vmatpush.msra.mxu3 %v5101_v22  ;;  %2543 = vmatpush.msra.mxu2 %v5393_v24 }
 0xecf   :  { %2363 = vmatpush.msra.mxu3 %v5104_v23  ;;  %2544 = vmatpush.msra.mxu2 %v5401_v26 }
 0xed1   :  { %2364 = vmatpush.msra.mxu3 %v5106_v15  ;;  %2545 = vmatpush.msra.mxu2 %v5407_v4 }
 0xed3   :  { %2365 = vmatpush.msra.mxu3 %v5110_v1  ;;  %2546 = vmatpush.msra.mxu2 %v5416_v56 }
 0xed5   :  { %2366 = vmatpush.msra.mxu3 %v5113_v21 }
 0xed7   :  { %2367 = vmatpush.msra.mxu3 %v5115_v28 }
 0xed9   :  { %2368 = vmatpush.msra.mxu3 %v5118_v35 }
 0xedb   :  { %2369 = vmatpush.msra.mxu3 %v5121_v36 }
 0xf1f   :  { %v2087_v45 = vpop.f32.mrf.mxu3  ;;  %v5322_v59 = vpop.f32.mrf.mxu2 }
 0xf20   :  { %v2090_v62 = vadd.f32 %v2087_v45, %v1914_v52  ;;  %v2266_v40 = vadd.f32 %v5184_v32, %v5322_v59 }
 0xf22   :  { %2823 = vtanh.f32 %v2090_v62 }
 0xf27   :  { %v2349_v0 = vpop.f32.mrf.mxu2 }
 0xf28   :  { %v2824_v13 = vpop.eup %2823  ;;  %v2352_v60 = vadd.f32 %v2349_v0, %v2186_v61 }
 0xf29   :  { %2284 = vmatmul.f32.vlgmr.msrb.gmra.mxu3 %v2824_v13 }
 0xf2a   :  { %2825 = vtanh.f32 %v2352_v60  ;;  %2442 = vmatpush.msrb.mxu3 %v5076_v57  ;;  %v5429_v57 = vld [vmem:[%s5602_s21 + $0x18] sm:$0xff] }
 0xf2b   :  { %2496 = vmatpush.msra.mxu0 %v5429_v57  ;;  %2522 = vmatpush.msra.mxu1 %v5429_v57 }
 0xf2c   :  { %2443 = vmatpush.msrb.mxu3 %v5079_v3  ;;  %v5434_v3 = vld [vmem:[%s5602_s21 + $0x10] sm:$0xff]  ;;  %2547 = vmatpush.msra.mxu2 %v5429_v57 }
 0xf2d   :  { %2497 = vmatpush.msra.mxu0 %v5434_v3  ;;  %2523 = vmatpush.msra.mxu1 %v5434_v3 }
 0xf2e   :  { %2444 = vmatpush.msrb.mxu3 %v5082_v58  ;;  %v5443_v58 = vld [vmem:[%s5602_s21 + $0x8] sm:$0xff]  ;;  %2548 = vmatpush.msra.mxu2 %v5434_v3 }
 0xf2f   :  { %2498 = vmatpush.msra.mxu0 %v5443_v58  ;;  %2524 = vmatpush.msra.mxu1 %v5443_v58 }
 0xf30   :  { %v5328_v2 = vpop.eup %2825  ;;  %2445 = vmatpush.msrb.mxu3 %v5085_v11  ;;  %v5452_v11 = vld [vmem:[%s5602_s21] sm:$0xff]  ;;  %2549 = vmatpush.msra.mxu2 %v5443_v58 }
 0xf31   :  { %2370 = vmatmul.f32.vlgmr.msra.gmra.mxu3 %v5328_v2  ;;  %2499 = vmatpush.msra.mxu0 %v5452_v11 }
 0xf32   :  { %2446 = vmatpush.msrb.mxu3 %v5088_v12  ;;  %v2205_v12 = vpop.f32.mrf.mxu3  ;;  %2525 = vmatpush.msra.mxu1 %v5452_v11 }
 0xf33   :  { %2550 = vmatpush.msra.mxu2 %v5452_v11 }
 0xf34   :  { %2447 = vmatpush.msrb.mxu3 %v5091_v16 }
 0xf36   :  { %2448 = vmatpush.msrb.mxu3 %v5094_v48  ;;  %v2206_v48 = vadd.f32 %v5184_v32, %v2205_v12 }
 0xf38   :  { %2449 = vmatpush.msrb.mxu3 %v5098_v19 }
 0xf3a   :  { %2450 = vmatpush.msrb.mxu3 %v5101_v22 }
 0xf3c   :  { %2451 = vmatpush.msrb.mxu3 %v5104_v23 }
 0xf3e   :  { %2452 = vmatpush.msrb.mxu3 %v5106_v15  ;;  %v2226_v15 = vadd.f32 %v5184_v32, %v5179_v53 }
 0xf40   :  { %2453 = vmatpush.msrb.mxu3 %v5110_v1 }
 0xf42   :  { %2454 = vmatpush.msrb.mxu3 %v5113_v21 }
 0xf44   :  { %2455 = vmatpush.msrb.mxu3 %v5115_v28  ;;  %v5492_v28 = vld [vmem:[%s5603_s22] ss:$0 sm:$0xff]  ;;  %s3023_s22 = smov [#allocation13]  }
 0xf45   :  { %s2689_s9 = sshll.u32 %s3023_s22, 4  ;;  %s2690_s9 = int_to_ptr.vmem [resolvable:$true] %s2689_s9 }
 0xf46   :  { %2456 = vmatpush.msrb.mxu3 %v5118_v35 }
 0xf48   :  { %2457 = vmatpush.msrb.mxu3 %v5121_v36 }
 0xf4a   :  { %2560 = vmatpush.msra.mxu3 %v5299_v31 }
 0xf4c   :  { %2561 = vmatpush.msra.mxu3 %v5304_v34 }
 0xf4e   :  { %2562 = vmatpush.msra.mxu3 %v5311_v37 }
 0xf50   :  { %2563 = vmatpush.msra.mxu3 %v5350_v30 }
 0xf52   :  { %2564 = vmatpush.msra.mxu3 %v5356_v5 }
 0xf54   :  { %2565 = vmatpush.msra.mxu3 %v5362_v6 }
 0xf56   :  { %2566 = vmatpush.msra.mxu3 %v5371_v7 }
 0xf58   :  { %2567 = vmatpush.msra.mxu3 %v5384_v33 }
 0xf5a   :  { %2568 = vmatpush.msra.mxu3 %v5393_v24 }
 0xf5c   :  { %2569 = vmatpush.msra.mxu3 %v5401_v26 }
 0xf5e   :  { %2570 = vmatpush.msra.mxu3 %v5407_v4 }
 0xf60   :  { %2571 = vmatpush.msra.mxu3 %v5416_v56 }
 0xf62   :  { %2572 = vmatpush.msra.mxu3 %v5429_v57 }
 0xf64   :  { %2573 = vmatpush.msra.mxu3 %v5434_v3 }
 0xf66   :  { %2574 = vmatpush.msra.mxu3 %v5443_v58 }
 0xf68   :  { %2575 = vmatpush.msra.mxu3 %v5452_v11 }
 0xfac   :  { %v5464_v16 = vpop.f32.mrf.mxu3 }
 0xfad   :  { %v2286_v51 = vadd.f32 %v5184_v32, %v5464_v16 }
 0xfb4   :  { %v2371_v19 = vpop.f32.mrf.mxu3 }
 0xfb5   :  { %v2374_v22 = vadd.f32 %v2371_v19, %v2206_v48 }
 0xfb7   :  { %2827 = vtanh.f32 %v2374_v22 }
 0xfbd   :  { %v5467_v23 = vpop.eup %2827 }
 0xfbe   :  { %2392 = vmatmul.f32.vlgmr.msrb.gmra.mxu0 %v5467_v23 }
 0xfbf   :  { %2585 = vmatpush.msrb.mxu0 %v5299_v31 }
 0xfc1   :  { %2586 = vmatpush.msrb.mxu0 %v5304_v34 }
 0xfc3   :  { %2587 = vmatpush.msrb.mxu0 %v5311_v37 }
 0xfc5   :  { %2588 = vmatpush.msrb.mxu0 %v5350_v30 }
 0xfc6   :  { %2500 = vmatmul.f32.vlgmr.msra.gmra.mxu0 %v5193_v17 }
 0xfc7   :  { %2589 = vmatpush.msrb.mxu0 %v5356_v5 }
 0xfc9   :  { %2590 = vmatpush.msrb.mxu0 %v5362_v6 }
 0xfcb   :  { %2591 = vmatpush.msrb.mxu0 %v5371_v7 }
 0xfcd   :  { %2592 = vmatpush.msrb.mxu0 %v5384_v33 }
 0xfcf   :  { %2593 = vmatpush.msrb.mxu0 %v5393_v24 }
 0xfd1   :  { %2594 = vmatpush.msrb.mxu0 %v5401_v26 }
 0xfd3   :  { %2595 = vmatpush.msrb.mxu0 %v5407_v4 }
 0xfd5   :  { %2596 = vmatpush.msrb.mxu0 %v5416_v56 }
 0xfd7   :  { %2597 = vmatpush.msrb.mxu0 %v5429_v57 }
 0xfd9   :  { %2598 = vmatpush.msrb.mxu0 %v5434_v3 }
 0xfdb   :  { %2599 = vmatpush.msrb.mxu0 %v5443_v58 }
 0xfdd   :  { %2600 = vmatpush.msrb.mxu0 %v5452_v11 }
0x103b   :  { %v2393_v1 = vpop.f32.mrf.mxu0 }
0x103c   :  { %v2396_v21 = vadd.f32 %v2393_v1, %v2226_v15 }
0x103e   :  { %2829 = vtanh.f32 %v2396_v21 }
0x1043   :  { %v2501_v35 = vpop.f32.mrf.mxu0 }
0x1044   :  { %v2830_v36 = vpop.eup %2829  ;;  %v2502_v10 = vadd.f32 %v5492_v28, %v2501_v35 }
0x1045   :  { %2414 = vmatmul.f32.vlgmr.msrb.gmra.mxu1 %v2830_v36  ;;  %2601 = vmatmul.f32.vlgmr.msrb.gmra.mxu0 %v2830_v36 }
0x1046   :  { %v2505_v39 = vrot.slane %v2502_v10, 1  ;;  %2508 = vst.msk [vmem:[#allocation13] sm:$0x1] %vm2507_vm2, %v2502_v10  ;;  %2610 = vmatpush.msrb.mxu1 %v5299_v31 }
0x1048   :  { %2509 = vst.msk [vmem:[#allocation13 + $0x8] sm:$0x1] %vm2507_vm2, %v2505_v39  ;;  %2611 = vmatpush.msrb.mxu1 %v5304_v34 }
0x104a   :  { %2612 = vmatpush.msrb.mxu1 %v5311_v37 }
0x104c   :  { %2613 = vmatpush.msrb.mxu1 %v5350_v30 }
0x104d   :  { %2526 = vmatmul.f32.vlgmr.msra.gmra.mxu1 %v5250_v42 }
0x104e   :  { %2614 = vmatpush.msrb.mxu1 %v5356_v5 }
0x1050   :  { %2615 = vmatpush.msrb.mxu1 %v5362_v6 }
0x1052   :  { %2616 = vmatpush.msrb.mxu1 %v5371_v7 }
0x1054   :  { %2617 = vmatpush.msrb.mxu1 %v5384_v33 }
0x1056   :  { %2618 = vmatpush.msrb.mxu1 %v5393_v24 }
0x1058   :  { %2619 = vmatpush.msrb.mxu1 %v5401_v26 }
0x105a   :  { %2620 = vmatpush.msrb.mxu1 %v5407_v4 }
0x105c   :  { %2621 = vmatpush.msrb.mxu1 %v5416_v56 }
0x105e   :  { %2622 = vmatpush.msrb.mxu1 %v5429_v57 }
0x1060   :  { %2623 = vmatpush.msrb.mxu1 %v5434_v3 }
0x1062   :  { %2624 = vmatpush.msrb.mxu1 %v5443_v58 }
0x1064   :  { %2625 = vmatpush.msrb.mxu1 %v5452_v11 }
0x10c2   :  { %v2415_v8 = vpop.f32.mrf.mxu1  ;;  %v2602_v27 = vpop.f32.mrf.mxu0 }
0x10c3   :  { %v2418_v44 = vadd.f32 %v2415_v8, %v2246_v14  ;;  %v2603_v25 = vadd.f32 %v5492_v28, %v2602_v27 }
0x10c5   :  { %2831 = vtanh.f32 %v2418_v44  ;;  %v2606_v29 = vrot.slane %v2603_v25, 1  ;;  %2608 = vst.msk [vmem:[#allocation13 + $0x4] sm:$0x1] %vm2507_vm2, %v2603_v25 }
0x10c7   :  { %2609 = vst.msk [vmem:[#allocation13 + $0xc] sm:$0x1] %vm2507_vm2, %v2606_v29 }
0x10ca   :  { %v2527_v53 = vpop.f32.mrf.mxu1 }
0x10cb   :  { %v2832_v46 = vpop.eup %2831  ;;  %v2528_v43 = vadd.f32 %v5492_v28, %v2527_v53 }
0x10cc   :  { %2436 = vmatmul.f32.vlgmr.msrb.gmra.mxu2 %v2832_v46  ;;  %2626 = vmatmul.f32.vlgmr.msrb.gmra.mxu1 %v2832_v46 }
0x10cd   :  { %v2531_v55 = vrot.slane %v2528_v43, 1  ;;  %2533 = vst.msk [vmem:[#allocation13 + $0x1] sm:$0x1] %vm2507_vm2, %v2528_v43  ;;  %2635 = vmatpush.msrb.mxu2 %v5299_v31 }
0x10cf   :  { %2534 = vst.msk [vmem:[#allocation13 + $0x9] sm:$0x1] %vm2507_vm2, %v2531_v55  ;;  %2636 = vmatpush.msrb.mxu2 %v5304_v34 }
0x10d1   :  { %2637 = vmatpush.msrb.mxu2 %v5311_v37 }
0x10d3   :  { %2638 = vmatpush.msrb.mxu2 %v5350_v30 }
0x10d4   :  { %2551 = vmatmul.f32.vlgmr.msra.gmra.mxu2 %v5328_v2 }
0x10d5   :  { %2639 = vmatpush.msrb.mxu2 %v5356_v5 }
0x10d7   :  { %2640 = vmatpush.msrb.mxu2 %v5362_v6 }
0x10d9   :  { %2641 = vmatpush.msrb.mxu2 %v5371_v7 }
0x10db   :  { %2642 = vmatpush.msrb.mxu2 %v5384_v33 }
0x10dd   :  { %2643 = vmatpush.msrb.mxu2 %v5393_v24 }
0x10df   :  { %2644 = vmatpush.msrb.mxu2 %v5401_v26 }
0x10e1   :  { %2645 = vmatpush.msrb.mxu2 %v5407_v4 }
0x10e3   :  { %2646 = vmatpush.msrb.mxu2 %v5416_v56 }
0x10e5   :  { %2647 = vmatpush.msrb.mxu2 %v5429_v57 }
0x10e7   :  { %2648 = vmatpush.msrb.mxu2 %v5434_v3 }
0x10e9   :  { %2649 = vmatpush.msrb.mxu2 %v5443_v58 }
0x10eb   :  { %2650 = vmatpush.msrb.mxu2 %v5452_v11 }
0x1149   :  { %v2627_v18 = vpop.f32.mrf.mxu1 }
0x114a   :  { %v2628_v38 = vadd.f32 %v5492_v28, %v2627_v18 }
0x114c   :  { %v2631_v17 = vrot.slane %v2628_v38, 1  ;;  %2633 = vst.msk [vmem:[#allocation13 + $0x5] sm:$0x1] %vm2507_vm2, %v2628_v38 }
0x114e   :  { %2634 = vst.msk [vmem:[#allocation13 + $0xd] sm:$0x1] %vm2507_vm2, %v2631_v17 }
0x114f   :  { %v2437_v41 = vpop.f32.mrf.mxu2 }
0x1150   :  { %v2440_v47 = vadd.f32 %v2437_v41, %v2266_v40 }
0x1152   :  { %2833 = vtanh.f32 %v2440_v47 }
0x1157   :  { %v2552_v49 = vpop.f32.mrf.mxu2 }
0x1158   :  { %v2834_v50 = vpop.eup %2833  ;;  %v2553_v63 = vadd.f32 %v5492_v28, %v2552_v49 }
0x1159   :  { %2458 = vmatmul.f32.vlgmr.msrb.gmra.mxu3 %v2834_v50  ;;  %2651 = vmatmul.f32.vlgmr.msrb.gmra.mxu2 %v2834_v50 }
0x115a   :  { %v2556_v20 = vrot.slane %v2553_v63, 1  ;;  %2558 = vst.msk [vmem:[#allocation13 + $0x2] sm:$0x1] %vm2507_vm2, %v2553_v63  ;;  %2660 = vmatpush.msrb.mxu3 %v5299_v31 }
0x115c   :  { %2559 = vst.msk [vmem:[#allocation13 + $0xa] sm:$0x1] %vm2507_vm2, %v2556_v20  ;;  %2661 = vmatpush.msrb.mxu3 %v5304_v34 }
0x115e   :  { %2662 = vmatpush.msrb.mxu3 %v5311_v37 }
0x1160   :  { %2663 = vmatpush.msrb.mxu3 %v5350_v30 }
0x1161   :  { %2576 = vmatmul.f32.vlgmr.msra.gmra.mxu3 %v5467_v23 }
0x1162   :  { %2664 = vmatpush.msrb.mxu3 %v5356_v5 }
0x1164   :  { %2665 = vmatpush.msrb.mxu3 %v5362_v6 }
0x1166   :  { %2666 = vmatpush.msrb.mxu3 %v5371_v7 }
0x1168   :  { %2667 = vmatpush.msrb.mxu3 %v5384_v33 }
0x116a   :  { %2668 = vmatpush.msrb.mxu3 %v5393_v24 }
0x116c   :  { %2669 = vmatpush.msrb.mxu3 %v5401_v26 }
0x116e   :  { %2670 = vmatpush.msrb.mxu3 %v5407_v4 }
0x1170   :  { %2671 = vmatpush.msrb.mxu3 %v5416_v56 }
0x1172   :  { %2672 = vmatpush.msrb.mxu3 %v5429_v57 }
0x1174   :  { %2673 = vmatpush.msrb.mxu3 %v5434_v3 }
0x1176   :  { %2674 = vmatpush.msrb.mxu3 %v5443_v58 }
0x1178   :  { %2675 = vmatpush.msrb.mxu3 %v5452_v11 }
0x11dc   :  { %v2459_v9 = vpop.f32.mrf.mxu3  ;;  %v2652_v42 = vpop.f32.mrf.mxu2 }
0x11dd   :  { %v2462_v31 = vadd.f32 %v2459_v9, %v2286_v51  ;;  %v2653_v34 = vadd.f32 %v5492_v28, %v2652_v42 }
0x11df   :  { %2835 = vtanh.f32 %v2462_v31  ;;  %v2656_v37 = vrot.slane %v2653_v34, 1  ;;  %2658 = vst.msk [vmem:[#allocation13 + $0x6] sm:$0x1] %vm2507_vm2, %v2653_v34 }
0x11e1   :  { %2659 = vst.msk [vmem:[#allocation13 + $0xe] sm:$0x1] %vm2507_vm2, %v2656_v37 }
0x11e4   :  { %v2577_v54 = vpop.f32.mrf.mxu3 }
0x11e5   :  { %v2836_v52 = vpop.eup %2835  ;;  %v2578_v45 = vadd.f32 %v5492_v28, %v2577_v54 }
0x11e6   :  { %2676 = vmatmul.f32.vlgmr.msrb.gmra.mxu3 %v2836_v52 }
0x11e7   :  { %v2581_v59 = vrot.slane %v2578_v45, 1  ;;  %2583 = vst.msk [vmem:[#allocation13 + $0x3] sm:$0x1] %vm2507_vm2, %v2578_v45 }
0x11e9   :  { %2584 = vst.msk [vmem:[#allocation13 + $0xb] sm:$0x1] %vm2507_vm2, %v2581_v59 }
0x1269   :  { %v2677_v32 = vpop.f32.mrf.mxu3 }
0x126a   :  { %v2678_v62 = vadd.f32 %v5492_v28, %v2677_v32 }
0x126c   :  { %v2681_v61 = vrot.slane %v2678_v62, 1  ;;  %2683 = vst.msk [vmem:[#allocation13 + $0x7] sm:$0x1] %vm2507_vm2, %v2678_v62 }
0x126e   :  { %2684 = vst.msk [vmem:[#allocation13 + $0xf] sm:$0x1] %vm2507_vm2, %v2681_v61 }
0x126f   :  { %2697 = dma.vmem_to_hbm [thread:$0]  %s2690_s9, 256, %s2692_s25, [#allocation4], %s3016_s6, %s3016_s6, %s3017_s27  }
0x1270   :  { %3013 = dma.done.wait [#allocation4], 256  }
0x1271   :  { %3014 = vsyncadd [#allocation4], 4294967040 }
0x1272   :  { %2702 = vsyncpa [#allocation3], 1 }
0x1273   :  { %2703 = vsyncpa [#allocation6], 1 }
0x1274   :  { %2704 = vsyncpa [#allocation9], 1 }
0x1275   :  { %2705 = vsyncpa [#allocation12], 1 }
0x1276   :  { %2706 = vsyncpa [#allocation4], 1 }

</bundles_post_ra>
